<compile_context>
chip_gen: v7x
topology: tpu7x:2x2x1
jax: 0.10.0
libtpu: 0.0.40
codegen_flags: <defaults>
</compile_context>

<pallas_src>
import functools

import jax
import jax.numpy as jnp
import numpy as np
from jax.experimental import pallas as pl
from jax.experimental.pallas import tpu as pltpu

C_IN = 5             # n_frames_input * 1 input channels
C_IN_PAD = 8         # input channels zero-padded to a full sublane group
C_MID = 64
C_OUT = 2
C_OUT_PAD = 8        # output channels padded -> full-sublane MXU result/stores
_TAPS = [(kh, kw) for kh in range(3) for kw in range(3)]


def _tap_masks_np(H, W):
    """(9, H*W) float32 0/1 validity mask per 3x3 tap (fused 'SAME' padding)."""
    l = np.arange(H * W, dtype=np.int64)
    hh, ww = l // W, l % W
    rows = []
    for kh, kw in _TAPS:
        dh, dw = kh - 1, kw - 1
        ok = (hh + dh >= 0) & (hh + dh < H) & (ww + dw >= 0) & (ww + dw < W)
        rows.append(ok.astype(np.float32))
    return np.stack(rows, axis=0)


@functools.lru_cache(maxsize=None)
def _pltpu_roll_mode():
    """Pin down pltpu.roll's rotation direction vs jnp.roll with a one-off
    probe kernel.  Returns +1 (same direction), -1 (opposite), or 0 (probe
    failed / inconclusive -> fall back to jnp.roll inside the kernel)."""
    try:
        def k(x_ref, o_ref):
            o_ref[...] = pltpu.roll(x_ref[...], 3, axis=1)

        x = jnp.arange(8 * 128, dtype=jnp.float32).reshape(8, 128)
        y = pl.pallas_call(
            k, out_shape=jax.ShapeDtypeStruct((8, 128), jnp.float32))(x)
        y = np.asarray(jax.block_until_ready(y))
        xn = np.asarray(x)
        if np.array_equal(y, np.roll(xn, 3, axis=1)):
            return 1
        if np.array_equal(y, np.roll(xn, -3, axis=1)):
            return -1
    except Exception:
        pass
    return 0


def _lane_shift(act, s, X, roll_mode):
    """out[:, j] = act[:, (j + s) % X]  (== jnp.roll(act, -s, axis=1))."""
    if roll_mode == 1:        # pltpu.roll(x, k) == jnp.roll(x, k)
        return pltpu.roll(act, (-s) % X, axis=1)
    if roll_mode == -1:       # pltpu.roll(x, k) == jnp.roll(x, -k)
        return pltpu.roll(act, s % X, axis=1)
    return jnp.roll(act, -s, axis=1)


def _fused_conv_kernel(x_ref, m_ref, w1_ref, b1_ref, w2_ref, b2_ref, out_ref,
                       p1_ref, p2_ref, *, W, X, roll_mode):
    # x_ref : (C_IN_PAD, X)      X = BN*H*W, lane axis = batch-folded spatial
    # m_ref : (9, X)             0/1 tap validity (SAME padding, batch-tiled)
    # w1_ref: (C_MID, 9*C_IN_PAD)     b1_ref: (C_MID, 1)
    # w2_ref: (C_OUT_PAD, 9*C_MID)    b2_ref: (C_OUT_PAD, 1)
    # out_ref: (C_OUT_PAD, X)    lane-dense, full-sublane output block
    # p1_ref : VMEM (9*C_IN_PAD, X) scratch; p2_ref : VMEM (9*C_MID, X) scratch

    def fill_patch(p_ref, act, c):
        # Write the 9 masked, spatially shifted copies of `act` (im2col row
        # blocks) straight into the patch scratch.  Row offsets are multiples
        # of c (8 / 64), so every store is a full-sublane store.  A spatial
        # shift is a lane roll of the flattened axis; every wrapped position
        # (across a spatial row, a batch element, or the array ends) is
        # exactly an out-of-bounds tap and is zeroed by the mask.
        for t, (kh, kw) in enumerate(_TAPS):
            s = (kh - 1) * W + (kw - 1)
            if s == 0:                       # centre tap: no shift, mask == 1
                p_ref[t * c:(t + 1) * c, :] = act
            else:
                p_ref[t * c:(t + 1) * c, :] = (
                    _lane_shift(act, s, X, roll_mode) * m_ref[t:t + 1, :])

    x = x_ref[...]

    # ---- conv1: im2col, one MXU matmul (K = 9*C_IN_PAD = 72) ----
    fill_patch(p1_ref, x, C_IN_PAD)
    h = jnp.dot(w1_ref[...], p1_ref[...], preferred_element_type=jnp.float32)
    h = jnp.maximum(h + b1_ref[...], 0.0)                    # (C_MID, X)

    # ---- conv2: im2col, one MXU matmul (K = 9*C_MID = 576) ----
    fill_patch(p2_ref, h, C_MID)
    out = jnp.dot(w2_ref[...], p2_ref[...], preferred_element_type=jnp.float32)
    out_ref[...] = out + b2_ref[...]                         # (C_OUT_PAD, X)


def _default_batch_block(n_batch):
    """One grid step per TensorCore: 1 step on single-core v5e/v6e, >=2 steps
    on multi-core chips so the 'parallel' batch axis shards across cores."""
    n_tc = 1
    try:
        d = jax.devices()[0]
        for attr in ("num_cores", "core_count"):
            v = getattr(d, attr, None)
            if isinstance(v, int) and v > 0:
                n_tc = v
                break
    except Exception:
        pass
    steps = max(1, min(n_batch, n_tc))
    while n_batch % steps:
        steps -= 1
    return n_batch // steps


def advanced_video_model(x_nchw, params, *, batch_block=None):
    """Forward pass matching the PyTorch module.  x_nchw: (N, 5, H, W) f32."""
    w1, b1, w2, b2 = params     # HWIO weights: (3,3,5,64), (64,), (3,3,64,2), (2,)
    N, C, H, W = x_nchw.shape
    assert C == C_IN
    hw = H * W
    assert hw % 128 == 0, "H*W must be a multiple of 128 (lane-dense layout)"
    BN = batch_block if batch_block is not None else _default_batch_block(N)
    assert N % BN == 0
    steps = N // BN
    X = BN * hw

    # Channel-major flatten, tiny channel pad (5 -> 8), fold BN batch elements
    # into the lane axis: (steps, C_IN_PAD, BN*hw).
    x_flat = jnp.pad(x_nchw.reshape(N, C_IN, hw),
                     ((0, 0), (0, C_IN_PAD - C_IN), (0, 0)))
    x_fold = (x_flat.reshape(steps, BN, C_IN_PAD, hw)
              .transpose(0, 2, 1, 3)
              .reshape(steps, C_IN_PAD, X))

    # im2col weight matrices, K ordered tap-major then channel; biases as
    # columns; conv2 output channels padded 2 -> 8 (full-sublane stores).
    w1p = jnp.pad(w1, ((0, 0), (0, 0), (0, C_IN_PAD - C_IN), (0, 0)))
    w1m = w1p.reshape(9 * C_IN_PAD, C_MID).T                      # (64, 72)
    w2m = jnp.pad(w2.reshape(9 * C_MID, C_OUT).T,
                  ((0, C_OUT_PAD - C_OUT), (0, 0)))               # (8, 576)
    b1c = b1.reshape(C_MID, 1)
    b2c = jnp.pad(b2.reshape(C_OUT, 1), ((0, C_OUT_PAD - C_OUT), (0, 0)))
    # Tap-validity mask, tiled across the folded batch ONCE here (not per tap
    # inside the kernel).
    masks = jnp.asarray(np.tile(_tap_masks_np(H, W), (1, BN)))    # (9, X)

    kernel = functools.partial(_fused_conv_kernel, W=W, X=X,
                               roll_mode=_pltpu_roll_mode())

    out_fold = pl.pallas_call(
        kernel,
        out_shape=jax.ShapeDtypeStruct((steps, C_OUT_PAD, X), jnp.float32),
        grid_spec=pltpu.PrefetchScalarGridSpec(
            num_scalar_prefetch=0,
            grid=(steps,),
            in_specs=[
                pl.BlockSpec((None, C_IN_PAD, X), lambda i: (i, 0, 0)),
                pl.BlockSpec((9, X), lambda i: (0, 0)),
                pl.BlockSpec((C_MID, 9 * C_IN_PAD), lambda i: (0, 0)),
                pl.BlockSpec((C_MID, 1), lambda i: (0, 0)),
                pl.BlockSpec((C_OUT_PAD, 9 * C_MID), lambda i: (0, 0)),
                pl.BlockSpec((C_OUT_PAD, 1), lambda i: (0, 0)),
            ],
            out_specs=pl.BlockSpec((None, C_OUT_PAD, X), lambda i: (i, 0, 0)),
            scratch_shapes=[
                pltpu.VMEM((9 * C_IN_PAD, X), jnp.float32),   # conv1 patch
                pltpu.VMEM((9 * C_MID, X), jnp.float32),      # conv2 patch
            ]),
        compiler_params=pltpu.CompilerParams(
            dimension_semantics=("parallel",)),
    )(x_fold, masks, w1m, b1c, w2m, b2c)

    # Unfold batch from lanes, drop the channel padding; already channel-major.
    out = (out_fold.reshape(steps, C_OUT_PAD, BN, hw)
           .transpose(0, 2, 1, 3)
           .reshape(N, C_OUT_PAD, hw)[:, :C_OUT, :])
    return out.reshape(N, C_OUT, H, W)


def _reference_forward(x_nchw, params):
    """Plain-JAX reference (lax.conv) for the correctness check."""
    w1, b1, w2, b2 = params
    x = jnp.transpose(x_nchw, (0, 2, 3, 1))
    dn = ('NHWC', 'HWIO', 'NHWC')
    y = jax.lax.conv_general_dilated(x, w1, (1, 1), 'SAME',
                                     dimension_numbers=dn) + b1
    y = jnp.maximum(y, 0.0)
    y = jax.lax.conv_general_dilated(y, w2, (1, 1), 'SAME',
                                     dimension_numbers=dn) + b2
    return jnp.transpose(y, (0, 3, 1, 2))


def _init_params():
    """Deterministic synthetic parameters (HWIO weight layout)."""
    k = jax.random.PRNGKey(0)
    k1, k2, k3, k4 = jax.random.split(k, 4)
    w1 = 0.1 * jax.random.normal(k1, (3, 3, C_IN, C_MID), jnp.float32)
    b1 = 0.1 * jax.random.normal(k2, (C_MID,), jnp.float32)
    w2 = 0.1 * jax.random.normal(k3, (3, 3, C_MID, C_OUT), jnp.float32)
    b2 = 0.1 * jax.random.normal(k4, (2,), jnp.float32)
    return w1, b1, w2, b2


if __name__ == "__main__":
    params = _init_params()
    key = jax.random.PRNGKey(0)
    # n_frames_input=5 -> 5 input channels; small spatial size
    x = jax.random.normal(key, (2, C_IN, 16, 16), jnp.float32)

    ref = jax.block_until_ready(_reference_forward(x, params))

    fwd = jax.jit(advanced_video_model, static_argnames=("batch_block",))
    # Exercise the device-default BN plus both BN=1 (multi-step grid) and
    # BN=2 (batch folded into lanes, single step) against the reference.
    for bn in (None, 1, 2):
        out = jax.block_until_ready(fwd(x, params, batch_block=bn))
        assert out.shape == (2, C_OUT, 16, 16), out.shape
        max_err = float(jnp.max(jnp.abs(out - ref)))
        assert jnp.allclose(out, ref, atol=1e-4, rtol=1e-4), (
            f"batch_block={bn}: mismatch vs reference, max abs err = {max_err}")
    print("KERNEL_OK")
</pallas_src>

<mosaic_0001>
module attributes {stable_mosaic.version = 11 : i64} {
  func.func @_fused_conv_kernel(%arg0: i32, %arg1: memref<1x8x512xf32, #tpu.memory_space<vmem>>, %arg2: memref<9x512xf32, #tpu.memory_space<vmem>>, %arg3: memref<64x72xf32, #tpu.memory_space<vmem>>, %arg4: memref<64x1xf32, #tpu.memory_space<vmem>>, %arg5: memref<8x576xf32, #tpu.memory_space<vmem>>, %arg6: memref<8x1xf32, #tpu.memory_space<vmem>>, %arg7: memref<1x8x512xf32, #tpu.memory_space<vmem>>, %arg8: memref<72x512xf32, #tpu.memory_space<vmem>>, %arg9: memref<576x512xf32, #tpu.memory_space<vmem>>) attributes {dimension_semantics = [#tpu.dimension_semantics<parallel>], iteration_bounds = array<i64: 1>, scalar_prefetch = 0 : i64, scratch_operands = 2 : i64, tpu.core_type = #tpu.core_type<tc>, window_params = [{transform_indices = @transform_0, window_bounds = array<i64: 1, 8, 512>}, {pipeline_mode = #tpu.pipeline_mode<synchronous>, transform_indices = @transform_1, window_bounds = array<i64: 9, 512>}, {pipeline_mode = #tpu.pipeline_mode<synchronous>, transform_indices = @transform_2, window_bounds = array<i64: 64, 72>}, {pipeline_mode = #tpu.pipeline_mode<synchronous>, transform_indices = @transform_3, window_bounds = array<i64: 64, 1>}, {pipeline_mode = #tpu.pipeline_mode<synchronous>, transform_indices = @transform_4, window_bounds = array<i64: 8, 576>}, {pipeline_mode = #tpu.pipeline_mode<synchronous>, transform_indices = @transform_5, window_bounds = array<i64: 8, 1>}, {transform_indices = @transform_6, window_bounds = array<i64: 1, 8, 512>}]} {
    %c0 = arith.constant 0 : index
    %c0_0 = arith.constant 0 : index
    %c0_1 = arith.constant 0 : index
    %0 = vector.load %arg1[%c0, %c0_0, %c0_1] : memref<1x8x512xf32, #tpu.memory_space<vmem>>, vector<1x8x512xf32>
    %1 = vector.shape_cast %0 : vector<1x8x512xf32> to vector<8x512xf32>
    %2 = vector.extract_strided_slice %1 {offsets = [0, 495], sizes = [8, 17], strides = [1, 1]} : vector<8x512xf32> to vector<8x17xf32>
    %3 = vector.extract_strided_slice %1 {offsets = [0, 0], sizes = [8, 495], strides = [1, 1]} : vector<8x512xf32> to vector<8x495xf32>
    %4 = tpu.concatenate %2, %3 in 1 : vector<8x17xf32>, vector<8x495xf32> -> vector<8x512xf32>
    %c0_2 = arith.constant 0 : index
    %c0_3 = arith.constant 0 : index
    %5 = vector.load %arg2[%c0_2, %c0_3] : memref<9x512xf32, #tpu.memory_space<vmem>>, vector<1x512xf32>
    %6 = vector.broadcast %5 : vector<1x512xf32> to vector<8x512xf32>
    %7 = arith.mulf %4, %6 : vector<8x512xf32>
    %c0_4 = arith.constant 0 : index
    %c0_5 = arith.constant 0 : index
    %8 = vector.load %arg8[%c0_4, %c0_5] : memref<72x512xf32, #tpu.memory_space<vmem>>, vector<8x512xf32>
    tpu.vector_store %arg8[%c0_4, %c0_5], %7 {strides = array<i32>} : memref<72x512xf32, #tpu.memory_space<vmem>>, vector<8x512xf32>,
    %9 = vector.extract_strided_slice %1 {offsets = [0, 496], sizes = [8, 16], strides = [1, 1]} : vector<8x512xf32> to vector<8x16xf32>
    %10 = vector.extract_strided_slice %1 {offsets = [0, 0], sizes = [8, 496], strides = [1, 1]} : vector<8x512xf32> to vector<8x496xf32>
    %11 = tpu.concatenate %9, %10 in 1 : vector<8x16xf32>, vector<8x496xf32> -> vector<8x512xf32>
    %c1 = arith.constant 1 : index
    %c0_6 = arith.constant 0 : index
    %12 = vector.load %arg2[%c1, %c0_6] : memref<9x512xf32, #tpu.memory_space<vmem>>, vector<1x512xf32>
    %13 = vector.broadcast %12 : vector<1x512xf32> to vector<8x512xf32>
    %14 = arith.mulf %11, %13 : vector<8x512xf32>
    %c8 = arith.constant 8 : index
    %c0_7 = arith.constant 0 : index
    %15 = vector.load %arg8[%c8, %c0_7] : memref<72x512xf32, #tpu.memory_space<vmem>>, vector<8x512xf32>
    tpu.vector_store %arg8[%c8, %c0_7], %14 {strides = array<i32>} : memref<72x512xf32, #tpu.memory_space<vmem>>, vector<8x512xf32>,
    %16 = vector.extract_strided_slice %1 {offsets = [0, 497], sizes = [8, 15], strides = [1, 1]} : vector<8x512xf32> to vector<8x15xf32>
    %17 = vector.extract_strided_slice %1 {offsets = [0, 0], sizes = [8, 497], strides = [1, 1]} : vector<8x512xf32> to vector<8x497xf32>
    %18 = tpu.concatenate %16, %17 in 1 : vector<8x15xf32>, vector<8x497xf32> -> vector<8x512xf32>
    %c2 = arith.constant 2 : index
    %c0_8 = arith.constant 0 : index
    %19 = vector.load %arg2[%c2, %c0_8] : memref<9x512xf32, #tpu.memory_space<vmem>>, vector<1x512xf32>
    %20 = vector.broadcast %19 : vector<1x512xf32> to vector<8x512xf32>
    %21 = arith.mulf %18, %20 : vector<8x512xf32>
    %c16 = arith.constant 16 : index
    %c0_9 = arith.constant 0 : index
    %22 = vector.load %arg8[%c16, %c0_9] : memref<72x512xf32, #tpu.memory_space<vmem>>, vector<8x512xf32>
    tpu.vector_store %arg8[%c16, %c0_9], %21 {strides = array<i32>} : memref<72x512xf32, #tpu.memory_space<vmem>>, vector<8x512xf32>,
    %23 = vector.extract_strided_slice %1 {offsets = [0, 511], sizes = [8, 1], strides = [1, 1]} : vector<8x512xf32> to vector<8x1xf32>
    %24 = vector.extract_strided_slice %1 {offsets = [0, 0], sizes = [8, 511], strides = [1, 1]} : vector<8x512xf32> to vector<8x511xf32>
    %25 = tpu.concatenate %23, %24 in 1 : vector<8x1xf32>, vector<8x511xf32> -> vector<8x512xf32>
    %c3 = arith.constant 3 : index
    %c0_10 = arith.constant 0 : index
    %26 = vector.load %arg2[%c3, %c0_10] : memref<9x512xf32, #tpu.memory_space<vmem>>, vector<1x512xf32>
    %27 = vector.broadcast %26 : vector<1x512xf32> to vector<8x512xf32>
    %28 = arith.mulf %25, %27 : vector<8x512xf32>
    %c24 = arith.constant 24 : index
    %c0_11 = arith.constant 0 : index
    %29 = vector.load %arg8[%c24, %c0_11] : memref<72x512xf32, #tpu.memory_space<vmem>>, vector<8x512xf32>
    tpu.vector_store %arg8[%c24, %c0_11], %28 {strides = array<i32>} : memref<72x512xf32, #tpu.memory_space<vmem>>, vector<8x512xf32>,
    %c32 = arith.constant 32 : index
    %c0_12 = arith.constant 0 : index
    %30 = vector.load %arg8[%c32, %c0_12] : memref<72x512xf32, #tpu.memory_space<vmem>>, vector<8x512xf32>
    tpu.vector_store %arg8[%c32, %c0_12], %1 {strides = array<i32>} : memref<72x512xf32, #tpu.memory_space<vmem>>, vector<8x512xf32>,
    %31 = vector.extract_strided_slice %1 {offsets = [0, 1], sizes = [8, 511], strides = [1, 1]} : vector<8x512xf32> to vector<8x511xf32>
    %32 = vector.extract_strided_slice %1 {offsets = [0, 0], sizes = [8, 1], strides = [1, 1]} : vector<8x512xf32> to vector<8x1xf32>
    %33 = tpu.concatenate %31, %32 in 1 : vector<8x511xf32>, vector<8x1xf32> -> vector<8x512xf32>
    %c5 = arith.constant 5 : index
    %c0_13 = arith.constant 0 : index
    %34 = vector.load %arg2[%c5, %c0_13] : memref<9x512xf32, #tpu.memory_space<vmem>>, vector<1x512xf32>
    %35 = vector.broadcast %34 : vector<1x512xf32> to vector<8x512xf32>
    %36 = arith.mulf %33, %35 : vector<8x512xf32>
    %c40 = arith.constant 40 : index
    %c0_14 = arith.constant 0 : index
    %37 = vector.load %arg8[%c40, %c0_14] : memref<72x512xf32, #tpu.memory_space<vmem>>, vector<8x512xf32>
    tpu.vector_store %arg8[%c40, %c0_14], %36 {strides = array<i32>} : memref<72x512xf32, #tpu.memory_space<vmem>>, vector<8x512xf32>,
    %38 = vector.extract_strided_slice %1 {offsets = [0, 15], sizes = [8, 497], strides = [1, 1]} : vector<8x512xf32> to vector<8x497xf32>
    %39 = vector.extract_strided_slice %1 {offsets = [0, 0], sizes = [8, 15], strides = [1, 1]} : vector<8x512xf32> to vector<8x15xf32>
    %40 = tpu.concatenate %38, %39 in 1 : vector<8x497xf32>, vector<8x15xf32> -> vector<8x512xf32>
    %c6 = arith.constant 6 : index
    %c0_15 = arith.constant 0 : index
    %41 = vector.load %arg2[%c6, %c0_15] : memref<9x512xf32, #tpu.memory_space<vmem>>, vector<1x512xf32>
    %42 = vector.broadcast %41 : vector<1x512xf32> to vector<8x512xf32>
    %43 = arith.mulf %40, %42 : vector<8x512xf32>
    %c48 = arith.constant 48 : index
    %c0_16 = arith.constant 0 : index
    %44 = vector.load %arg8[%c48, %c0_16] : memref<72x512xf32, #tpu.memory_space<vmem>>, vector<8x512xf32>
    tpu.vector_store %arg8[%c48, %c0_16], %43 {strides = array<i32>} : memref<72x512xf32, #tpu.memory_space<vmem>>, vector<8x512xf32>,
    %45 = vector.extract_strided_slice %1 {offsets = [0, 16], sizes = [8, 496], strides = [1, 1]} : vector<8x512xf32> to vector<8x496xf32>
    %46 = vector.extract_strided_slice %1 {offsets = [0, 0], sizes = [8, 16], strides = [1, 1]} : vector<8x512xf32> to vector<8x16xf32>
    %47 = tpu.concatenate %45, %46 in 1 : vector<8x496xf32>, vector<8x16xf32> -> vector<8x512xf32>
    %c7 = arith.constant 7 : index
    %c0_17 = arith.constant 0 : index
    %48 = vector.load %arg2[%c7, %c0_17] : memref<9x512xf32, #tpu.memory_space<vmem>>, vector<1x512xf32>
    %49 = vector.broadcast %48 : vector<1x512xf32> to vector<8x512xf32>
    %50 = arith.mulf %47, %49 : vector<8x512xf32>
    %c56 = arith.constant 56 : index
    %c0_18 = arith.constant 0 : index
    %51 = vector.load %arg8[%c56, %c0_18] : memref<72x512xf32, #tpu.memory_space<vmem>>, vector<8x512xf32>
    tpu.vector_store %arg8[%c56, %c0_18], %50 {strides = array<i32>} : memref<72x512xf32, #tpu.memory_space<vmem>>, vector<8x512xf32>,
    %52 = vector.extract_strided_slice %1 {offsets = [0, 17], sizes = [8, 495], strides = [1, 1]} : vector<8x512xf32> to vector<8x495xf32>
    %53 = vector.extract_strided_slice %1 {offsets = [0, 0], sizes = [8, 17], strides = [1, 1]} : vector<8x512xf32> to vector<8x17xf32>
    %54 = tpu.concatenate %52, %53 in 1 : vector<8x495xf32>, vector<8x17xf32> -> vector<8x512xf32>
    %c8_19 = arith.constant 8 : index
    %c0_20 = arith.constant 0 : index
    %55 = vector.load %arg2[%c8_19, %c0_20] : memref<9x512xf32, #tpu.memory_space<vmem>>, vector<1x512xf32>
    %56 = vector.broadcast %55 : vector<1x512xf32> to vector<8x512xf32>
    %57 = arith.mulf %54, %56 : vector<8x512xf32>
    %c64 = arith.constant 64 : index
    %c0_21 = arith.constant 0 : index
    %58 = vector.load %arg8[%c64, %c0_21] : memref<72x512xf32, #tpu.memory_space<vmem>>, vector<8x512xf32>
    tpu.vector_store %arg8[%c64, %c0_21], %57 {strides = array<i32>} : memref<72x512xf32, #tpu.memory_space<vmem>>, vector<8x512xf32>,
    %c0_22 = arith.constant 0 : index
    %c0_23 = arith.constant 0 : index
    %59 = vector.load %arg3[%c0_22, %c0_23] : memref<64x72xf32, #tpu.memory_space<vmem>>, vector<64x72xf32>
    %c0_24 = arith.constant 0 : index
    %c0_25 = arith.constant 0 : index
    %60 = vector.load %arg8[%c0_24, %c0_25] : memref<72x512xf32, #tpu.memory_space<vmem>>, vector<72x512xf32>
    %cst = arith.constant dense<0.000000e+00> : vector<64x512xf32>
    %61 = tpu.matmul %59, %60, %cst {dimension_numbers = #tpu.dot_dimension_numbers<[1], [0], [0], [1], [0, 0, 1, 1], [], []>} : vector<64x72xf32>, vector<72x512xf32>, vector<64x512xf32> -> vector<64x512xf32>
    %c0_26 = arith.constant 0 : index
    %c0_27 = arith.constant 0 : index
    %62 = vector.load %arg4[%c0_26, %c0_27] : memref<64x1xf32, #tpu.memory_space<vmem>>, vector<64x1xf32>
    %63 = vector.broadcast %62 : vector<64x1xf32> to vector<64x512xf32>
    %64 = arith.addf %61, %63 : vector<64x512xf32>
    %cst_28 = arith.constant 0.000000e+00 : f32
    %65 = vector.broadcast %cst_28 : f32 to vector<64x512xf32>
    %66 = arith.maximumf %64, %65 : vector<64x512xf32>
    %67 = vector.extract_strided_slice %66 {offsets = [0, 495], sizes = [64, 17], strides = [1, 1]} : vector<64x512xf32> to vector<64x17xf32>
    %68 = vector.extract_strided_slice %66 {offsets = [0, 0], sizes = [64, 495], strides = [1, 1]} : vector<64x512xf32> to vector<64x495xf32>
    %69 = tpu.concatenate %67, %68 in 1 : vector<64x17xf32>, vector<64x495xf32> -> vector<64x512xf32>
    %c0_29 = arith.constant 0 : index
    %c0_30 = arith.constant 0 : index
    %70 = vector.load %arg2[%c0_29, %c0_30] : memref<9x512xf32, #tpu.memory_space<vmem>>, vector<1x512xf32>
    %71 = vector.broadcast %70 : vector<1x512xf32> to vector<64x512xf32>
    %72 = arith.mulf %69, %71 : vector<64x512xf32>
    %c0_31 = arith.constant 0 : index
    %c0_32 = arith.constant 0 : index
    %73 = vector.load %arg9[%c0_31, %c0_32] : memref<576x512xf32, #tpu.memory_space<vmem>>, vector<64x512xf32>
    tpu.vector_store %arg9[%c0_31, %c0_32], %72 {strides = array<i32>} : memref<576x512xf32, #tpu.memory_space<vmem>>, vector<64x512xf32>,
    %74 = vector.extract_strided_slice %66 {offsets = [0, 496], sizes = [64, 16], strides = [1, 1]} : vector<64x512xf32> to vector<64x16xf32>
    %75 = vector.extract_strided_slice %66 {offsets = [0, 0], sizes = [64, 496], strides = [1, 1]} : vector<64x512xf32> to vector<64x496xf32>
    %76 = tpu.concatenate %74, %75 in 1 : vector<64x16xf32>, vector<64x496xf32> -> vector<64x512xf32>
    %c1_33 = arith.constant 1 : index
    %c0_34 = arith.constant 0 : index
    %77 = vector.load %arg2[%c1_33, %c0_34] : memref<9x512xf32, #tpu.memory_space<vmem>>, vector<1x512xf32>
    %78 = vector.broadcast %77 : vector<1x512xf32> to vector<64x512xf32>
    %79 = arith.mulf %76, %78 : vector<64x512xf32>
    %c64_35 = arith.constant 64 : index
    %c0_36 = arith.constant 0 : index
    %80 = vector.load %arg9[%c64_35, %c0_36] : memref<576x512xf32, #tpu.memory_space<vmem>>, vector<64x512xf32>
    tpu.vector_store %arg9[%c64_35, %c0_36], %79 {strides = array<i32>} : memref<576x512xf32, #tpu.memory_space<vmem>>, vector<64x512xf32>,
    %81 = vector.extract_strided_slice %66 {offsets = [0, 497], sizes = [64, 15], strides = [1, 1]} : vector<64x512xf32> to vector<64x15xf32>
    %82 = vector.extract_strided_slice %66 {offsets = [0, 0], sizes = [64, 497], strides = [1, 1]} : vector<64x512xf32> to vector<64x497xf32>
    %83 = tpu.concatenate %81, %82 in 1 : vector<64x15xf32>, vector<64x497xf32> -> vector<64x512xf32>
    %c2_37 = arith.constant 2 : index
    %c0_38 = arith.constant 0 : index
    %84 = vector.load %arg2[%c2_37, %c0_38] : memref<9x512xf32, #tpu.memory_space<vmem>>, vector<1x512xf32>
    %85 = vector.broadcast %84 : vector<1x512xf32> to vector<64x512xf32>
    %86 = arith.mulf %83, %85 : vector<64x512xf32>
    %c128 = arith.constant 128 : index
    %c0_39 = arith.constant 0 : index
    %87 = vector.load %arg9[%c128, %c0_39] : memref<576x512xf32, #tpu.memory_space<vmem>>, vector<64x512xf32>
    tpu.vector_store %arg9[%c128, %c0_39], %86 {strides = array<i32>} : memref<576x512xf32, #tpu.memory_space<vmem>>, vector<64x512xf32>,
    %88 = vector.extract_strided_slice %66 {offsets = [0, 511], sizes = [64, 1], strides = [1, 1]} : vector<64x512xf32> to vector<64x1xf32>
    %89 = vector.extract_strided_slice %66 {offsets = [0, 0], sizes = [64, 511], strides = [1, 1]} : vector<64x512xf32> to vector<64x511xf32>
    %90 = tpu.concatenate %88, %89 in 1 : vector<64x1xf32>, vector<64x511xf32> -> vector<64x512xf32>
    %c3_40 = arith.constant 3 : index
    %c0_41 = arith.constant 0 : index
    %91 = vector.load %arg2[%c3_40, %c0_41] : memref<9x512xf32, #tpu.memory_space<vmem>>, vector<1x512xf32>
    %92 = vector.broadcast %91 : vector<1x512xf32> to vector<64x512xf32>
    %93 = arith.mulf %90, %92 : vector<64x512xf32>
    %c192 = arith.constant 192 : index
    %c0_42 = arith.constant 0 : index
    %94 = vector.load %arg9[%c192, %c0_42] : memref<576x512xf32, #tpu.memory_space<vmem>>, vector<64x512xf32>
    tpu.vector_store %arg9[%c192, %c0_42], %93 {strides = array<i32>} : memref<576x512xf32, #tpu.memory_space<vmem>>, vector<64x512xf32>,
    %c256 = arith.constant 256 : index
    %c0_43 = arith.constant 0 : index
    %95 = vector.load %arg9[%c256, %c0_43] : memref<576x512xf32, #tpu.memory_space<vmem>>, vector<64x512xf32>
    tpu.vector_store %arg9[%c256, %c0_43], %66 {strides = array<i32>} : memref<576x512xf32, #tpu.memory_space<vmem>>, vector<64x512xf32>,
    %96 = vector.extract_strided_slice %66 {offsets = [0, 1], sizes = [64, 511], strides = [1, 1]} : vector<64x512xf32> to vector<64x511xf32>
    %97 = vector.extract_strided_slice %66 {offsets = [0, 0], sizes = [64, 1], strides = [1, 1]} : vector<64x512xf32> to vector<64x1xf32>
    %98 = tpu.concatenate %96, %97 in 1 : vector<64x511xf32>, vector<64x1xf32> -> vector<64x512xf32>
    %c5_44 = arith.constant 5 : index
    %c0_45 = arith.constant 0 : index
    %99 = vector.load %arg2[%c5_44, %c0_45] : memref<9x512xf32, #tpu.memory_space<vmem>>, vector<1x512xf32>
    %100 = vector.broadcast %99 : vector<1x512xf32> to vector<64x512xf32>
    %101 = arith.mulf %98, %100 : vector<64x512xf32>
    %c320 = arith.constant 320 : index
    %c0_46 = arith.constant 0 : index
    %102 = vector.load %arg9[%c320, %c0_46] : memref<576x512xf32, #tpu.memory_space<vmem>>, vector<64x512xf32>
    tpu.vector_store %arg9[%c320, %c0_46], %101 {strides = array<i32>} : memref<576x512xf32, #tpu.memory_space<vmem>>, vector<64x512xf32>,
    %103 = vector.extract_strided_slice %66 {offsets = [0, 15], sizes = [64, 497], strides = [1, 1]} : vector<64x512xf32> to vector<64x497xf32>
    %104 = vector.extract_strided_slice %66 {offsets = [0, 0], sizes = [64, 15], strides = [1, 1]} : vector<64x512xf32> to vector<64x15xf32>
    %105 = tpu.concatenate %103, %104 in 1 : vector<64x497xf32>, vector<64x15xf32> -> vector<64x512xf32>
    %c6_47 = arith.constant 6 : index
    %c0_48 = arith.constant 0 : index
    %106 = vector.load %arg2[%c6_47, %c0_48] : memref<9x512xf32, #tpu.memory_space<vmem>>, vector<1x512xf32>
    %107 = vector.broadcast %106 : vector<1x512xf32> to vector<64x512xf32>
    %108 = arith.mulf %105, %107 : vector<64x512xf32>
    %c384 = arith.constant 384 : index
    %c0_49 = arith.constant 0 : index
    %109 = vector.load %arg9[%c384, %c0_49] : memref<576x512xf32, #tpu.memory_space<vmem>>, vector<64x512xf32>
    tpu.vector_store %arg9[%c384, %c0_49], %108 {strides = array<i32>} : memref<576x512xf32, #tpu.memory_space<vmem>>, vector<64x512xf32>,
    %110 = vector.extract_strided_slice %66 {offsets = [0, 16], sizes = [64, 496], strides = [1, 1]} : vector<64x512xf32> to vector<64x496xf32>
    %111 = vector.extract_strided_slice %66 {offsets = [0, 0], sizes = [64, 16], strides = [1, 1]} : vector<64x512xf32> to vector<64x16xf32>
    %112 = tpu.concatenate %110, %111 in 1 : vector<64x496xf32>, vector<64x16xf32> -> vector<64x512xf32>
    %c7_50 = arith.constant 7 : index
    %c0_51 = arith.constant 0 : index
    %113 = vector.load %arg2[%c7_50, %c0_51] : memref<9x512xf32, #tpu.memory_space<vmem>>, vector<1x512xf32>
    %114 = vector.broadcast %113 : vector<1x512xf32> to vector<64x512xf32>
    %115 = arith.mulf %112, %114 : vector<64x512xf32>
    %c448 = arith.constant 448 : index
    %c0_52 = arith.constant 0 : index
    %116 = vector.load %arg9[%c448, %c0_52] : memref<576x512xf32, #tpu.memory_space<vmem>>, vector<64x512xf32>
    tpu.vector_store %arg9[%c448, %c0_52], %115 {strides = array<i32>} : memref<576x512xf32, #tpu.memory_space<vmem>>, vector<64x512xf32>,
    %117 = vector.extract_strided_slice %66 {offsets = [0, 17], sizes = [64, 495], strides = [1, 1]} : vector<64x512xf32> to vector<64x495xf32>
    %118 = vector.extract_strided_slice %66 {offsets = [0, 0], sizes = [64, 17], strides = [1, 1]} : vector<64x512xf32> to vector<64x17xf32>
    %119 = tpu.concatenate %117, %118 in 1 : vector<64x495xf32>, vector<64x17xf32> -> vector<64x512xf32>
    %c8_53 = arith.constant 8 : index
    %c0_54 = arith.constant 0 : index
    %120 = vector.load %arg2[%c8_53, %c0_54] : memref<9x512xf32, #tpu.memory_space<vmem>>, vector<1x512xf32>
    %121 = vector.broadcast %120 : vector<1x512xf32> to vector<64x512xf32>
    %122 = arith.mulf %119, %121 : vector<64x512xf32>
    %c512 = arith.constant 512 : index
    %c0_55 = arith.constant 0 : index
    %123 = vector.load %arg9[%c512, %c0_55] : memref<576x512xf32, #tpu.memory_space<vmem>>, vector<64x512xf32>
    tpu.vector_store %arg9[%c512, %c0_55], %122 {strides = array<i32>} : memref<576x512xf32, #tpu.memory_space<vmem>>, vector<64x512xf32>,
    %c0_56 = arith.constant 0 : index
    %c0_57 = arith.constant 0 : index
    %124 = vector.load %arg5[%c0_56, %c0_57] : memref<8x576xf32, #tpu.memory_space<vmem>>, vector<8x576xf32>
    %c0_58 = arith.constant 0 : index
    %c0_59 = arith.constant 0 : index
    %125 = vector.load %arg9[%c0_58, %c0_59] : memref<576x512xf32, #tpu.memory_space<vmem>>, vector<576x512xf32>
    %cst_60 = arith.constant dense<0.000000e+00> : vector<8x512xf32>
    %126 = tpu.matmul %124, %125, %cst_60 {dimension_numbers = #tpu.dot_dimension_numbers<[1], [0], [0], [1], [0, 0, 1, 1], [], []>} : vector<8x576xf32>, vector<576x512xf32>, vector<8x512xf32> -> vector<8x512xf32>
    %c0_61 = arith.constant 0 : index
    %c0_62 = arith.constant 0 : index
    %127 = vector.load %arg6[%c0_61, %c0_62] : memref<8x1xf32, #tpu.memory_space<vmem>>, vector<8x1xf32>
    %128 = vector.broadcast %127 : vector<8x1xf32> to vector<8x512xf32>
    %129 = arith.addf %126, %128 : vector<8x512xf32>
    %c0_63 = arith.constant 0 : index
    %c0_64 = arith.constant 0 : index
    %c0_65 = arith.constant 0 : index
    %130 = vector.load %arg7[%c0_63, %c0_64, %c0_65] : memref<1x8x512xf32, #tpu.memory_space<vmem>>, vector<1x8x512xf32>
    %131 = vector.shape_cast %130 : vector<1x8x512xf32> to vector<8x512xf32>
    %132 = vector.shape_cast %129 : vector<8x512xf32> to vector<1x8x512xf32>
    tpu.vector_store %arg7[%c0_63, %c0_64, %c0_65], %132 {strides = array<i32>} : memref<1x8x512xf32, #tpu.memory_space<vmem>>, vector<1x8x512xf32>,
    return
  }
  func.func @transform_0(%arg0: i32) -> (i32, i32, i32) {
    %c0_i32 = arith.constant 0 : i32
    %c0_i32_0 = arith.constant 0 : i32
    %c0_i32_1 = arith.constant 0 : i32
    return %arg0, %c0_i32, %c0_i32_0 : i32, i32, i32
  }
  func.func @transform_1(%arg0: i32) -> (i32, i32) {
    %c0_i32 = arith.constant 0 : i32
    %c0_i32_0 = arith.constant 0 : i32
    %c0_i32_1 = arith.constant 0 : i32
    return %c0_i32, %c0_i32_0 : i32, i32
  }
  func.func @transform_2(%arg0: i32) -> (i32, i32) {
    %c0_i32 = arith.constant 0 : i32
    %c0_i32_0 = arith.constant 0 : i32
    %c0_i32_1 = arith.constant 0 : i32
    return %c0_i32, %c0_i32_0 : i32, i32
  }
  func.func @transform_3(%arg0: i32) -> (i32, i32) {
    %c0_i32 = arith.constant 0 : i32
    %c0_i32_0 = arith.constant 0 : i32
    %c0_i32_1 = arith.constant 0 : i32
    return %c0_i32, %c0_i32_0 : i32, i32
  }
  func.func @transform_4(%arg0: i32) -> (i32, i32) {
    %c0_i32 = arith.constant 0 : i32
    %c0_i32_0 = arith.constant 0 : i32
    %c0_i32_1 = arith.constant 0 : i32
    return %c0_i32, %c0_i32_0 : i32, i32
  }
  func.func @transform_5(%arg0: i32) -> (i32, i32) {
    %c0_i32 = arith.constant 0 : i32
    %c0_i32_0 = arith.constant 0 : i32
    %c0_i32_1 = arith.constant 0 : i32
    return %c0_i32, %c0_i32_0 : i32, i32
  }
  func.func @transform_6(%arg0: i32) -> (i32, i32, i32) {
    %c0_i32 = arith.constant 0 : i32
    %c0_i32_0 = arith.constant 0 : i32
    %c0_i32_1 = arith.constant 0 : i32
    return %arg0, %c0_i32, %c0_i32_0 : i32, i32, i32
  }
}

</mosaic_0001>

<bundles_post_ra>
// kernel: advanced_video_model.1
= control target key start
LH: loop header
LB: loop body
LE: loop exit
PB: predicated region body
PF: predicated region fallthrough
CT: control target
= control target key end

     0   :  { %s3754_s25 = smov 17   ;;  %s3755_s30 = smov 16   ;;  %v6466_v4 = vmov 0.0   ;;  %v3763_v5 = vmov 0   ;;  %v51_v14 = vlaneseq  ;;  %vm40_vm0 = vcmask 138240   ;;  %s6459_s0 = inlined_call_operand.vmem [shape: f32[1,8,512], index: 0, kind: input, shape index: {}]   ;;  %s6460_s3 = inlined_call_operand.vmem [shape: f32[64,1], index: 3, kind: input, shape index: {}]   ;;  %s6461_s1 = inlined_call_operand.vmem [shape: f32[9,512], index: 1, kind: input, shape index: {}]   ;;  %s6462_s2 = inlined_call_operand.vmem [shape: f32[64,72], index: 2, kind: input, shape index: {}]   ;;  %s6463_s4 = inlined_call_operand.vmem [shape: f32[8,576], index: 4, kind: input, shape index: {}]   ;;  %s6464_s5 = inlined_call_operand.vmem [shape: f32[8,1], index: 5, kind: input, shape index: {}]   ;;  %s6465_s6 = inlined_call_operand.vmem [shape: f32[1,8,512], index: 6, kind: output, shape index: {}]  }
   0x1   :  { %v3802_v0 = vld [vmem:[%s6459_s0 + $0x18] sm:$0xff]  ;;  %v3807_v1 = vld [vmem:[%s6459_s0 + $0x8] sm:$0xff]  ;;  %v3816_v2 = vld [vmem:[%s6459_s0 + $0x10] sm:$0xff]  ;;  %s3757_s7 = smov 1   ;;  %s3758_s8 = smov 127   ;;  %607 = vmatprep.mubr.f32.mxu0 %v6466_v4  ;;  %720 = vmatprep.mubr.f32.mxu1 %v6466_v4  ;;  %vm88_vm1 = vcmask 130048  }
   0x2   :  { %28 = vrot.lane.b32.xlu0 %v3802_v0, %s3754_s25  ;;  %36 = vrot.lane.b32.xlu1 %v3807_v1, %s3754_s25  ;;  %v3821_v3 = vld [vmem:[%s6459_s0] sm:$0xff]  ;;  %s3756_s0 = smov 15   ;;  %s3759_s9 = smov 113   ;;  %v471_v7 = vld [vmem:[%s6460_s3 + $0x8] sm:$0xff]  ;;  %v52_v17 = vshrl.u32 %v51_v14, 7  ;;  %vm186_vm2 = vcmask 7168  }
   0x3   :  { %s3760_s10 = smov 112   ;;  %s3762_s11 = smov 111   ;;  %3752 = vset.pattern.permute.xlu0 %v3763_v5  ;;  %v470_v6 = vld [vmem:[%s6460_s3] sm:$0xff]  ;;  %3753 = vset.pattern.permute.xlu1 %v3763_v5  ;;  %v473_v8 = vld [vmem:[%s6460_s3 + $0x18] sm:$0xff]  ;;  %v472_v9 = vld [vmem:[%s6460_s3 + $0x10] sm:$0xff]  ;;  %vm137_vm3 = vcmask 121856  }
   0x4   :  { %v475_v10 = vld [vmem:[%s6460_s3 + $0x28] sm:$0xff]  ;;  %v474_v11 = vld [vmem:[%s6460_s3 + $0x20] sm:$0xff]  ;;  %v477_v12 = vld [vmem:[%s6460_s3 + $0x38] sm:$0xff]  ;;  %v3909_v20 = vsub.s32 1, %v52_v17  ;;  %v3911_v21 = vsub.s32 3, %v52_v17  ;;  %v3919_v24 = vsub.s32 2, %v52_v17 }
   0x5   :  { %v476_v13 = vld [vmem:[%s6460_s3 + $0x30] sm:$0xff]  ;;  %v3921_v25 = vsub.s32 0, %v52_v17  ;;  %vm238_vm4 = vcmask 1039360   ;;  %vm336_vm5 = vcmask 916480   ;;  %vm287_vm6 = vcmask 924672  }
   0x6   :  { %38 = vrot.lane.b32.xlu1 %v3816_v2, %s3754_s25  ;;  %34 = vrot.lane.b32.xlu0 %v3821_v3, %s3754_s25  ;;  %6688 = vst [vmem:[#allocation4_spill] sm:$0xff] %v3909_v20  ;;  %6689 = vst [vmem:[#allocation5_spill] sm:$0xff] %v3911_v21  ;;  %v49_v22 = vld [vmem:[%s6461_s1] ss:$8 sm:$0xf]  ;;  %vm385_vm7 = vcmask 908288  }
   0x7   :  { %v3378_v23 = vld [vmem:[%s6461_s1 + $0x1] ss:$8 sm:$0xf]  ;;  %6690 = vst [vmem:[#allocation6_spill] sm:$0xff] %v3919_v24  ;;  %6691 = vst [vmem:[#allocation7_spill] sm:$0xff] %v3921_v25  ;;  %v58_v28 = vrot.slane %v49_v22, %v3909_v20  ;;  %v66_v29 = vrot.slane %v49_v22, %v3911_v21  ;;  %v62_v36 = vrot.slane %v49_v22, %v3919_v24  ;;  %vm518_vm8 = vcmask 588800  }
   0x8   :  { %v107_v31 = vrot.slane %v3378_v23, %v3909_v20  ;;  %v103_v33 = vrot.slane %v3378_v23, %v3921_v25  ;;  %v115_v35 = vrot.slane %v3378_v23, %v3911_v21  ;;  %v111_v37 = vrot.slane %v3378_v23, %v3919_v24  ;;  %v3380_v62 = vld [vmem:[%s6461_s1 + $0x3] ss:$8 sm:$0xf]  ;;  %v3379_v63 = vld [vmem:[%s6461_s1 + $0x2] ss:$8 sm:$0xf] }
   0x9   :  { %v54_v39 = vrot.slane %v49_v22, %v3921_v25  ;;  %v164_v5 = vrot.slane %v3379_v63, %v3911_v21  ;;  %v213_v14 = vrot.slane %v3380_v62, %v3911_v21  ;;  %v152_v17 = vrot.slane %v3379_v63, %v3921_v25 }
   0xa   :  { %82 = vrot.lane.b32.xlu1 %v3821_v3, %s3755_s30  ;;  %79 = vrot.lane.b32.xlu0 %v3802_v0, %s3755_s30  ;;  %vm2940_vm9 = vcmask 523264  }
   0xe   :  { %86 = vrot.lane.b32.xlu1 %v3816_v2, %s3755_s30  ;;  %84 = vrot.lane.b32.xlu0 %v3807_v1, %s3755_s30 }
  0x12   :  { %131 = vrot.lane.b32.xlu1 %v3821_v3, %s3756_s0  ;;  %128 = vrot.lane.b32.xlu0 %v3802_v0, %s3756_s0 }
  0x16   :  { %135 = vrot.lane.b32.xlu1 %v3816_v2, %s3756_s0  ;;  %133 = vrot.lane.b32.xlu0 %v3807_v1, %s3756_s0 }
  0x1a   :  { %180 = vrot.lane.b32.xlu1 %v3821_v3, %s3757_s7  ;;  %177 = vrot.lane.b32.xlu0 %v3802_v0, %s3757_s7 }
  0x1e   :  { %184 = vrot.lane.b32.xlu1 %v3816_v2, %s3757_s7  ;;  %182 = vrot.lane.b32.xlu0 %v3807_v1, %s3757_s7 }
  0x22   :  { %232 = vrot.lane.b32.xlu1 %v3807_v1, %s3758_s8  ;;  %230 = vrot.lane.b32.xlu0 %v3821_v3, %s3758_s8 }
  0x26   :  { %236 = vrot.lane.b32.xlu1 %v3802_v0, %s3758_s8  ;;  %234 = vrot.lane.b32.xlu0 %v3816_v2, %s3758_s8 }
  0x2a   :  { %281 = vrot.lane.b32.xlu1 %v3807_v1, %s3759_s9  ;;  %279 = vrot.lane.b32.xlu0 %v3821_v3, %s3759_s9 }
  0x2e   :  { %285 = vrot.lane.b32.xlu1 %v3802_v0, %s3759_s9  ;;  %283 = vrot.lane.b32.xlu0 %v3816_v2, %s3759_s9 }
  0x32   :  { %330 = vrot.lane.b32.xlu1 %v3807_v1, %s3760_s10  ;;  %328 = vrot.lane.b32.xlu0 %v3821_v3, %s3760_s10 }
  0x36   :  { %334 = vrot.lane.b32.xlu1 %v3802_v0, %s3760_s10  ;;  %332 = vrot.lane.b32.xlu0 %v3816_v2, %s3760_s10 }
  0x3a   :  { %379 = vrot.lane.b32.xlu1 %v3807_v1, %s3762_s11  ;;  %377 = vrot.lane.b32.xlu0 %v3821_v3, %s3762_s11 }
  0x3e   :  { %383 = vrot.lane.b32.xlu1 %v3802_v0, %s3762_s11  ;;  %381 = vrot.lane.b32.xlu0 %v3816_v2, %s3762_s11 }
  0x42   :  { %480 = vperm.xlu0 %3752, %v470_v6   ;;  %485 = vperm.xlu1 %3753, %v471_v7   ;;  %v156_v6 = vrot.slane %v3379_v63, %v3909_v20 }
  0x46   :  { %495 = vperm.xlu0 %3752, %v473_v8   ;;  %490 = vperm.xlu1 %3753, %v472_v9  }
  0x4a   :  { %505 = vperm.xlu0 %3752, %v475_v10   ;;  %500 = vperm.xlu1 %3753, %v474_v11   ;;  %v160_v10 = vrot.slane %v3379_v63, %v3919_v24 }
  0x4e   :  { %515 = vperm.xlu0 %3752, %v477_v12   ;;  %510 = vperm.xlu1 %3753, %v476_v13   ;;  %v201_v12 = vrot.slane %v3380_v62, %v3921_v25 }
  0x74   :  { %v29_v15 = vpop.permute.xlu0 %28  ;;  %v37_v16 = vpop.permute.xlu1 %36 }
  0x78   :  { %v39_v18 = vpop.permute.xlu1 %38  ;;  %v35_v19 = vpop.permute.xlu0 %34 }
  0x79   :  { %v41_v30 = vsel %vm40_vm0, %v35_v19, %v37_v16  ;;  %v43_v32 = vsel %vm40_vm0, %v39_v18, %v29_v15  ;;  %v42_v38 = vsel %vm40_vm0, %v37_v16, %v39_v18  ;;  %v48_v40 = vsel %vm40_vm0, %v29_v15, %v35_v19 }
  0x7a   :  { %v72_v43 = vmul.f32 %v58_v28, %v41_v30  ;;  %v74_v44 = vmul.f32 %v66_v29, %v43_v32  ;;  %v73_v51 = vmul.f32 %v62_v36, %v42_v38  ;;  %v71_v53 = vmul.f32 %v54_v39, %v48_v40  ;;  %v3381_v36 = vld [vmem:[%s6461_s1 + $0x5] ss:$8 sm:$0xf] }
  0x7b   :  { %v205_v15 = vrot.slane %v3380_v62, %v3909_v20  ;;  %v209_v16 = vrot.slane %v3380_v62, %v3919_v24 }
  0x7c   :  { %v83_v26 = vpop.permute.xlu1 %82  ;;  %v80_v27 = vpop.permute.xlu0 %79 }
  0x7d   :  { %v96_v34 = vsel %vm88_vm1, %v80_v27, %v83_v26 }
  0x7e   :  { %v120_v48 = vmul.f32 %v103_v33, %v96_v34 }
  0x80   :  { %v87_v41 = vpop.permute.xlu1 %86  ;;  %v85_v42 = vpop.permute.xlu0 %84  ;;  %v3412_v59 = vpack.c.bf16 %v120_v48, %v71_v53  ;;  %v262_v48 = vrot.slane %v3381_v36, %v3919_v24 }
  0x81   :  { %v90_v45 = vsel %vm88_vm1, %v85_v42, %v87_v41  ;;  %v89_v46 = vsel %vm88_vm1, %v83_v26, %v85_v42  ;;  %v91_v47 = vsel %vm88_vm1, %v87_v41, %v80_v27 }
  0x82   :  { %v121_v49 = vmul.f32 %v107_v31, %v89_v46  ;;  %v123_v50 = vmul.f32 %v115_v35, %v91_v47  ;;  %v122_v52 = vmul.f32 %v111_v37, %v90_v45  ;;  %v266_v45 = vrot.slane %v3381_v36, %v3911_v21 }
  0x83   :  { %v258_v47 = vrot.slane %v3381_v36, %v3909_v20 }
  0x84   :  { %v132_v54 = vpop.permute.xlu1 %131  ;;  %v129_v55 = vpop.permute.xlu0 %128  ;;  %v3410_v56 = vpack.c.bf16 %v121_v49, %v72_v43  ;;  %v3426_v57 = vpack.c.bf16 %v123_v50, %v74_v44  ;;  %v3428_v58 = vpack.c.bf16 %v122_v52, %v73_v51  ;;  %v254_v43 = vrot.slane %v3381_v36, %v3921_v25 }
  0x85   :  { %v145_v19 = vsel %vm137_vm3, %v129_v55, %v132_v54 }
  0x86   :  { %3411 = vmatprep.subr.bf16.mxu0 %v3410_v56  ;;  %3427 = vmatprep.subr.bf16.mxu1 %v3426_v57  ;;  %v169_v37 = vmul.f32 %v152_v17, %v145_v19 }
  0x87   :  { %3413 = vmatpush1.bf16.msra.mxu0 %v3412_v59  ;;  %3429 = vmatpush1.bf16.msra.mxu1 %v3428_v58 }
  0x88   :  { %v136_v60 = vpop.permute.xlu1 %135  ;;  %v134_v61 = vpop.permute.xlu0 %133 }
  0x89   :  { %v140_v9 = vsel %vm137_vm3, %v136_v60, %v129_v55  ;;  %v138_v11 = vsel %vm137_vm3, %v132_v54, %v134_v61  ;;  %v139_v18 = vsel %vm137_vm3, %v134_v61, %v136_v60 }
  0x8a   :  { %v172_v22 = vmul.f32 %v164_v5, %v140_v9  ;;  %v170_v23 = vmul.f32 %v156_v6, %v138_v11  ;;  %v171_v32 = vmul.f32 %v160_v10, %v139_v18 }
  0x8c   :  { %v181_v7 = vpop.permute.xlu1 %180  ;;  %v178_v8 = vpop.permute.xlu0 %177 }
  0x8d   :  { %v194_v13 = vsel %vm186_vm2, %v178_v8, %v181_v7 }
  0x8e   :  { %v218_v28 = vmul.f32 %v201_v12, %v194_v13 }
  0x90   :  { %v185_v26 = vpop.permute.xlu1 %184  ;;  %v183_v27 = vpop.permute.xlu0 %182  ;;  %v3416_v44 = vpack.c.bf16 %v218_v28, %v169_v37 }
  0x91   :  { %v189_v29 = vsel %vm186_vm2, %v185_v26, %v178_v8  ;;  %v187_v30 = vsel %vm186_vm2, %v181_v7, %v183_v27  ;;  %v188_v31 = vsel %vm186_vm2, %v183_v27, %v185_v26  ;;  %v3383_v7 = vld [vmem:[%s6461_s1 + $0x7] ss:$8 sm:$0xf] }
  0x92   :  { %v221_v33 = vmul.f32 %v213_v14, %v189_v29  ;;  %v219_v34 = vmul.f32 %v205_v15, %v187_v30  ;;  %v220_v35 = vmul.f32 %v209_v16, %v188_v31  ;;  %v352_v12 = vrot.slane %v3383_v7, %v3921_v25 }
  0x93   :  { %v364_v14 = vrot.slane %v3383_v7, %v3911_v21  ;;  %v356_v15 = vrot.slane %v3383_v7, %v3909_v20  ;;  %v360_v16 = vrot.slane %v3383_v7, %v3919_v24 }
  0x94   :  { %v233_v38 = vpop.permute.xlu1 %232  ;;  %v231_v39 = vpop.permute.xlu0 %230  ;;  %v3414_v40 = vpack.c.bf16 %v219_v34, %v170_v23  ;;  %v3430_v41 = vpack.c.bf16 %v221_v33, %v172_v22  ;;  %v3432_v42 = vpack.c.bf16 %v220_v35, %v171_v32 }
  0x95   :  { %v239_v46 = vsel %vm238_vm4, %v231_v39, %v233_v38 }
  0x96   :  { %3415 = vmatprep.subr.bf16.mxu0 %v3414_v40  ;;  %3431 = vmatprep.subr.bf16.mxu1 %v3430_v41  ;;  %v271_v51 = vmul.f32 %v254_v43, %v239_v46 }
  0x97   :  { %3417 = vmatpush1.bf16.msra.mxu0 %v3416_v44  ;;  %3433 = vmatpush1.bf16.msra.mxu1 %v3432_v42  ;;  %v3384_v42 = vld [vmem:[%s6461_s1 + $0x20] ss:$8 sm:$0xf] }
  0x98   :  { %v237_v49 = vpop.permute.xlu1 %236  ;;  %v235_v50 = vpop.permute.xlu0 %234  ;;  %v3420_v63 = vpack.c.bf16 %v271_v51, %v3821_v3  ;;  %v405_v44 = vrot.slane %v3384_v42, %v3909_v20  ;;  %v409_v46 = vrot.slane %v3384_v42, %v3919_v24 }
  0x99   :  { %v247_v52 = vsel %vm238_vm4, %v237_v49, %v231_v39  ;;  %v240_v53 = vsel %vm238_vm4, %v233_v38, %v235_v50  ;;  %v241_v54 = vsel %vm238_vm4, %v235_v50, %v237_v49 }
  0x9a   :  { %v274_v55 = vmul.f32 %v266_v45, %v247_v52  ;;  %v272_v56 = vmul.f32 %v258_v47, %v240_v53  ;;  %v273_v57 = vmul.f32 %v262_v48, %v241_v54  ;;  %v413_v45 = vrot.slane %v3384_v42, %v3911_v21 }
  0x9b   :  { %v401_v47 = vrot.slane %v3384_v42, %v3921_v25 }
  0x9c   :  { %v282_v58 = vpop.permute.xlu1 %281  ;;  %v280_v59 = vpop.permute.xlu0 %279  ;;  %v3418_v60 = vpack.c.bf16 %v272_v56, %v3807_v1  ;;  %v3434_v61 = vpack.c.bf16 %v274_v55, %v3802_v0  ;;  %v3436_v62 = vpack.c.bf16 %v273_v57, %v3816_v2  ;;  %v3382_v1 = vld [vmem:[%s6461_s1 + $0x6] ss:$8 sm:$0xf] }
  0x9d   :  { %v315_v0 = vrot.slane %v3382_v1, %v3911_v21  ;;  %v307_v2 = vrot.slane %v3382_v1, %v3909_v20  ;;  %v311_v10 = vrot.slane %v3382_v1, %v3919_v24  ;;  %v303_v17 = vrot.slane %v3382_v1, %v3921_v25 }
  0x9e   :  { %3419 = vmatprep.subr.bf16.mxu0 %v3418_v60  ;;  %3435 = vmatprep.subr.bf16.mxu1 %v3434_v61  ;;  %v288_v19 = vsel %vm287_vm6, %v280_v59, %v282_v58  ;;  %v428_v60 = vld [vmem:[%s6462_s2 + $0x10] sm:$0xff]  ;;  %v429_v61 = vld [vmem:[%s6462_s2 + $0x18] sm:$0xff] }
  0x9f   :  { %3421 = vmatpush1.bf16.msra.mxu0 %v3420_v63  ;;  %3437 = vmatpush1.bf16.msra.mxu1 %v3436_v62  ;;  %v320_v36 = vmul.f32 %v303_v17, %v288_v19  ;;  %v430_v62 = vld [vmem:[%s6462_s2 + $0x20] sm:$0xff]  ;;  %v431_v63 = vld [vmem:[%s6462_s2 + $0x28] sm:$0xff] }
  0xa0   :  { %v286_v5 = vpop.permute.xlu1 %285  ;;  %v284_v6 = vpop.permute.xlu0 %283 }
  0xa1   :  { %v296_v9 = vsel %vm287_vm6, %v286_v5, %v280_v59  ;;  %v289_v11 = vsel %vm287_vm6, %v282_v58, %v284_v6  ;;  %v290_v18 = vsel %vm287_vm6, %v284_v6, %v286_v5  ;;  %v426_v58 = vld [vmem:[%s6462_s2] sm:$0xff]  ;;  %v427_v59 = vld [vmem:[%s6462_s2 + $0x8] sm:$0xff]  ;;  %v432_v5 = vld [vmem:[%s6462_s2 + $0x30] sm:$0xff] }
  0xa2   :  { %v323_v22 = vmul.f32 %v315_v0, %v296_v9  ;;  %v321_v23 = vmul.f32 %v307_v2, %v289_v11  ;;  %v322_v32 = vmul.f32 %v311_v10, %v290_v18  ;;  %v433_v6 = vld [vmem:[%s6462_s2 + $0x38] sm:$0xff] }
  0xa4   :  { %v331_v3 = vpop.permute.xlu1 %330  ;;  %v329_v8 = vpop.permute.xlu0 %328 }
  0xa5   :  { %v337_v13 = vsel %vm336_vm5, %v329_v8, %v331_v3 }
  0xa6   :  { %v369_v28 = vmul.f32 %v352_v12, %v337_v13 }
  0xa8   :  { %v335_v26 = vpop.permute.xlu1 %334  ;;  %v333_v27 = vpop.permute.xlu0 %332  ;;  %v3424_v43 = vpack.c.bf16 %v369_v28, %v320_v36 }
  0xa9   :  { %v345_v29 = vsel %vm336_vm5, %v335_v26, %v329_v8  ;;  %v338_v30 = vsel %vm336_vm5, %v331_v3, %v333_v27  ;;  %v339_v31 = vsel %vm336_vm5, %v333_v27, %v335_v26 }
  0xaa   :  { %v372_v33 = vmul.f32 %v364_v14, %v345_v29  ;;  %v370_v34 = vmul.f32 %v356_v15, %v338_v30  ;;  %v371_v35 = vmul.f32 %v360_v16, %v339_v31 }
  0xac   :  { %v380_v37 = vpop.permute.xlu1 %379  ;;  %v378_v38 = vpop.permute.xlu0 %377  ;;  %v3422_v39 = vpack.c.bf16 %v370_v34, %v321_v23  ;;  %v3438_v40 = vpack.c.bf16 %v372_v33, %v323_v22  ;;  %v3440_v41 = vpack.c.bf16 %v371_v35, %v322_v32 }
  0xad   :  { %v386_v48 = vsel %vm385_vm7, %v378_v38, %v380_v37 }
  0xae   :  { %3423 = vmatprep.subr.bf16.mxu0 %v3422_v39  ;;  %3439 = vmatprep.subr.bf16.mxu1 %v3438_v40  ;;  %v418_v57 = vmul.f32 %v401_v47, %v386_v48 }
  0xaf   :  { %3425 = vmatpush1.bf16.msra.mxu0 %v3424_v43  ;;  %3441 = vmatpush1.bf16.msra.mxu1 %v3440_v41 }
  0xb0   :  { %v384_v49 = vpop.permute.xlu1 %383  ;;  %v382_v50 = vpop.permute.xlu0 %381 }
  0xb1   :  { %v394_v51 = vsel %vm385_vm7, %v384_v49, %v378_v38  ;;  %v387_v52 = vsel %vm385_vm7, %v380_v37, %v382_v50  ;;  %v388_v53 = vsel %vm385_vm7, %v382_v50, %v384_v49 }
  0xb2   :  { %v419_v54 = vmul.f32 %v405_v44, %v387_v52  ;;  %v421_v55 = vmul.f32 %v413_v45, %v394_v51  ;;  %v420_v56 = vmul.f32 %v409_v46, %v388_v53 }
  0xb4   :  { %559 = vmatprep.subr.mxu0 %v419_v54  ;;  %672 = vmatprep.subr.mxu1 %v421_v55 }
  0xb5   :  { %560 = vmatpush1.msra.mxu0 %v418_v57  ;;  %673 = vmatpush1.msra.mxu1 %v420_v56 }
  0xb6   :  { %3385 = vmatmul.mubr.msk.f32.vlgmr.msra.gmra.mrb[0].mxu0 %vm518_vm8, %v426_v58  ;;  %3393 = vmatmul.mubr.msk.f32.vlgmr.msra.gmra.mrb[0].mxu1 %vm518_vm8, %v426_v58 }
  0xb7   :  { %613 = vmatprep.mubr.f32.mxu0 %v6466_v4  ;;  %726 = vmatprep.mubr.f32.mxu1 %v6466_v4 }
  0xba   :  { %3386 = vmatmul.mubr.msk.f32.gmra.mrb[2].mxu0 %vm518_vm8, %v427_v59  ;;  %3394 = vmatmul.mubr.msk.f32.gmra.mrb[2].mxu1 %vm518_vm8, %v427_v59 }
  0xbb   :  { %619 = vmatprep.mubr.f32.mxu0 %v6466_v4  ;;  %732 = vmatprep.mubr.f32.mxu1 %v6466_v4 }
  0xbe   :  { %3387 = vmatmul.mubr.msk.f32.gmra.mrb[4].mxu0 %vm518_vm8, %v428_v60  ;;  %3395 = vmatmul.mubr.msk.f32.gmra.mrb[4].mxu1 %vm518_vm8, %v428_v60 }
  0xbf   :  { %625 = vmatprep.mubr.f32.mxu0 %v6466_v4  ;;  %738 = vmatprep.mubr.f32.mxu1 %v6466_v4 }
  0xc1   :  { %v481_v7 = vpop.permute.xlu0 %480  ;;  %v486_v34 = vpop.permute.xlu1 %485 }
  0xc2   :  { %3388 = vmatmul.mubr.msk.f32.gmra.mrb[6].mxu0 %vm518_vm8, %v429_v61  ;;  %3396 = vmatmul.mubr.msk.f32.gmra.mrb[6].mxu1 %vm518_vm8, %v429_v61 }
  0xc3   :  { %631 = vmatprep.mubr.f32.mxu0 %v6466_v4  ;;  %744 = vmatprep.mubr.f32.mxu1 %v6466_v4 }
  0xc5   :  { %v491_v57 = vpop.permute.xlu1 %490 }
  0xc6   :  { %3389 = vmatmul.mubr.msk.f32.gmra.mrb[8].mxu0 %vm518_vm8, %v430_v62  ;;  %3397 = vmatmul.mubr.msk.f32.gmra.mrb[8].mxu1 %vm518_vm8, %v430_v62 }
  0xc7   :  { %637 = vmatprep.mubr.f32.mxu0 %v6466_v4  ;;  %750 = vmatprep.mubr.f32.mxu1 %v6466_v4 }
  0xca   :  { %3390 = vmatmul.mubr.msk.f32.gmra.mrb[10].mxu0 %vm518_vm8, %v431_v63  ;;  %3398 = vmatmul.mubr.msk.f32.gmra.mrb[10].mxu1 %vm518_vm8, %v431_v63 }
  0xcb   :  { %643 = vmatprep.mubr.f32.mxu0 %v6466_v4  ;;  %756 = vmatprep.mubr.f32.mxu1 %v6466_v4 }
  0xce   :  { %3391 = vmatmul.mubr.msk.f32.gmra.mrb[12].mxu0 %vm518_vm8, %v432_v5  ;;  %3399 = vmatmul.mubr.msk.f32.gmra.mrb[12].mxu1 %vm518_vm8, %v432_v5 }
  0xcf   :  { %649 = vmatprep.mubr.f32.mxu0 %v6466_v4  ;;  %762 = vmatprep.mubr.f32.mxu1 %v6466_v4 }
  0xd2   :  { %3392 = vmatmul.mubr.msk.f32.gmra.mrb[14].mxu0 %vm518_vm8, %v433_v6  ;;  %3400 = vmatmul.mubr.msk.f32.gmra.mrb[14].mxu1 %vm518_vm8, %v433_v6  ;;  %v496_v6 = vpop.permute.xlu0 %495 }
 0x189   :  { %v609_v1 = vpop.f32.mrb[0].mxu0  ;;  %v722_v0 = vpop.f32.mrb[0].mxu1 }
 0x18a   :  { %v610_v2 = vadd.f32 %v609_v1, %v481_v7  ;;  %v611_v3 = vpop.f32.mrb[1].mxu0  ;;  %v724_v8 = vpop.f32.mrb[1].mxu1  ;;  %v723_v11 = vadd.f32 %v722_v0, %v481_v7 }
 0x18b   :  { %v612_v9 = vadd.f32 %v611_v3, %v481_v7  ;;  %v725_v35 = vadd.f32 %v724_v8, %v481_v7  ;;  %v4250_v3 = vpop.permute.xlu1 %500  ;;  %v4254_v8 = vpop.permute.xlu0 %505 }
 0x18c   :  { %v4063_v10 = vmax.f32 %v610_v2, 0.0  ;;  %v4073_v17 = vmax.f32 %v723_v11, 0.0 }
 0x18d   :  { %v4065_v12 = vmax.f32 %v612_v9, 0.0  ;;  %v615_v13 = vpop.f32.mrb[2].mxu0  ;;  %v728_v14 = vpop.f32.mrb[2].mxu1  ;;  %v4123_v40 = vmax.f32 %v725_v35, 0.0 }
 0x18e   :  { %6692 = vst [vmem:[#allocation8_spill] sm:$0xff] %v4063_v10  ;;  %v4067_v15 = vpop.f32.mrb[3].mxu0  ;;  %v730_v16 = vpop.f32.mrb[3].mxu1  ;;  %857 = vrot.lane.b32.xlu1 %v4063_v10, %s3754_s25  ;;  %6694 = vst [vmem:[#allocation10_spill] sm:$0xff] %v4073_v17  ;;  %v616_v41 = vadd.f32 %v615_v13, %v486_v34  ;;  %v729_v47 = vadd.f32 %v728_v14, %v486_v34 }
 0x18f   :  { %6693 = vst [vmem:[#allocation9_spill] sm:$0xff] %v4065_v12  ;;  %859 = vrot.lane.b32.xlu0 %v4065_v12, %s3754_s25  ;;  %6695 = vst [vmem:[#allocation11_spill] sm:$0xff] %v4123_v40  ;;  %v731_v53 = vadd.f32 %v730_v16, %v486_v34  ;;  %v618_v55 = vadd.f32 %v4067_v15, %v486_v34  ;;  %v4264_v11 = vpop.permute.xlu1 %510  ;;  %v4266_v13 = vpop.permute.xlu0 %515 }
 0x190   :  { %v4137_v46 = vmax.f32 %v616_v41, 0.0  ;;  %v4151_v52 = vmax.f32 %v729_v47, 0.0 }
 0x191   :  { %v4075_v18 = vpop.f32.mrb[4].mxu0  ;;  %v4077_v19 = vpop.f32.mrb[4].mxu1  ;;  %v4181_v54 = vmax.f32 %v731_v53, 0.0  ;;  %v4192_v56 = vmax.f32 %v618_v55, 0.0 }
 0x192   :  { %861 = vrot.lane.b32.xlu1 %v4073_v17, %s3754_s25  ;;  %v4081_v22 = vpop.f32.mrb[5].mxu0  ;;  %v4083_v23 = vpop.f32.mrb[5].mxu1  ;;  %6696 = vst [vmem:[#allocation12_spill] sm:$0xff] %v4137_v46  ;;  %6697 = vst [vmem:[#allocation13_spill] sm:$0xff] %v4151_v52  ;;  %v622_v58 = vadd.f32 %v4075_v18, %v491_v57  ;;  %v735_v60 = vadd.f32 %v4077_v19, %v491_v57 }
 0x193   :  { %1081 = vrot.lane.b32.xlu0 %v4065_v12, %s3755_s30  ;;  %6698 = vst [vmem:[#allocation14_spill] sm:$0xff] %v4181_v54  ;;  %6699 = vst [vmem:[#allocation15_spill] sm:$0xff] %v4192_v56  ;;  %v624_v59 = vadd.f32 %v4081_v22, %v491_v57  ;;  %v737_v5 = vadd.f32 %v4083_v23, %v491_v57 }
 0x194   :  { %v4213_v61 = vmax.f32 %v622_v58, 0.0  ;;  %v4221_v63 = vmax.f32 %v735_v60, 0.0 }
 0x195   :  { %v4087_v26 = vpop.f32.mrb[6].mxu0  ;;  %v4089_v27 = vpop.f32.mrb[6].mxu1  ;;  %v4215_v62 = vmax.f32 %v624_v59, 0.0  ;;  %v4240_v7 = vmax.f32 %v737_v5, 0.0 }
 0x196   :  { %v4091_v28 = vpop.f32.mrb[7].mxu0  ;;  %v4093_v29 = vpop.f32.mrb[7].mxu1  ;;  %1079 = vrot.lane.b32.xlu1 %v4063_v10, %s3755_s30  ;;  %6700 = vst [vmem:[#allocation16_spill] sm:$0xff] %v4213_v61  ;;  %6702 = vst [vmem:[#allocation18_spill] sm:$0xff] %v4221_v63  ;;  %v628_v1 = vadd.f32 %v4087_v26, %v496_v6  ;;  %v741_v2 = vadd.f32 %v4089_v27, %v496_v6 }
 0x197   :  { %1303 = vrot.lane.b32.xlu0 %v4065_v12, %s3756_s0  ;;  %6701 = vst [vmem:[#allocation17_spill] sm:$0xff] %v4215_v62  ;;  %6703 = vst [vmem:[#allocation19_spill] sm:$0xff] %v4240_v7  ;;  %v743_v34 = vadd.f32 %v4093_v29, %v496_v6  ;;  %v630_v29 = vadd.f32 %v4091_v28, %v496_v6 }
 0x198   :  { %v4247_v0 = vmax.f32 %v628_v1, 0.0  ;;  %v4258_v9 = vmax.f32 %v741_v2, 0.0 }
 0x199   :  { %v4099_v30 = vpop.f32.mrb[8].mxu0  ;;  %v4101_v31 = vpop.f32.mrb[8].mxu1  ;;  %v4315_v47 = vmax.f32 %v743_v34, 0.0  ;;  %v4332_v58 = vmax.f32 %v630_v29, 0.0 }
 0x19a   :  { %1083 = vrot.lane.b32.xlu1 %v4073_v17, %s3755_s30  ;;  %v4105_v32 = vpop.f32.mrb[9].mxu0  ;;  %v4107_v33 = vpop.f32.mrb[9].mxu1  ;;  %6704 = vst [vmem:[#allocation20_spill] sm:$0xff] %v4247_v0  ;;  %6705 = vst [vmem:[#allocation21_spill] sm:$0xff] %v4258_v9  ;;  %v634_v2 = vadd.f32 %v4099_v30, %v4250_v3 }
 0x19b   :  { %1525 = vrot.lane.b32.xlu0 %v4065_v12, %s3757_s7  ;;  %6710 = vst [vmem:[#allocation26_spill] sm:$0xff] %v4315_v47  ;;  %6713 = vst [vmem:[#allocation29_spill] sm:$0xff] %v4332_v58  ;;  %v636_v29 = vadd.f32 %v4105_v32, %v4250_v3 }
 0x19d   :  { %v4111_v36 = vpop.f32.mrb[10].mxu0  ;;  %v4113_v37 = vpop.f32.mrb[10].mxu1  ;;  %v4374_v30 = vmax.f32 %v636_v29, 0.0  ;;  %v969_v29 = vld [vmem:[%s6461_s1] ss:$8 sm:$0xf] }
 0x19e   :  { %v4115_v38 = vpop.f32.mrb[11].mxu0  ;;  %v4117_v39 = vpop.f32.mrb[11].mxu1  ;;  %1301 = vrot.lane.b32.xlu1 %v4063_v10, %s3756_s0 }
 0x19f   :  { %1755 = vrot.lane.b32.xlu0 %v4065_v12, %s3758_s8  ;;  %6722 = vst [vmem:[#allocation38_spill] sm:$0xff] %v4374_v30 }
 0x1a1   :  { %v4125_v42 = vpop.f32.mrb[12].mxu0  ;;  %v4127_v43 = vpop.f32.mrb[12].mxu1 }
 0x1a2   :  { %v4129_v44 = vpop.f32.mrb[13].mxu0  ;;  %v4131_v45 = vpop.f32.mrb[13].mxu1  ;;  %1305 = vrot.lane.b32.xlu1 %v4073_v17, %s3756_s0 }
 0x1a3   :  { %1759 = vrot.lane.b32.xlu0 %v4123_v40, %s3758_s8 }
 0x1a5   :  { %v4139_v48 = vpop.f32.mrb[14].mxu0  ;;  %v4141_v49 = vpop.f32.mrb[14].mxu1 }
 0x1a6   :  { %v4143_v50 = vpop.f32.mrb[15].mxu0  ;;  %v4145_v51 = vpop.f32.mrb[15].mxu1  ;;  %1523 = vrot.lane.b32.xlu1 %v4063_v10, %s3757_s7 }
 0x1a7   :  { %863 = vrot.lane.b32.xlu0 %v4137_v46, %s3754_s25 }
 0x1aa   :  { %1527 = vrot.lane.b32.xlu1 %v4073_v17, %s3757_s7 }
 0x1ab   :  { %867 = vrot.lane.b32.xlu0 %v4151_v52, %s3754_s25 }
 0x1ae   :  { %1753 = vrot.lane.b32.xlu1 %v4063_v10, %s3758_s8 }
 0x1af   :  { %1085 = vrot.lane.b32.xlu0 %v4137_v46, %s3755_s30 }
 0x1b2   :  { %1757 = vrot.lane.b32.xlu1 %v4073_v17, %s3758_s8 }
 0x1b3   :  { %1089 = vrot.lane.b32.xlu0 %v4151_v52, %s3755_s30 }
 0x1b6   :  { %809 = vrot.lane.b32.xlu1 %v4123_v40, %s3754_s25 }
 0x1b7   :  { %1307 = vrot.lane.b32.xlu0 %v4137_v46, %s3756_s0 }
 0x1ba   :  { %1055 = vrot.lane.b32.xlu1 %v4123_v40, %s3755_s30 }
 0x1bb   :  { %1311 = vrot.lane.b32.xlu0 %v4151_v52, %s3756_s0 }
 0x1be   :  { %1277 = vrot.lane.b32.xlu1 %v4123_v40, %s3756_s0 }
 0x1bf   :  { %1529 = vrot.lane.b32.xlu0 %v4137_v46, %s3757_s7 }
 0x1c2   :  { %1499 = vrot.lane.b32.xlu1 %v4123_v40, %s3757_s7 }
 0x1c3   :  { %1533 = vrot.lane.b32.xlu0 %v4151_v52, %s3757_s7 }
 0x1c6   :  { %1761 = vrot.lane.b32.xlu1 %v4137_v46, %s3758_s8 }
 0x1c7   :  { %811 = vrot.lane.b32.xlu0 %v4181_v54, %s3754_s25 }
 0x1ca   :  { %1765 = vrot.lane.b32.xlu1 %v4151_v52, %s3758_s8 }
 0x1cb   :  { %1057 = vrot.lane.b32.xlu0 %v4181_v54, %s3755_s30 }
 0x1ce   :  { %865 = vrot.lane.b32.xlu1 %v4192_v56, %s3754_s25 }
 0x1cf   :  { %1279 = vrot.lane.b32.xlu0 %v4181_v54, %s3756_s0 }
 0x1d2   :  { %1087 = vrot.lane.b32.xlu1 %v4192_v56, %s3755_s30 }
 0x1d3   :  { %1501 = vrot.lane.b32.xlu0 %v4181_v54, %s3757_s7 }
 0x1d6   :  { %1309 = vrot.lane.b32.xlu1 %v4192_v56, %s3756_s0 }
 0x1d7   :  { %1763 = vrot.lane.b32.xlu0 %v4192_v56, %s3758_s8 }
 0x1da   :  { %1531 = vrot.lane.b32.xlu1 %v4192_v56, %s3757_s7 }
 0x1db   :  { %1767 = vrot.lane.b32.xlu0 %v4181_v54, %s3758_s8 }
 0x1de   :  { %869 = vrot.lane.b32.xlu1 %v4213_v61, %s3754_s25 }
 0x1df   :  { %871 = vrot.lane.b32.xlu0 %v4215_v62, %s3754_s25 }
 0x1e2   :  { %873 = vrot.lane.b32.xlu1 %v4221_v63, %s3754_s25 }
 0x1e3   :  { %1093 = vrot.lane.b32.xlu0 %v4215_v62, %s3755_s30 }
 0x1e6   :  { %1091 = vrot.lane.b32.xlu1 %v4213_v61, %s3755_s30 }
 0x1e7   :  { %1315 = vrot.lane.b32.xlu0 %v4215_v62, %s3756_s0 }
 0x1ea   :  { %1095 = vrot.lane.b32.xlu1 %v4221_v63, %s3755_s30 }
 0x1eb   :  { %1537 = vrot.lane.b32.xlu0 %v4215_v62, %s3757_s7 }
 0x1ee   :  { %1313 = vrot.lane.b32.xlu1 %v4213_v61, %s3756_s0 }
 0x1ef   :  { %1771 = vrot.lane.b32.xlu0 %v4215_v62, %s3758_s8 }
 0x1f2   :  { %1317 = vrot.lane.b32.xlu1 %v4221_v63, %s3756_s0 }
 0x1f3   :  { %1775 = vrot.lane.b32.xlu0 %v4240_v7, %s3758_s8 }
 0x1f6   :  { %1535 = vrot.lane.b32.xlu1 %v4213_v61, %s3757_s7 }
 0x1f7   :  { %875 = vrot.lane.b32.xlu0 %v4247_v0, %s3754_s25 }
 0x1fa   :  { %1539 = vrot.lane.b32.xlu1 %v4221_v63, %s3757_s7 }
 0x1fb   :  { %879 = vrot.lane.b32.xlu0 %v4258_v9, %s3754_s25 }
 0x1fe   :  { %1769 = vrot.lane.b32.xlu1 %v4213_v61, %s3758_s8 }
 0x1ff   :  { %1097 = vrot.lane.b32.xlu0 %v4247_v0, %s3755_s30 }
 0x200   :  { %v4272_v14 = vpop.permute.xlu1 %857 }
 0x201   :  { %v4274_v15 = vpop.permute.xlu0 %859 }
 0x202   :  { %1773 = vrot.lane.b32.xlu1 %v4221_v63, %s3758_s8 }
 0x203   :  { %1101 = vrot.lane.b32.xlu0 %v4258_v9, %s3755_s30 }
 0x204   :  { %v4280_v16 = vpop.permute.xlu1 %861 }
 0x205   :  { %v4282_v18 = vpop.permute.xlu0 %1081 }
 0x206   :  { %813 = vrot.lane.b32.xlu1 %v4240_v7, %s3754_s25 }
 0x207   :  { %1319 = vrot.lane.b32.xlu0 %v4247_v0, %s3756_s0 }
 0x208   :  { %v4288_v19 = vpop.permute.xlu1 %1079 }
 0x209   :  { %v4290_v22 = vpop.permute.xlu0 %1303 }
 0x20a   :  { %1059 = vrot.lane.b32.xlu1 %v4240_v7, %s3755_s30 }
 0x20b   :  { %1323 = vrot.lane.b32.xlu0 %v4258_v9, %s3756_s0 }
 0x20c   :  { %v4296_v23 = vpop.permute.xlu1 %1083 }
 0x20d   :  { %v4298_v26 = vpop.permute.xlu0 %1525 }
 0x20e   :  { %6706 = vst [vmem:[#allocation22_spill] sm:$0xff] %v4298_v26  ;;  %1281 = vrot.lane.b32.xlu1 %v4240_v7, %s3756_s0 }
 0x20f   :  { %1541 = vrot.lane.b32.xlu0 %v4247_v0, %s3757_s7 }
 0x210   :  { %v4304_v27 = vpop.permute.xlu1 %1301 }
 0x211   :  { %6707 = vst [vmem:[#allocation23_spill] sm:$0xff] %v4304_v27  ;;  %v4307_v35 = vpop.permute.xlu0 %1755 }
 0x212   :  { %6708 = vst [vmem:[#allocation24_spill] sm:$0xff] %v4307_v35  ;;  %1503 = vrot.lane.b32.xlu1 %v4240_v7, %s3757_s7 }
 0x213   :  { %1545 = vrot.lane.b32.xlu0 %v4258_v9, %s3757_s7 }
 0x214   :  { %v4313_v41 = vpop.permute.xlu1 %1305 }
 0x215   :  { %6709 = vst [vmem:[#allocation25_spill] sm:$0xff] %v4313_v41  ;;  %v4317_v53 = vpop.permute.xlu0 %1759 }
 0x216   :  { %6711 = vst [vmem:[#allocation27_spill] sm:$0xff] %v4317_v53  ;;  %1777 = vrot.lane.b32.xlu1 %v4247_v0, %s3758_s8  ;;  %v4370_v53 = vmax.f32 %v634_v2, 0.0 }
 0x217   :  { %815 = vrot.lane.b32.xlu0 %v4315_v47, %s3754_s25 }
 0x218   :  { %v4324_v55 = vpop.permute.xlu1 %1523  ;;  %6720 = vst [vmem:[#allocation36_spill] sm:$0xff] %v4370_v53 }
 0x219   :  { %6712 = vst [vmem:[#allocation28_spill] sm:$0xff] %v4324_v55  ;;  %v4326_v57 = vpop.permute.xlu0 %863 }
 0x21a   :  { %1781 = vrot.lane.b32.xlu1 %v4258_v9, %s3758_s8 }
 0x21b   :  { %1061 = vrot.lane.b32.xlu0 %v4315_v47, %s3755_s30 }
 0x21c   :  { %v4334_v59 = vpop.permute.xlu1 %1527 }
 0x21d   :  { %6714 = vst [vmem:[#allocation30_spill] sm:$0xff] %v4334_v59  ;;  %v4336_v60 = vpop.permute.xlu0 %867 }
 0x21e   :  { %877 = vrot.lane.b32.xlu1 %v4332_v58, %s3754_s25 }
 0x21f   :  { %1283 = vrot.lane.b32.xlu0 %v4315_v47, %s3756_s0 }
 0x220   :  { %v4342_v28 = vpop.permute.xlu1 %1753 }
 0x221   :  { %6715 = vst [vmem:[#allocation31_spill] sm:$0xff] %v4342_v28  ;;  %v4344_v5 = vpop.permute.xlu0 %1085 }
 0x222   :  { %6716 = vst [vmem:[#allocation32_spill] sm:$0xff] %v4344_v5  ;;  %1099 = vrot.lane.b32.xlu1 %v4332_v58, %s3755_s30 }
 0x223   :  { %1505 = vrot.lane.b32.xlu0 %v4315_v47, %s3757_s7 }
 0x224   :  { %v4350_v6 = vpop.permute.xlu1 %1757 }
 0x225   :  { %6717 = vst [vmem:[#allocation33_spill] sm:$0xff] %v4350_v6  ;;  %v4352_v1 = vpop.permute.xlu0 %1089  ;;  %v747_v6 = vadd.f32 %v4101_v31, %v4250_v3 }
 0x226   :  { %6718 = vst [vmem:[#allocation34_spill] sm:$0xff] %v4352_v1  ;;  %1321 = vrot.lane.b32.xlu1 %v4332_v58, %s3756_s0 }
 0x227   :  { %1779 = vrot.lane.b32.xlu0 %v4332_v58, %s3758_s8  ;;  %v4382_v32 = vmax.f32 %v747_v6, 0.0  ;;  %v4402_v6 = vrot.slane %v969_v29, %v3911_v21 }
 0x228   :  { %v810_v34 = vpop.permute.xlu1 %809 }
 0x229   :  { %v4362_v4 = vpop.permute.xlu0 %1307  ;;  %6724 = vst [vmem:[#allocation40_spill] sm:$0xff] %v4382_v32 }
 0x22a   :  { %6719 = vst [vmem:[#allocation35_spill] sm:$0xff] %v4362_v4  ;;  %1543 = vrot.lane.b32.xlu1 %v4332_v58, %s3757_s7 }
 0x22b   :  { %1783 = vrot.lane.b32.xlu0 %v4315_v47, %s3758_s8 }
 0x22c   :  { %v4372_v5 = vpop.permute.xlu1 %1055 }
 0x22d   :  { %6721 = vst [vmem:[#allocation37_spill] sm:$0xff] %v4372_v5  ;;  %v4376_v1 = vpop.permute.xlu0 %1311  ;;  %v749_v5 = vadd.f32 %v4107_v33, %v4250_v3  ;;  %v906_v33 = vsel %vm40_vm0, %v4274_v15, %v4280_v16 }
 0x22e   :  { %6723 = vst [vmem:[#allocation39_spill] sm:$0xff] %v4376_v1  ;;  %881 = vrot.lane.b32.xlu1 %v4370_v53, %s3754_s25 }
 0x22f   :  { %883 = vrot.lane.b32.xlu0 %v4374_v30, %s3754_s25 }
 0x230   :  { %v4384_v4 = vpop.permute.xlu1 %1277 }
 0x231   :  { %6725 = vst [vmem:[#allocation41_spill] sm:$0xff] %v4384_v4  ;;  %v4386_v28 = vpop.permute.xlu0 %1529 }
 0x232   :  { %6726 = vst [vmem:[#allocation42_spill] sm:$0xff] %v4386_v28  ;;  %885 = vrot.lane.b32.xlu1 %v4382_v32, %s3754_s25  ;;  %v907_v28 = vsel %vm40_vm0, %v4280_v16, %v810_v34 }
 0x233   :  { %1105 = vrot.lane.b32.xlu0 %v4374_v30, %s3755_s30  ;;  %v994_v4 = vmul.f32 %v4402_v6, %v907_v28  ;;  %v905_v28 = vsel %vm40_vm0, %v4272_v14, %v4274_v15  ;;  %v961_v15 = vsel %vm40_vm0, %v810_v34, %v4272_v14 }
 0x234   :  { %v4392_v31 = vpop.permute.xlu1 %1499 }
 0x235   :  { %6727 = vst [vmem:[#allocation43_spill] sm:$0xff] %v4392_v31  ;;  %v4394_v2 = vpop.permute.xlu0 %1533 }
 0x236   :  { %6728 = vst [vmem:[#allocation44_spill] sm:$0xff] %v4394_v2  ;;  %1103 = vrot.lane.b32.xlu1 %v4370_v53, %s3755_s30 }
 0x237   :  { %1327 = vrot.lane.b32.xlu0 %v4374_v30, %s3756_s0 }
 0x238   :  { %v4408_v1 = vpop.permute.xlu1 %1761 }
 0x239   :  { %6729 = vst [vmem:[#allocation45_spill] sm:$0xff] %v4408_v1  ;;  %v812_v31 = vpop.permute.xlu0 %811  ;;  %v4423_v1 = vrot.slane %v969_v29, %v3909_v20 }
 0x23a   :  { %v910_v2 = vsel %vm40_vm0, %v4336_v60, %v812_v31  ;;  %1107 = vrot.lane.b32.xlu1 %v4382_v32, %s3755_s30  ;;  %v962_v3 = vsel %vm40_vm0, %v812_v31, %v4326_v57 }
 0x23b   :  { %v998_v35 = vmul.f32 %v4402_v6, %v910_v2  ;;  %1549 = vrot.lane.b32.xlu0 %v4374_v30, %s3757_s7  ;;  %v4431_v2 = vrot.slane %v969_v29, %v3919_v24  ;;  %v992_v41 = vmul.f32 %v4423_v1, %v905_v28 }
 0x23c   :  { %v4420_v59 = vpop.permute.xlu1 %1765 }
 0x23d   :  { %6730 = vst [vmem:[#allocation46_spill] sm:$0xff] %v4420_v59  ;;  %v4425_v55 = vpop.permute.xlu0 %1057  ;;  %v3586_v26 = vpack.c.bf16 %v998_v35, %v994_v4  ;;  %v4442_v4 = vmax.f32 %v749_v5, 0.0  ;;  %v640_v35 = vadd.f32 %v4111_v36, %v4254_v8  ;;  %v4447_v59 = vrot.slane %v969_v29, %v3921_v25 }
 0x23e   :  { %6731 = vst [vmem:[#allocation47_spill] sm:$0xff] %v4425_v55  ;;  %1325 = vrot.lane.b32.xlu1 %v4370_v53, %s3756_s0  ;;  %v993_v31 = vmul.f32 %v4431_v2, %v906_v33  ;;  %v753_v33 = vadd.f32 %v4113_v37, %v4254_v8 }
 0x23f   :  { %1787 = vrot.lane.b32.xlu0 %v4374_v30, %s3758_s8  ;;  %3587 = vmatprep.subr.bf16.mxu1 %v3586_v26  ;;  %6732 = vst [vmem:[#allocation48_spill] sm:$0xff] %v4442_v4  ;;  %v995_v36 = vmul.f32 %v4447_v59, %v962_v3  ;;  %v991_v14 = vmul.f32 %v4447_v59, %v961_v15  ;;  %v4471_v28 = vmax.f32 %v640_v35, 0.0 }
 0x240   :  { %v866_v55 = vpop.permute.xlu1 %865  ;;  %v4483_v15 = vmax.f32 %v753_v33, 0.0 }
 0x241   :  { %v908_v16 = vsel %vm40_vm0, %v4326_v57, %v866_v55  ;;  %v909_v26 = vsel %vm40_vm0, %v866_v55, %v4336_v60  ;;  %v4456_v5 = vpop.permute.xlu0 %1279  ;;  %6735 = vst [vmem:[#allocation51_spill] sm:$0xff] %v4471_v28  ;;  %v3444_v3 = vpack.c.bf16 %v995_v36, %v991_v14 }
 0x242   :  { %v996_v29 = vmul.f32 %v4423_v1, %v908_v16  ;;  %v997_v27 = vmul.f32 %v4431_v2, %v909_v26  ;;  %1329 = vrot.lane.b32.xlu1 %v4382_v32, %s3756_s0  ;;  %6738 = vst [vmem:[#allocation54_spill] sm:$0xff] %v4483_v15 }
 0x243   :  { %1791 = vrot.lane.b32.xlu0 %v4442_v4, %s3758_s8 }
 0x244   :  { %v3588_v57 = vpack.c.bf16 %v997_v27, %v993_v31  ;;  %v4467_v55 = vpop.permute.xlu1 %1087  ;;  %v3442_v60 = vpack.c.bf16 %v996_v29, %v992_v41 }
 0x245   :  { %6733 = vst [vmem:[#allocation49_spill] sm:$0xff] %v4467_v55  ;;  %v4469_v34 = vpop.permute.xlu0 %1501 }
 0x246   :  { %6734 = vst [vmem:[#allocation50_spill] sm:$0xff] %v4469_v34  ;;  %1547 = vrot.lane.b32.xlu1 %v4370_v53, %s3757_s7  ;;  %3443 = vmatprep.subr.bf16.mxu0 %v3442_v60 }
 0x247   :  { %3589 = vmatpush1.bf16.msra.mxu1 %v3588_v57  ;;  %887 = vrot.lane.b32.xlu0 %v4471_v28, %s3754_s25 }
 0x248   :  { %3445 = vmatpush1.bf16.msra.mxu0 %v3444_v3  ;;  %v4479_v27 = vpop.permute.xlu1 %1309 }
 0x249   :  { %6736 = vst [vmem:[#allocation52_spill] sm:$0xff] %v4479_v27  ;;  %v4481_v41 = vpop.permute.xlu0 %1763 }
 0x24a   :  { %6737 = vst [vmem:[#allocation53_spill] sm:$0xff] %v4481_v41  ;;  %1551 = vrot.lane.b32.xlu1 %v4382_v32, %s3757_s7 }
 0x24b   :  { %891 = vrot.lane.b32.xlu0 %v4483_v15, %s3754_s25 }
 0x24c   :  { %v4489_v37 = vpop.permute.xlu1 %1531 }
 0x24d   :  { %6739 = vst [vmem:[#allocation55_spill] sm:$0xff] %v4489_v37  ;;  %v4491_v35 = vpop.permute.xlu0 %1767  ;;  %v765_v37 = vadd.f32 %v4141_v49, %v4266_v13 }
 0x24e   :  { %6740 = vst [vmem:[#allocation56_spill] sm:$0xff] %v4491_v35  ;;  %1785 = vrot.lane.b32.xlu1 %v4370_v53, %s3758_s8  ;;  %v755_v35 = vadd.f32 %v4117_v39, %v4254_v8 }
 0x24f   :  { %1109 = vrot.lane.b32.xlu0 %v4471_v28, %s3755_s30 }
 0x250   :  { %v4497_v16 = vpop.permute.xlu1 %869 }
 0x251   :  { %v4499_v26 = vpop.permute.xlu0 %871 }
 0x252   :  { %1789 = vrot.lane.b32.xlu1 %v4382_v32, %s3758_s8  ;;  %v911_v55 = vsel %vm40_vm0, %v4497_v16, %v4499_v26 }
 0x253   :  { %1113 = vrot.lane.b32.xlu0 %v4483_v15, %s3755_s30 }
 0x254   :  { %v4505_v31 = vpop.permute.xlu1 %873 }
 0x255   :  { %v4507_v36 = vpop.permute.xlu0 %1093  ;;  %v912_v49 = vsel %vm40_vm0, %v4499_v26, %v4505_v31 }
 0x256   :  { %6741 = vst [vmem:[#allocation57_spill] sm:$0xff] %v4507_v36  ;;  %817 = vrot.lane.b32.xlu1 %v4442_v4, %s3754_s25 }
 0x257   :  { %1331 = vrot.lane.b32.xlu0 %v4471_v28, %s3756_s0 }
 0x258   :  { %v4513_v29 = vpop.permute.xlu1 %1091 }
 0x259   :  { %6742 = vst [vmem:[#allocation58_spill] sm:$0xff] %v4513_v29  ;;  %v4515_v14 = vpop.permute.xlu0 %1315 }
 0x25a   :  { %6743 = vst [vmem:[#allocation59_spill] sm:$0xff] %v4515_v14  ;;  %1063 = vrot.lane.b32.xlu1 %v4442_v4, %s3755_s30  ;;  %v4543_v14 = vmax.f32 %v755_v35, 0.0 }
 0x25b   :  { %1335 = vrot.lane.b32.xlu0 %v4483_v15, %s3756_s0 }
 0x25c   :  { %v4521_v57 = vpop.permute.xlu1 %1095  ;;  %6750 = vst [vmem:[#allocation66_spill] sm:$0xff] %v4543_v14 }
 0x25d   :  { %6744 = vst [vmem:[#allocation60_spill] sm:$0xff] %v4521_v57  ;;  %v4523_v60 = vpop.permute.xlu0 %1537  ;;  %v648_v57 = vadd.f32 %v4129_v44, %v4264_v11 }
 0x25e   :  { %6745 = vst [vmem:[#allocation61_spill] sm:$0xff] %v4523_v60  ;;  %1285 = vrot.lane.b32.xlu1 %v4442_v4, %s3756_s0 }
 0x25f   :  { %1553 = vrot.lane.b32.xlu0 %v4471_v28, %s3757_s7  ;;  %v4601_v36 = vmax.f32 %v648_v57, 0.0 }
 0x260   :  { %v4529_v33 = vpop.permute.xlu1 %1313 }
 0x261   :  { %6746 = vst [vmem:[#allocation62_spill] sm:$0xff] %v4529_v33  ;;  %v4531_v3 = vpop.permute.xlu0 %1771  ;;  %6762 = vst [vmem:[#allocation78_spill] sm:$0xff] %v4601_v36 }
 0x262   :  { %6747 = vst [vmem:[#allocation63_spill] sm:$0xff] %v4531_v3  ;;  %1507 = vrot.lane.b32.xlu1 %v4442_v4, %s3757_s7  ;;  %v642_v3 = vadd.f32 %v4115_v38, %v4254_v8 }
 0x263   :  { %1557 = vrot.lane.b32.xlu0 %v4483_v15, %s3757_s7 }
 0x264   :  { %v4539_v60 = vpop.permute.xlu1 %1317 }
 0x265   :  { %6748 = vst [vmem:[#allocation64_spill] sm:$0xff] %v4539_v60  ;;  %v4541_v41 = vpop.permute.xlu0 %1775  ;;  %v4557_v60 = vmax.f32 %v642_v3, 0.0 }
 0x266   :  { %6749 = vst [vmem:[#allocation65_spill] sm:$0xff] %v4541_v41  ;;  %1793 = vrot.lane.b32.xlu1 %v4471_v28, %s3758_s8 }
 0x267   :  { %819 = vrot.lane.b32.xlu0 %v4543_v14, %s3754_s25  ;;  %6752 = vst [vmem:[#allocation68_spill] sm:$0xff] %v4557_v60 }
 0x268   :  { %v4551_v39 = vpop.permute.xlu1 %1535 }
 0x269   :  { %6751 = vst [vmem:[#allocation67_spill] sm:$0xff] %v4551_v39  ;;  %v4553_v33 = vpop.permute.xlu0 %875  ;;  %v646_v39 = vadd.f32 %v4125_v42, %v4264_v11 }
 0x26a   :  { %1797 = vrot.lane.b32.xlu1 %v4483_v15, %s3758_s8 }
 0x26b   :  { %1065 = vrot.lane.b32.xlu0 %v4543_v14, %s3755_s30 }
 0x26c   :  { %v4561_v35 = vpop.permute.xlu1 %1539 }
 0x26d   :  { %6753 = vst [vmem:[#allocation69_spill] sm:$0xff] %v4561_v35  ;;  %v880_v41 = vpop.permute.xlu0 %879 }
 0x26e   :  { %889 = vrot.lane.b32.xlu1 %v4557_v60, %s3754_s25 }
 0x26f   :  { %1287 = vrot.lane.b32.xlu0 %v4543_v14, %s3756_s0 }
 0x270   :  { %v4567_v38 = vpop.permute.xlu1 %1769 }
 0x271   :  { %6754 = vst [vmem:[#allocation70_spill] sm:$0xff] %v4567_v38  ;;  %v4569_v8 = vpop.permute.xlu0 %1097 }
 0x272   :  { %6755 = vst [vmem:[#allocation71_spill] sm:$0xff] %v4569_v8  ;;  %1111 = vrot.lane.b32.xlu1 %v4557_v60, %s3755_s30 }
 0x273   :  { %1509 = vrot.lane.b32.xlu0 %v4543_v14, %s3757_s7 }
 0x274   :  { %v4575_v3 = vpop.permute.xlu1 %1773 }
 0x275   :  { %6756 = vst [vmem:[#allocation72_spill] sm:$0xff] %v4575_v3  ;;  %v4577_v35 = vpop.permute.xlu0 %1101  ;;  %v759_v3 = vadd.f32 %v4127_v43, %v4264_v11 }
 0x276   :  { %6757 = vst [vmem:[#allocation73_spill] sm:$0xff] %v4577_v35  ;;  %1333 = vrot.lane.b32.xlu1 %v4557_v60, %s3756_s0  ;;  %v4593_v35 = vmax.f32 %v646_v39, 0.0 }
 0x277   :  { %1795 = vrot.lane.b32.xlu0 %v4557_v60, %s3758_s8  ;;  %v4605_v44 = vmax.f32 %v759_v3, 0.0 }
 0x278   :  { %v814_v38 = vpop.permute.xlu1 %813  ;;  %6759 = vst [vmem:[#allocation75_spill] sm:$0xff] %v4593_v35 }
 0x279   :  { %v4585_v8 = vpop.permute.xlu0 %1319  ;;  %6763 = vst [vmem:[#allocation79_spill] sm:$0xff] %v4605_v44  ;;  %v913_v3 = vsel %vm40_vm0, %v4505_v31, %v814_v38 }
 0x27a   :  { %6758 = vst [vmem:[#allocation74_spill] sm:$0xff] %v4585_v8  ;;  %1555 = vrot.lane.b32.xlu1 %v4557_v60, %s3757_s7 }
 0x27b   :  { %1799 = vrot.lane.b32.xlu0 %v4543_v14, %s3758_s8 }
 0x27c   :  { %v4597_v42 = vpop.permute.xlu1 %1059 }
 0x27d   :  { %6760 = vst [vmem:[#allocation76_spill] sm:$0xff] %v4597_v42  ;;  %v4599_v29 = vpop.permute.xlu0 %1323 }
 0x27e   :  { %6761 = vst [vmem:[#allocation77_spill] sm:$0xff] %v4599_v29  ;;  %893 = vrot.lane.b32.xlu1 %v4593_v35, %s3754_s25 }
 0x27f   :  { %895 = vrot.lane.b32.xlu0 %v4601_v36, %s3754_s25 }
 0x280   :  { %v4609_v43 = vpop.permute.xlu1 %1281 }
 0x281   :  { %6764 = vst [vmem:[#allocation80_spill] sm:$0xff] %v4609_v43  ;;  %v4611_v39 = vpop.permute.xlu0 %1541  ;;  %v652_v43 = vadd.f32 %v4139_v48, %v4266_v13 }
 0x282   :  { %6765 = vst [vmem:[#allocation81_spill] sm:$0xff] %v4611_v39  ;;  %897 = vrot.lane.b32.xlu1 %v4605_v44, %s3754_s25 }
 0x283   :  { %1117 = vrot.lane.b32.xlu0 %v4601_v36, %s3755_s30  ;;  %v4644_v34 = vmax.f32 %v652_v43, 0.0  ;;  %v1000_v43 = vmul.f32 %v4423_v1, %v911_v55 }
 0x284   :  { %v4617_v57 = vpop.permute.xlu1 %1503 }
 0x285   :  { %6766 = vst [vmem:[#allocation82_spill] sm:$0xff] %v4617_v57  ;;  %v4619_v8 = vpop.permute.xlu0 %1545  ;;  %6771 = vst [vmem:[#allocation87_spill] sm:$0xff] %v4644_v34 }
 0x286   :  { %6767 = vst [vmem:[#allocation83_spill] sm:$0xff] %v4619_v8  ;;  %1115 = vrot.lane.b32.xlu1 %v4593_v35, %s3755_s30  ;;  %v1002_v8 = vmul.f32 %v4402_v6, %v913_v3  ;;  %v4656_v3 = vmax.f32 %v765_v37, 0.0 }
 0x287   :  { %1339 = vrot.lane.b32.xlu0 %v4601_v36, %s3756_s0 }
 0x288   :  { %v4627_v39 = vpop.permute.xlu1 %1777  ;;  %6772 = vst [vmem:[#allocation88_spill] sm:$0xff] %v4656_v3 }
 0x289   :  { %6768 = vst [vmem:[#allocation84_spill] sm:$0xff] %v4627_v39  ;;  %v816_v29 = vpop.permute.xlu0 %815 }
 0x28a   :  { %v916_v42 = vsel %vm40_vm0, %v880_v41, %v816_v29  ;;  %1119 = vrot.lane.b32.xlu1 %v4605_v44, %s3755_s30 }
 0x28b   :  { %v1006_v57 = vmul.f32 %v4402_v6, %v916_v42  ;;  %1561 = vrot.lane.b32.xlu0 %v4601_v36, %s3757_s7  ;;  %v964_v42 = vsel %vm40_vm0, %v816_v29, %v4553_v33  ;;  %v1001_v29 = vmul.f32 %v4431_v2, %v912_v49 }
 0x28c   :  { %v4640_v39 = vpop.permute.xlu1 %1781  ;;  %v1003_v37 = vmul.f32 %v4447_v59, %v964_v42  ;;  %v761_v42 = vadd.f32 %v4131_v45, %v4264_v11 }
 0x28d   :  { %6769 = vst [vmem:[#allocation85_spill] sm:$0xff] %v4640_v39  ;;  %v4642_v27 = vpop.permute.xlu0 %1061  ;;  %v3590_v48 = vpack.c.bf16 %v1006_v57, %v1002_v8  ;;  %v963_v57 = vsel %vm40_vm0, %v814_v38, %v4497_v16 }
 0x28e   :  { %6770 = vst [vmem:[#allocation86_spill] sm:$0xff] %v4642_v27  ;;  %1337 = vrot.lane.b32.xlu1 %v4593_v35, %s3756_s0  ;;  %v999_v55 = vmul.f32 %v4447_v59, %v963_v57  ;;  %v4701_v57 = vmax.f32 %v761_v42, 0.0 }
 0x28f   :  { %3591 = vmatprep.subr.bf16.mxu1 %v3590_v48  ;;  %899 = vrot.lane.b32.xlu0 %v4644_v34, %s3754_s25 }
 0x290   :  { %v878_v8 = vpop.permute.xlu1 %877  ;;  %v3448_v49 = vpack.c.bf16 %v1003_v37, %v999_v55  ;;  %6779 = vst [vmem:[#allocation95_spill] sm:$0xff] %v4701_v57  ;;  %v767_v55 = vadd.f32 %v4145_v51, %v4266_v13 }
 0x291   :  { %v914_v39 = vsel %vm40_vm0, %v4553_v33, %v878_v8  ;;  %v915_v26 = vsel %vm40_vm0, %v878_v8, %v880_v41  ;;  %v4666_v31 = vpop.permute.xlu0 %1283 }
 0x292   :  { %6773 = vst [vmem:[#allocation89_spill] sm:$0xff] %v4666_v31  ;;  %v1004_v48 = vmul.f32 %v4423_v1, %v914_v39  ;;  %v1005_v27 = vmul.f32 %v4431_v2, %v915_v26  ;;  %1341 = vrot.lane.b32.xlu1 %v4605_v44, %s3756_s0  ;;  %v4737_v42 = vmax.f32 %v767_v55, 0.0 }
 0x293   :  { %903 = vrot.lane.b32.xlu0 %v4656_v3, %s3754_s25 }
 0x294   :  { %v3592_v16 = vpack.c.bf16 %v1005_v27, %v1001_v29  ;;  %v4677_v41 = vpop.permute.xlu1 %1099  ;;  %v3446_v33 = vpack.c.bf16 %v1004_v48, %v1000_v43  ;;  %6785 = vst [vmem:[#allocation101_spill] sm:$0xff] %v4737_v42 }
 0x295   :  { %v4679_v38 = vpop.permute.xlu0 %1505 }
 0x296   :  { %6774 = vst [vmem:[#allocation90_spill] sm:$0xff] %v4679_v38  ;;  %1559 = vrot.lane.b32.xlu1 %v4593_v35, %s3757_s7  ;;  %3447 = vmatprep.subr.bf16.mxu0 %v3446_v33 }
 0x297   :  { %3593 = vmatpush1.bf16.msra.mxu1 %v3592_v16  ;;  %1121 = vrot.lane.b32.xlu0 %v4644_v34, %s3755_s30  ;;  %v654_v16 = vadd.f32 %v4143_v50, %v4266_v13 }
 0x298   :  { %3449 = vmatpush1.bf16.msra.mxu0 %v3448_v49  ;;  %v4685_v39 = vpop.permute.xlu1 %1321 }
 0x299   :  { %6775 = vst [vmem:[#allocation91_spill] sm:$0xff] %v4685_v39  ;;  %v4687_v27 = vpop.permute.xlu0 %1779 }
 0x29a   :  { %6776 = vst [vmem:[#allocation92_spill] sm:$0xff] %v4687_v27  ;;  %1563 = vrot.lane.b32.xlu1 %v4605_v44, %s3757_s7 }
 0x29b   :  { %1125 = vrot.lane.b32.xlu0 %v4656_v3, %s3755_s30 }
 0x29c   :  { %v4695_v8 = vpop.permute.xlu1 %1543 }
 0x29d   :  { %6777 = vst [vmem:[#allocation93_spill] sm:$0xff] %v4695_v8  ;;  %v4697_v43 = vpop.permute.xlu0 %1783 }
 0x29e   :  { %6778 = vst [vmem:[#allocation94_spill] sm:$0xff] %v4697_v43  ;;  %1801 = vrot.lane.b32.xlu1 %v4593_v35, %s3758_s8  ;;  %v4741_v43 = vmax.f32 %v654_v16, 0.0 }
 0x29f   :  { %1343 = vrot.lane.b32.xlu0 %v4644_v34, %s3756_s0 }
 0x2a0   :  { %v4705_v26 = vpop.permute.xlu1 %881  ;;  %6786 = vst [vmem:[#allocation102_spill] sm:$0xff] %v4741_v43 }
 0x2a1   :  { %v4707_v29 = vpop.permute.xlu0 %883 }
 0x2a2   :  { %821 = vrot.lane.b32.xlu1 %v4701_v57, %s3754_s25 }
 0x2a3   :  { %1347 = vrot.lane.b32.xlu0 %v4656_v3, %s3756_s0 }
 0x2a4   :  { %v4713_v45 = vpop.permute.xlu1 %885 }
 0x2a5   :  { %v4715_v11 = vpop.permute.xlu0 %1105 }
 0x2a6   :  { %6780 = vst [vmem:[#allocation96_spill] sm:$0xff] %v4715_v11  ;;  %1067 = vrot.lane.b32.xlu1 %v4701_v57, %s3755_s30 }
 0x2a7   :  { %1565 = vrot.lane.b32.xlu0 %v4644_v34, %s3757_s7 }
 0x2a8   :  { %v4721_v37 = vpop.permute.xlu1 %1103 }
 0x2a9   :  { %6781 = vst [vmem:[#allocation97_spill] sm:$0xff] %v4721_v37  ;;  %v4723_v48 = vpop.permute.xlu0 %1327 }
 0x2aa   :  { %6782 = vst [vmem:[#allocation98_spill] sm:$0xff] %v4723_v48  ;;  %1289 = vrot.lane.b32.xlu1 %v4701_v57, %s3756_s0 }
 0x2ab   :  { %1569 = vrot.lane.b32.xlu0 %v4656_v3, %s3757_s7 }
 0x2ac   :  { %v4733_v33 = vpop.permute.xlu1 %1107 }
 0x2ad   :  { %6783 = vst [vmem:[#allocation99_spill] sm:$0xff] %v4733_v33  ;;  %v4735_v49 = vpop.permute.xlu0 %1549 }
 0x2ae   :  { %6784 = vst [vmem:[#allocation100_spill] sm:$0xff] %v4735_v49  ;;  %1511 = vrot.lane.b32.xlu1 %v4701_v57, %s3757_s7 }
 0x2af   :  { %823 = vrot.lane.b32.xlu0 %v4737_v42, %s3754_s25 }
 0x2b0   :  { %v4745_v51 = vpop.permute.xlu1 %1325 }
 0x2b1   :  { %6787 = vst [vmem:[#allocation103_spill] sm:$0xff] %v4745_v51  ;;  %v4747_v50 = vpop.permute.xlu0 %1787 }
 0x2b2   :  { %6788 = vst [vmem:[#allocation104_spill] sm:$0xff] %v4747_v50  ;;  %901 = vrot.lane.b32.xlu1 %v4741_v43, %s3754_s25 }
 0x2b3   :  { %1069 = vrot.lane.b32.xlu0 %v4737_v42, %s3755_s30 }
 0x2b4   :  { %v4753_v13 = vpop.permute.xlu1 %1329 }
 0x2b5   :  { %6789 = vst [vmem:[#allocation105_spill] sm:$0xff] %v4753_v13  ;;  %v4755_v55 = vpop.permute.xlu0 %1791 }
 0x2b6   :  { %6790 = vst [vmem:[#allocation106_spill] sm:$0xff] %v4755_v55  ;;  %1123 = vrot.lane.b32.xlu1 %v4741_v43, %s3755_s30 }
 0x2b7   :  { %1291 = vrot.lane.b32.xlu0 %v4737_v42, %s3756_s0 }
 0x2b8   :  { %v4761_v16 = vpop.permute.xlu1 %1547 }
 0x2b9   :  { %6791 = vst [vmem:[#allocation107_spill] sm:$0xff] %v4761_v16  ;;  %v888_v27 = vpop.permute.xlu0 %887 }
 0x2ba   :  { %1345 = vrot.lane.b32.xlu1 %v4741_v43, %s3756_s0 }
 0x2bb   :  { %1513 = vrot.lane.b32.xlu0 %v4737_v42, %s3757_s7 }
 0x2bc   :  { %v4767_v50 = vpop.permute.xlu1 %1551 }
 0x2bd   :  { %6792 = vst [vmem:[#allocation108_spill] sm:$0xff] %v4767_v50  ;;  %v892_v49 = vpop.permute.xlu0 %891 }
 0x2be   :  { %1567 = vrot.lane.b32.xlu1 %v4741_v43, %s3757_s7 }
 0x2bf   :  { %1803 = vrot.lane.b32.xlu0 %v4601_v36, %s3758_s8 }
 0x2c0   :  { %v4773_v55 = vpop.permute.xlu1 %1785 }
 0x2c1   :  { %6793 = vst [vmem:[#allocation109_spill] sm:$0xff] %v4773_v55  ;;  %v4775_v8 = vpop.permute.xlu0 %1109 }
 0x2c2   :  { %6794 = vst [vmem:[#allocation110_spill] sm:$0xff] %v4775_v8  ;;  %1805 = vrot.lane.b32.xlu1 %v4605_v44, %s3758_s8  ;;  %v2642_v8 = vld [vmem:[%s6463_s4 + $0x8] sm:$0xff] }
 0x2c3   :  { %1807 = vrot.lane.b32.xlu0 %v4701_v57, %s3758_s8  ;;  %3221 = vmatprep.mubr.f32.mxu1 %v2642_v8 }
 0x2c4   :  { %v4781_v16 = vpop.permute.xlu1 %1789  ;;  %3008 = vmatprep.mubr.f32.mxu0 %v2642_v8 }
 0x2c5   :  { %6795 = vst [vmem:[#allocation111_spill] sm:$0xff] %v4781_v16  ;;  %v4783_v50 = vpop.permute.xlu0 %1113 }
 0x2c6   :  { %6796 = vst [vmem:[#allocation112_spill] sm:$0xff] %v4783_v50  ;;  %1809 = vrot.lane.b32.xlu1 %v4644_v34, %s3758_s8 }
 0x2c7   :  { %1811 = vrot.lane.b32.xlu0 %v4741_v43, %s3758_s8 }
 0x2c8   :  { %v818_v13 = vpop.permute.xlu1 %817 }
 0x2c9   :  { %v4789_v55 = vpop.permute.xlu0 %1331 }
 0x2ca   :  { %6797 = vst [vmem:[#allocation113_spill] sm:$0xff] %v4789_v55  ;;  %1813 = vrot.lane.b32.xlu1 %v4656_v3, %s3758_s8 }
 0x2cb   :  { %1815 = vrot.lane.b32.xlu0 %v4737_v42, %s3758_s8 }
 0x2cc   :  { %v4795_v51 = vpop.permute.xlu1 %1063 }
 0x2cd   :  { %6798 = vst [vmem:[#allocation114_spill] sm:$0xff] %v4795_v51  ;;  %v4797_v16 = vpop.permute.xlu0 %1335 }
 0x2ce   :  { %6799 = vst [vmem:[#allocation115_spill] sm:$0xff] %v4797_v16  ;;  %1975 = vrot.lane.b32.xlu1 %v4063_v10, %s3759_s9 }
 0x2cf   :  { %1977 = vrot.lane.b32.xlu0 %v4065_v12, %s3759_s9 }
 0x2d0   :  { %v4803_v48 = vpop.permute.xlu1 %1285 }
 0x2d1   :  { %6800 = vst [vmem:[#allocation116_spill] sm:$0xff] %v4803_v48  ;;  %v4805_v38 = vpop.permute.xlu0 %1553 }
 0x2d2   :  { %6801 = vst [vmem:[#allocation117_spill] sm:$0xff] %v4805_v38  ;;  %1979 = vrot.lane.b32.xlu1 %v4073_v17, %s3759_s9  ;;  %v919_v38 = vsel %vm40_vm0, %v4713_v45, %v818_v13 }
 0x2d3   :  { %1981 = vrot.lane.b32.xlu0 %v4123_v40, %s3759_s9 }
 0x2d4   :  { %v4811_v55 = vpop.permute.xlu1 %1507 }
 0x2d5   :  { %6802 = vst [vmem:[#allocation118_spill] sm:$0xff] %v4811_v55  ;;  %v4813_v39 = vpop.permute.xlu0 %1557  ;;  %v1010_v55 = vmul.f32 %v4402_v6, %v919_v38  ;;  %v917_v38 = vsel %vm40_vm0, %v4705_v26, %v4707_v29 }
 0x2d6   :  { %6803 = vst [vmem:[#allocation119_spill] sm:$0xff] %v4813_v39  ;;  %1983 = vrot.lane.b32.xlu1 %v4137_v46, %s3759_s9  ;;  %v1008_v50 = vmul.f32 %v4423_v1, %v917_v38 }
 0x2d7   :  { %1985 = vrot.lane.b32.xlu0 %v4192_v56, %s3759_s9 }
 0x2d8   :  { %v4819_v16 = vpop.permute.xlu1 %1793 }
 0x2d9   :  { %6804 = vst [vmem:[#allocation120_spill] sm:$0xff] %v4819_v16  ;;  %v820_v48 = vpop.permute.xlu0 %819 }
 0x2da   :  { %1987 = vrot.lane.b32.xlu1 %v4151_v52, %s3759_s9  ;;  %v922_v51 = vsel %vm40_vm0, %v892_v49, %v820_v48  ;;  %v966_v16 = vsel %vm40_vm0, %v820_v48, %v888_v27  ;;  %v965_v48 = vsel %vm40_vm0, %v818_v13, %v4705_v26 }
 0x2db   :  { %v1014_v39 = vmul.f32 %v4402_v6, %v922_v51  ;;  %1989 = vrot.lane.b32.xlu0 %v4181_v54, %s3759_s9  ;;  %v918_v51 = vsel %vm40_vm0, %v4707_v29, %v4713_v45 }
 0x2dc   :  { %v4830_v33 = vpop.permute.xlu1 %1797  ;;  %v1009_v29 = vmul.f32 %v4431_v2, %v918_v51 }
 0x2dd   :  { %6805 = vst [vmem:[#allocation121_spill] sm:$0xff] %v4830_v33  ;;  %v4833_v37 = vpop.permute.xlu0 %1065  ;;  %v3594_v11 = vpack.c.bf16 %v1014_v39, %v1010_v55  ;;  %v1011_v55 = vmul.f32 %v4447_v59, %v966_v16 }
 0x2de   :  { %6806 = vst [vmem:[#allocation122_spill] sm:$0xff] %v4833_v37  ;;  %1991 = vrot.lane.b32.xlu1 %v4213_v61, %s3759_s9 }
 0x2df   :  { %1993 = vrot.lane.b32.xlu0 %v4215_v62, %s3759_s9  ;;  %3595 = vmatprep.subr.bf16.mxu1 %v3594_v11  ;;  %v1007_v11 = vmul.f32 %v4447_v59, %v965_v48 }
 0x2e0   :  { %v890_v39 = vpop.permute.xlu1 %889 }
 0x2e1   :  { %v920_v33 = vsel %vm40_vm0, %v888_v27, %v890_v39  ;;  %v921_v31 = vsel %vm40_vm0, %v890_v39, %v892_v49  ;;  %v4857_v26 = vpop.permute.xlu0 %1287  ;;  %v3452_v16 = vpack.c.bf16 %v1011_v55, %v1007_v11 }
 0x2e2   :  { %v1012_v8 = vmul.f32 %v4423_v1, %v920_v33  ;;  %v1013_v45 = vmul.f32 %v4431_v2, %v921_v31  ;;  %6807 = vst [vmem:[#allocation123_spill] sm:$0xff] %v4857_v26  ;;  %1995 = vrot.lane.b32.xlu1 %v4221_v63, %s3759_s9 }
 0x2e3   :  { %1997 = vrot.lane.b32.xlu0 %v4240_v7, %s3759_s9 }
 0x2e4   :  { %v3596_v13 = vpack.c.bf16 %v1013_v45, %v1009_v29  ;;  %v4864_v27 = vpop.permute.xlu1 %1111  ;;  %v3450_v49 = vpack.c.bf16 %v1012_v8, %v1008_v50 }
 0x2e5   :  { %6808 = vst [vmem:[#allocation124_spill] sm:$0xff] %v4864_v27  ;;  %v4866_v38 = vpop.permute.xlu0 %1509 }
 0x2e6   :  { %6809 = vst [vmem:[#allocation125_spill] sm:$0xff] %v4866_v38  ;;  %1999 = vrot.lane.b32.xlu1 %v4247_v0, %s3759_s9  ;;  %3451 = vmatprep.subr.bf16.mxu0 %v3450_v49  ;;  %v3403_v38 = vld [vmem:[%s6461_s1 + $0x3] ss:$8 sm:$0xf] }
 0x2e7   :  { %3597 = vmatpush1.bf16.msra.mxu1 %v3596_v13  ;;  %3453 = vmatpush1.bf16.msra.mxu0 %v3452_v16  ;;  %v4980_v27 = vrot.slane %v3403_v38, %v3919_v24 }
 0x2e8   :  { %2001 = vrot.lane.b32.xlu0 %v4332_v58, %s3759_s9  ;;  %v4872_v31 = vpop.permute.xlu1 %1333 }
 0x2e9   :  { %6810 = vst [vmem:[#allocation126_spill] sm:$0xff] %v4872_v31  ;;  %v4874_v33 = vpop.permute.xlu0 %1795  ;;  %v3404_v31 = vld [vmem:[%s6461_s1 + $0x5] ss:$8 sm:$0xf]  ;;  %6824 = vst [vmem:[#allocation140_spill] sm:$0xff] %v4980_v27 }
 0x2ea   :  { %6811 = vst [vmem:[#allocation127_spill] sm:$0xff] %v4874_v33  ;;  %2003 = vrot.lane.b32.xlu1 %v4258_v9, %s3759_s9  ;;  %v3401_v33 = vld [vmem:[%s6461_s1 + $0x1] ss:$8 sm:$0xf]  ;;  %v5006_v37 = vrot.slane %v3404_v31, %v3919_v24 }
 0x2ec   :  { %2005 = vrot.lane.b32.xlu0 %v4315_v47, %s3759_s9  ;;  %v4880_v50 = vpop.permute.xlu1 %1555  ;;  %v5003_v47 = vrot.slane %v3404_v31, %v3909_v20  ;;  %6829 = vst [vmem:[#allocation145_spill] sm:$0xff] %v5006_v37 }
 0x2ed   :  { %6812 = vst [vmem:[#allocation128_spill] sm:$0xff] %v4880_v50  ;;  %v4882_v51 = vpop.permute.xlu0 %1799 }
 0x2ee   :  { %6813 = vst [vmem:[#allocation129_spill] sm:$0xff] %v4882_v51  ;;  %2007 = vrot.lane.b32.xlu1 %v4370_v53, %s3759_s9  ;;  %6828 = vst [vmem:[#allocation144_spill] sm:$0xff] %v5003_v47  ;;  %v6834_v47 = vld [vmem:[#allocation28_spill] sm:$0xff]  ;;  %v6853_v53 = vld [vmem:[#allocation42_spill] sm:$0xff] }
 0x2f0   :  { %2009 = vrot.lane.b32.xlu0 %v4374_v30, %s3759_s9  ;;  %v4888_v48 = vpop.permute.xlu1 %893  ;;  %v6852_v30 = vld [vmem:[#allocation43_spill] sm:$0xff] }
 0x2f1   :  { %v4890_v39 = vpop.permute.xlu0 %895 }
 0x2f2   :  { %2011 = vrot.lane.b32.xlu1 %v4382_v32, %s3759_s9 }
 0x2f4   :  { %2013 = vrot.lane.b32.xlu0 %v4442_v4, %s3759_s9  ;;  %v4896_v55 = vpop.permute.xlu1 %897  ;;  %v6851_v4 = vld [vmem:[#allocation49_spill] sm:$0xff] }
 0x2f5   :  { %v4898_v29 = vpop.permute.xlu0 %1117 }
 0x2f6   :  { %6814 = vst [vmem:[#allocation130_spill] sm:$0xff] %v4898_v29  ;;  %2015 = vrot.lane.b32.xlu1 %v4471_v28, %s3759_s9  ;;  %v4989_v29 = vrot.slane %v3404_v31, %v3921_v25 }
 0x2f8   :  { %2017 = vrot.lane.b32.xlu0 %v4557_v60, %s3759_s9  ;;  %v4904_v8 = vpop.permute.xlu1 %1115  ;;  %6825 = vst [vmem:[#allocation141_spill] sm:$0xff] %v4989_v29  ;;  %v1127_v29 = vsel %vm88_vm1, %v4288_v19, %v4282_v18  ;;  %v6848_v60 = vld [vmem:[#allocation35_spill] sm:$0xff] }
 0x2f9   :  { %6815 = vst [vmem:[#allocation131_spill] sm:$0xff] %v4904_v8  ;;  %v4906_v45 = vpop.permute.xlu0 %1339  ;;  %v5016_v8 = vrot.slane %v3401_v33, %v3911_v21  ;;  %v1406_v28 = vsel %vm137_vm3, %v4456_v5, %v6848_v60 }
 0x2fa   :  { %6816 = vst [vmem:[#allocation132_spill] sm:$0xff] %v4906_v45  ;;  %2019 = vrot.lane.b32.xlu1 %v4483_v15, %s3759_s9 }
 0x2fc   :  { %2021 = vrot.lane.b32.xlu0 %v4543_v14, %s3759_s9  ;;  %v4912_v11 = vpop.permute.xlu1 %1119 }
 0x2fd   :  { %6817 = vst [vmem:[#allocation133_spill] sm:$0xff] %v4912_v11  ;;  %v4914_v13 = vpop.permute.xlu0 %1561  ;;  %v4992_v11 = vrot.slane %v3404_v31, %v3911_v21  ;;  %v6833_v31 = vld [vmem:[#allocation22_spill] sm:$0xff] }
 0x2fe   :  { %6818 = vst [vmem:[#allocation134_spill] sm:$0xff] %v4914_v13  ;;  %2023 = vrot.lane.b32.xlu1 %v4593_v35, %s3759_s9  ;;  %v3402_v13 = vld [vmem:[%s6461_s1 + $0x2] ss:$8 sm:$0xf] }
 0x2ff   :  { %6826 = vst [vmem:[#allocation142_spill] sm:$0xff] %v4992_v11  ;;  %v6831_v11 = vld [vmem:[#allocation23_spill] sm:$0xff]  ;;  %v5058_v14 = vrot.slane %v3402_v13, %v3911_v21 }
 0x300   :  { %2025 = vrot.lane.b32.xlu0 %v4601_v36, %s3759_s9  ;;  %v4920_v49 = vpop.permute.xlu1 %1337  ;;  %v4954_v36 = vrot.slane %v3402_v13, %v3909_v20 }
 0x301   :  { %6819 = vst [vmem:[#allocation135_spill] sm:$0xff] %v4920_v49  ;;  %v4922_v16 = vpop.permute.xlu0 %899  ;;  %v4947_v49 = vrot.slane %v3401_v33, %v3919_v24 }
 0x302   :  { %2027 = vrot.lane.b32.xlu1 %v4605_v44, %s3759_s9  ;;  %v5048_v44 = vrot.slane %v3402_v13, %v3921_v25 }
 0x304   :  { %2029 = vrot.lane.b32.xlu0 %v4701_v57, %s3759_s9  ;;  %v4928_v51 = vpop.permute.xlu1 %1341  ;;  %v4944_v57 = vrot.slane %v3401_v33, %v3909_v20 }
 0x305   :  { %6820 = vst [vmem:[#allocation136_spill] sm:$0xff] %v4928_v51  ;;  %v4936_v50 = vpop.permute.xlu0 %903  ;;  %v4957_v51 = vrot.slane %v3402_v13, %v3919_v24  ;;  %v1349_v24 = vsel %vm137_vm3, %v6831_v11, %v4290_v22  ;;  %v6842_v13 = vld [vmem:[#allocation24_spill] sm:$0xff] }
 0x306   :  { %2031 = vrot.lane.b32.xlu1 %v4644_v34, %s3759_s9  ;;  %v6836_v34 = vld [vmem:[#allocation37_spill] sm:$0xff]  ;;  %v5067_v15 = vmul.f32 %v4944_v57, %v1127_v29 }
 0x308   :  { %2033 = vrot.lane.b32.xlu0 %v4741_v43, %s3759_s9  ;;  %v4951_v45 = vpop.permute.xlu1 %1559  ;;  %v4967_v43 = vrot.slane %v3403_v38, %v3909_v20  ;;  %v6832_v20 = vld [vmem:[#allocation25_spill] sm:$0xff] }
 0x309   :  { %6821 = vst [vmem:[#allocation137_spill] sm:$0xff] %v4951_v45  ;;  %v4969_v45 = vpop.permute.xlu0 %1121  ;;  %v1350_v37 = vsel %vm137_vm3, %v4290_v22, %v6832_v20  ;;  %v1129_v22 = vsel %vm88_vm1, %v4296_v23, %v6836_v34 }
 0x30a   :  { %6822 = vst [vmem:[#allocation138_spill] sm:$0xff] %v4967_v43  ;;  %6823 = vst [vmem:[#allocation139_spill] sm:$0xff] %v4969_v45  ;;  %2035 = vrot.lane.b32.xlu1 %v4656_v3, %s3759_s9  ;;  %v1571_v45 = vsel %vm186_vm2, %v6834_v47, %v6833_v31 }
 0x30c   :  { %2037 = vrot.lane.b32.xlu0 %v4737_v42, %s3759_s9  ;;  %v4996_v26 = vpop.permute.xlu1 %1563 }
 0x30d   :  { %6827 = vst [vmem:[#allocation143_spill] sm:$0xff] %v4996_v26  ;;  %v5013_v26 = vrot.slane %v3401_v33, %v3921_v25  ;;  %v5018_v42 = vpop.permute.xlu0 %1125  ;;  %v1128_v33 = vsel %vm88_vm1, %v4282_v18, %v4296_v23  ;;  %v1183_v18 = vsel %vm88_vm1, %v6836_v34, %v4288_v19  ;;  %v5064_v19 = vrot.slane %v3403_v38, %v3911_v21 }
 0x30e   :  { %6830 = vst [vmem:[#allocation146_spill] sm:$0xff] %v5018_v42  ;;  %2197 = vrot.lane.b32.xlu1 %v4063_v10, %s3760_s10  ;;  %v6835_v10 = vld [vmem:[#allocation30_spill] sm:$0xff]  ;;  %v5076_v23 = vmul.f32 %v4957_v51, %v1350_v37  ;;  %v5097_v37 = vmul.f32 %v5016_v8, %v1129_v22 }
 0x30f   :  { %v1572_v3 = vsel %vm186_vm2, %v6833_v31, %v6835_v10  ;;  %v5061_v31 = vrot.slane %v3403_v38, %v3921_v25  ;;  %6839 = vst [vmem:[#allocation22_spill] sm:$0xff] %v5064_v19  ;;  %v5083_v38 = vmul.f32 %v4967_v43, %v1571_v45  ;;  %v6845_v25 = vld [vmem:[#allocation47_spill] sm:$0xff]  ;;  %v6847_v45 = vld [vmem:[#allocation32_spill] sm:$0xff]  ;;  %v6854_v42 = vld [vmem:[#allocation50_spill] sm:$0xff] }
 0x310   :  { %2199 = vrot.lane.b32.xlu0 %v4065_v12, %s3760_s10  ;;  %v5052_v35 = vpop.permute.xlu1 %1801  ;;  %v5070_v12 = vmul.f32 %v4947_v49, %v1128_v33  ;;  %v5086_v29 = vmul.f32 %v4980_v27, %v1572_v3  ;;  %v6843_v33 = vld [vmem:[#allocation31_spill] sm:$0xff]  ;;  %v1184_v3 = vsel %vm88_vm1, %v6845_v25, %v6847_v45 }
 0x311   :  { %6837 = vst [vmem:[#allocation23_spill] sm:$0xff] %v5052_v35  ;;  %6838 = vst [vmem:[#allocation25_spill] sm:$0xff] %v5061_v31  ;;  %v5073_v35 = vmul.f32 %v4954_v36, %v1349_v24  ;;  %v5078_v34 = vpop.permute.xlu0 %1343  ;;  %v5091_v21 = vsel %vm238_vm4, %v6843_v33, %v6842_v13  ;;  %v5094_v24 = vmul.f32 %v5013_v26, %v1183_v18  ;;  %v6850_v13 = vld [vmem:[#allocation39_spill] sm:$0xff] }
 0x312   :  { %6840 = vst [vmem:[#allocation28_spill] sm:$0xff] %v5078_v34  ;;  %2201 = vrot.lane.b32.xlu1 %v4073_v17, %s3760_s10  ;;  %6841 = vst [vmem:[#allocation30_spill] sm:$0xff] %v5086_v29  ;;  %v6846_v34 = vld [vmem:[#allocation34_spill] sm:$0xff]  ;;  %v1354_v33 = vsel %vm137_vm3, %v6850_v13, %v4456_v5  ;;  %v1627_v5 = vsel %vm186_vm2, %v6852_v30, %v6834_v47  ;;  %v6856_v47 = vld [vmem:[#allocation44_spill] sm:$0xff] }
 0x313   :  { %6844 = vst [vmem:[#allocation37_spill] sm:$0xff] %v5091_v21  ;;  %v1132_v17 = vsel %vm88_vm1, %v6846_v34, %v6845_v25  ;;  %v6849_v21 = vld [vmem:[#allocation41_spill] sm:$0xff]  ;;  %v1130_v25 = vsel %vm88_vm1, %v6847_v45, %v6851_v4  ;;  %v1131_v32 = vsel %vm88_vm1, %v6851_v4, %v6846_v34  ;;  %v1628_v45 = vsel %vm186_vm2, %v6854_v42, %v6853_v53 }
 0x314   :  { %2203 = vrot.lane.b32.xlu0 %v4123_v40, %s3760_s10  ;;  %v5110_v18 = vpop.permute.xlu1 %821  ;;  %v1351_v22 = vsel %vm137_vm3, %v6832_v20, %v6849_v21  ;;  %v1405_v40 = vsel %vm137_vm3, %v6849_v21, %v6831_v11  ;;  %v1573_v20 = vsel %vm186_vm2, %v6835_v10, %v6852_v30  ;;  %v5141_v4 = vmul.f32 %v5013_v26, %v1184_v3  ;;  %v6857_v3 = vld [vmem:[#allocation52_spill] sm:$0xff] }
 0x315   :  { %v5136_v9 = vpop.permute.xlu0 %1347  ;;  %v5144_v21 = vmul.f32 %v5016_v8, %v1132_v17  ;;  %v5147_v10 = vmul.f32 %v5048_v44, %v1406_v28  ;;  %v1576_v30 = vsel %vm186_vm2, %v6856_v47, %v6854_v42  ;;  %v5153_v11 = vmul.f32 %v5058_v14, %v1354_v33 }
 0x316   :  { %6855 = vst [vmem:[#allocation47_spill] sm:$0xff] %v5136_v9  ;;  %2205 = vrot.lane.b32.xlu1 %v4137_v46, %s3760_s10  ;;  %v5156_v34 = vmul.f32 %v4944_v57, %v1130_v25  ;;  %v5159_v46 = vmul.f32 %v4947_v49, %v1131_v32  ;;  %v1353_v17 = vsel %vm137_vm3, %v6857_v3, %v6850_v13  ;;  %v6860_v25 = vld [vmem:[#allocation55_spill] sm:$0xff] }
 0x317   :  { %v5169_v42 = vmul.f32 %v5061_v31, %v1628_v45  ;;  %v1352_v33 = vsel %vm137_vm3, %v6848_v60, %v6857_v3  ;;  %v1574_v32 = vsel %vm186_vm2, %v6853_v53, %v6860_v25  ;;  %v1575_v13 = vsel %vm186_vm2, %v6860_v25, %v6856_v47  ;;  %v6876_v47 = vld [vmem:[#allocation71_spill] sm:$0xff] }
 0x318   :  { %2207 = vrot.lane.b32.xlu0 %v4192_v56, %s3760_s10  ;;  %v5166_v28 = vpop.permute.xlu1 %1067  ;;  %v5181_v9 = vmul.f32 %v5048_v44, %v1405_v40  ;;  %v5184_v56 = vmul.f32 %v5058_v14, %v1351_v22  ;;  %v5187_v45 = vmul.f32 %v5061_v31, %v1627_v5  ;;  %v5197_v53 = vmul.f32 %v5064_v19, %v1573_v20  ;;  %v6865_v40 = vld [vmem:[#allocation57_spill] sm:$0xff] }
 0x319   :  { %6858 = vst [vmem:[#allocation34_spill] sm:$0xff] %v5166_v28  ;;  %6859 = vst [vmem:[#allocation32_spill] sm:$0xff] %v5169_v42  ;;  %v5190_v28 = vmul.f32 %v5064_v19, %v1576_v30  ;;  %v5192_v60 = vpop.permute.xlu0 %1565  ;;  %v5202_v22 = vmul.f32 %v4957_v51, %v1353_v17  ;;  %v5209_v30 = vmul.f32 %v4954_v36, %v1352_v33  ;;  %v6871_v33 = vld [vmem:[#allocation53_spill] sm:$0xff] }
 0x31a   :  { %6861 = vst [vmem:[#allocation35_spill] sm:$0xff] %v5187_v45  ;;  %6862 = vst [vmem:[#allocation41_spill] sm:$0xff] %v5192_v60  ;;  %2209 = vrot.lane.b32.xlu1 %v4151_v52, %s3760_s10  ;;  %v5212_v3 = vmul.f32 %v4967_v43, %v1574_v32  ;;  %v5215_v20 = vmul.f32 %v4980_v27, %v1575_v13  ;;  %v6866_v13 = vld [vmem:[#allocation58_spill] sm:$0xff]  ;;  %v6867_v52 = vld [vmem:[#allocation60_spill] sm:$0xff] }
 0x31b   :  { %6863 = vst [vmem:[#allocation39_spill] sm:$0xff] %v5197_v53  ;;  %v1133_v5 = vsel %vm88_vm1, %v6866_v13, %v6865_v40  ;;  %v6868_v60 = vld [vmem:[#allocation59_spill] sm:$0xff]  ;;  %v6869_v27 = vld [vmem:[#allocation62_spill] sm:$0xff]  ;;  %v6872_v45 = vld [vmem:[#allocation45_spill] sm:$0xff] }
 0x31c   :  { %6864 = vst [vmem:[#allocation49_spill] sm:$0xff] %v5215_v20  ;;  %2211 = vrot.lane.b32.xlu0 %v4181_v54, %s3760_s10  ;;  %v5219_v17 = vpop.permute.xlu1 %1289  ;;  %v1134_v54 = vsel %vm88_vm1, %v6865_v40, %v6867_v52  ;;  %v1355_v25 = vsel %vm137_vm3, %v6869_v27, %v6868_v60  ;;  %v5249_v42 = vsel %vm238_vm4, %v6872_v45, %v6871_v33  ;;  %v6874_v40 = vld [vmem:[#allocation64_spill] sm:$0xff]  ;;  %v6877_v53 = vld [vmem:[#allocation86_spill] sm:$0xff] }
 0x31d   :  { %v5238_v19 = vpop.permute.xlu0 %1569  ;;  %6873 = vst [vmem:[#allocation42_spill] sm:$0xff] %v5249_v42  ;;  %v1356_v43 = vsel %vm137_vm3, %v6868_v60, %v6874_v40  ;;  %v1186_v32 = vsel %vm88_vm1, %v6877_v53, %v6876_v47  ;;  %v5277_v33 = vmul.f32 %v4954_v36, %v1355_v25  ;;  %v6879_v42 = vld [vmem:[#allocation73_spill] sm:$0xff] }
 0x31e   :  { %6870 = vst [vmem:[#allocation43_spill] sm:$0xff] %v5238_v19  ;;  %2213 = vrot.lane.b32.xlu1 %v4213_v61, %s3760_s10  ;;  %v6875_v19 = vld [vmem:[#allocation76_spill] sm:$0xff]  ;;  %v5274_v61 = vmul.f32 %v4947_v49, %v1134_v54  ;;  %v924_v54 = vsel %vm40_vm0, %v4890_v39, %v4896_v55  ;;  %v5300_v29 = vmul.f32 %v5013_v26, %v1186_v32 }
 0x31f   :  { %v1185_v31 = vsel %vm88_vm1, %v6875_v19, %v6866_v13  ;;  %v5271_v13 = vmul.f32 %v4944_v57, %v1133_v5  ;;  %v1135_v60 = vsel %vm88_vm1, %v6867_v52, %v6875_v19  ;;  %v923_v19 = vsel %vm40_vm0, %v4888_v48, %v4890_v39 }
 0x320   :  { %2215 = vrot.lane.b32.xlu0 %v4215_v62, %s3760_s10  ;;  %v5264_v45 = vpop.permute.xlu1 %1511  ;;  %v925_v62 = vsel %vm40_vm0, %v4896_v55, %v5110_v18  ;;  %v5289_v5 = vmul.f32 %v5013_v26, %v1185_v31  ;;  %v1137_v55 = vsel %vm88_vm1, %v4677_v41, %v6879_v42  ;;  %v1017_v20 = vmul.f32 %v4431_v2, %v924_v54 }
 0x321   :  { %6878 = vst [vmem:[#allocation50_spill] sm:$0xff] %v5264_v45  ;;  %v5283_v45 = vmul.f32 %v4957_v51, %v1356_v43  ;;  %v824_v25 = vpop.permute.xlu0 %823  ;;  %v1138_v43 = vsel %vm88_vm1, %v6879_v42, %v6877_v53 }
 0x322   :  { %2217 = vrot.lane.b32.xlu1 %v4221_v63, %s3760_s10  ;;  %v928_v52 = vsel %vm40_vm0, %v4936_v50, %v824_v25  ;;  %v968_v31 = vsel %vm40_vm0, %v824_v25, %v4922_v16  ;;  %v1018_v63 = vmul.f32 %v4402_v6, %v925_v62  ;;  %v967_v25 = vsel %vm40_vm0, %v5110_v18, %v4888_v48 }
 0x323   :  { %v1022_v53 = vmul.f32 %v4402_v6, %v928_v52  ;;  %v1019_v62 = vmul.f32 %v4447_v59, %v968_v31  ;;  %v1224_v48 = vmul.f32 %v5016_v8, %v1135_v60  ;;  %v1228_v18 = vmul.f32 %v5016_v8, %v1138_v43  ;;  %v6880_v31 = vld [vmem:[#allocation80_spill] sm:$0xff] }
 0x324   :  { %2219 = vrot.lane.b32.xlu0 %v4240_v7, %s3760_s10  ;;  %v902_v32 = vpop.permute.xlu1 %901  ;;  %v5348_v60 = vsel %vm137_vm3, %v6880_v31, %v6869_v27  ;;  %v6884_v27 = vld [vmem:[#allocation89_spill] sm:$0xff] }
 0x325   :  { %v926_v42 = vsel %vm40_vm0, %v4922_v16, %v902_v32  ;;  %v927_v39 = vsel %vm40_vm0, %v902_v32, %v4936_v50  ;;  %v5327_v7 = vpop.permute.xlu0 %1069  ;;  %v3598_v54 = vpack.c.bf16 %v1022_v53, %v1018_v63  ;;  %v1136_v50 = vsel %vm88_vm1, %v6876_v47, %v4677_v41 }
 0x326   :  { %v1020_v6 = vmul.f32 %v4423_v1, %v926_v42  ;;  %v1021_v52 = vmul.f32 %v4431_v2, %v927_v39  ;;  %2221 = vrot.lane.b32.xlu1 %v4247_v0, %s3760_s10  ;;  %v1016_v16 = vmul.f32 %v4423_v1, %v923_v19  ;;  %v5340_v2 = vsel %vm137_vm3, %v6874_v40, %v6880_v31  ;;  %v6885_v39 = vld [vmem:[#allocation77_spill] sm:$0xff]  ;;  %v6891_v31 = vld [vmem:[#allocation99_spill] sm:$0xff] }
 0x327   :  { %v1015_v32 = vmul.f32 %v4447_v59, %v967_v25  ;;  %3599 = vmatprep.subr.bf16.mxu1 %v3598_v54  ;;  %v3464_v1 = vpack.c.bf16 %v5300_v29, %v5289_v5  ;;  %v1227_v41 = vmul.f32 %v4947_v49, %v1137_v55  ;;  %v1226_v40 = vmul.f32 %v4944_v57, %v1136_v50  ;;  %v6881_v59 = vld [vmem:[#allocation122_spill] sm:$0xff]  ;;  %v6883_v25 = vld [vmem:[#allocation21_spill] sm:$0xff]  ;;  %v6886_v5 = vld [vmem:[#allocation124_spill] sm:$0xff] }
 0x328   :  { %v3600_v42 = vpack.c.bf16 %v1021_v52, %v1017_v20  ;;  %2223 = vrot.lane.b32.xlu0 %v4332_v58, %s3760_s10  ;;  %v1124_v63 = vpop.permute.xlu1 %1123  ;;  %v3454_v47 = vpack.c.bf16 %v1020_v6, %v1016_v16  ;;  %v6882_v20 = vld [vmem:[#allocation112_spill] sm:$0xff]  ;;  %v5364_v29 = vsel %vm137_vm3, %v6885_v39, %v6884_v27  ;;  %v6887_v55 = vld [vmem:[#allocation110_spill] sm:$0xff]  ;;  %v6888_v52 = vpack.c.bf16 %v5144_v21, %v5097_v37  ;;  %v6890_v50 = vld [vmem:[#allocation97_spill] sm:$0xff] }
 0x329   :  { %v1144_v43 = vsel %vm88_vm1, %v6882_v20, %v6881_v59  ;;  %v3456_v19 = vpack.c.bf16 %v1019_v62, %v1015_v32  ;;  %v5357_v53 = vpop.permute.xlu0 %1291  ;;  %v1142_v6 = vsel %vm88_vm1, %v6887_v55, %v6886_v5  ;;  %v3606_v62 = vpack.c.bf16 %v1228_v18, %v1224_v48  ;;  %v6889_v54 = vld [vmem:[#allocation96_spill] sm:$0xff]  ;;  %v6894_v37 = vld [vmem:[#allocation74_spill] sm:$0xff] }
 0x32a   :  { %2225 = vrot.lane.b32.xlu1 %v6883_v25, %s3760_s10  ;;  %3601 = vmatpush1.bf16.msra.mxu1 %v3600_v42  ;;  %v1139_v16 = vsel %vm88_vm1, %v6890_v50, %v6889_v54  ;;  %v1140_v32 = vsel %vm88_vm1, %v6889_v54, %v6891_v31  ;;  %v6892_v42 = vld [vmem:[#allocation114_spill] sm:$0xff]  ;;  %v1408_v21 = vsel %vm137_vm3, %v6884_v27, %v6894_v37 }
 0x32b   :  { %3455 = vmatprep.subr.bf16.mxu0 %v3454_v47  ;;  %3603 = vmatprep.subr.bf16.mxu1 %v6888_v52  ;;  %v1141_v0 = vsel %vm88_vm1, %v6891_v31, %v6892_v42  ;;  %v6893_v25 = vld [vmem:[#allocation26_spill] sm:$0xff]  ;;  %v3608_v48 = vpack.c.bf16 %v1227_v41, %v5274_v61  ;;  %v1236_v18 = vmul.f32 %v5016_v8, %v1144_v43  ;;  %v6897_v61 = vld [vmem:[#allocation36_spill] sm:$0xff] }
 0x32c   :  { %2227 = vrot.lane.b32.xlu0 %v6893_v25, %s3760_s10  ;;  %3457 = vmatpush1.bf16.msra.mxu0 %v3456_v19  ;;  %v5383_v47 = vpop.permute.xlu1 %1345  ;;  %v1143_v52 = vsel %vm88_vm1, %v6886_v5, %v6882_v20  ;;  %v6895_v54 = vpack.c.bf16 %v5156_v34, %v5067_v15  ;;  %v1234_v19 = vmul.f32 %v4944_v57, %v1142_v6  ;;  %v6896_v31 = vld [vmem:[#allocation146_spill] sm:$0xff] }
 0x32d   :  { %v1150_v58 = vsel %vm88_vm1, %v6896_v31, %v5327_v7  ;;  %v5400_v25 = vpop.permute.xlu0 %1513  ;;  %v6898_v41 = vpack.c.bf16 %v5159_v46, %v5070_v12  ;;  %v3462_v20 = vpack.c.bf16 %v1226_v40, %v5271_v13  ;;  %v1230_v15 = vmul.f32 %v4944_v57, %v1139_v16  ;;  %v6899_v6 = vld [vmem:[#allocation34_spill] sm:$0xff]  ;;  %v6901_v46 = vld [vmem:[#allocation139_spill] sm:$0xff] }
 0x32e   :  { %3459 = vmatprep.subr.bf16.mxu0 %v6895_v54  ;;  %2229 = vrot.lane.b32.xlu1 %v6897_v61, %s3760_s10  ;;  %v1231_v34 = vmul.f32 %v4947_v49, %v1140_v32  ;;  %v1232_v43 = vmul.f32 %v5016_v8, %v1141_v0  ;;  %v1188_v27 = vsel %vm88_vm1, %v6881_v59, %v6887_v55  ;;  %v6900_v54 = vld [vmem:[#allocation133_spill] sm:$0xff]  ;;  %v6902_v40 = vld [vmem:[#allocation38_spill] sm:$0xff]  ;;  %v6905_v61 = vld [vmem:[#allocation131_spill] sm:$0xff] }
 0x32f   :  { %3605 = vmatpush1.bf16.msra.mxu1 %v6898_v41  ;;  %v1235_v5 = vmul.f32 %v4947_v49, %v1143_v52  ;;  %v1147_v12 = vsel %vm88_vm1, %v6900_v54, %v6899_v6  ;;  %v1148_v13 = vsel %vm88_vm1, %v6901_v46, %v1124_v63  ;;  %v6903_v0 = vpack.c.bf16 %v5141_v4, %v5094_v24  ;;  %v6904_v41 = vld [vmem:[#allocation130_spill] sm:$0xff] }
 0x330   :  { %3607 = vmatprep.subr.bf16.mxu1 %v3606_v62  ;;  %2231 = vrot.lane.b32.xlu0 %v6902_v40, %s3760_s10  ;;  %v5425_v16 = vpop.permute.xlu1 %1567  ;;  %v1187_v59 = vsel %vm88_vm1, %v6892_v42, %v6890_v50  ;;  %v1244_v55 = vmul.f32 %v5016_v8, %v1150_v58  ;;  %v1149_v62 = vsel %vm88_vm1, %v1124_v63, %v6896_v31 }
 0x331   :  { %3461 = vmatpush1.bf16.msra.mxu0 %v6903_v0  ;;  %v3610_v32 = vpack.c.bf16 %v1236_v18, %v1232_v43  ;;  %v1233_v52 = vmul.f32 %v5013_v26, %v1188_v27  ;;  %v1145_v24 = vsel %vm88_vm1, %v6905_v61, %v6904_v41  ;;  %v5437_v4 = vpop.permute.xlu0 %1803  ;;  %v6906_v0 = vld [vmem:[#allocation40_spill] sm:$0xff]  ;;  %v3466_v50 = vpack.c.bf16 %v1234_v19, %v1230_v15 }
 0x332   :  { %3463 = vmatprep.subr.bf16.mxu0 %v3462_v20  ;;  %2233 = vrot.lane.b32.xlu1 %v6906_v0, %s3760_s10  ;;  %v1146_v58 = vsel %vm88_vm1, %v6904_v41, %v6900_v54  ;;  %v1240_v63 = vmul.f32 %v5016_v8, %v1147_v12  ;;  %v1190_v42 = vsel %vm88_vm1, %v5327_v7, %v6901_v46  ;;  %v6908_v8 = vld [vmem:[#allocation91_spill] sm:$0xff] }
 0x333   :  { %3609 = vmatpush1.bf16.msra.mxu1 %v3608_v48  ;;  %v1242_v18 = vmul.f32 %v4944_v57, %v1148_v13  ;;  %v1229_v31 = vmul.f32 %v5013_v26, %v1187_v59  ;;  %v3612_v20 = vpack.c.bf16 %v1235_v5, %v1231_v34  ;;  %v1243_v43 = vmul.f32 %v4947_v49, %v1149_v62  ;;  %v6907_v48 = vld [vmem:[#allocation48_spill] sm:$0xff]  ;;  %v6910_v46 = vld [vmem:[#allocation51_spill] sm:$0xff] }
 0x334   :  { %3611 = vmatprep.subr.bf16.mxu1 %v3610_v32  ;;  %2235 = vrot.lane.b32.xlu0 %v6907_v48, %s3760_s10  ;;  %v5453_v19 = vpop.permute.xlu1 %1805  ;;  %v1359_v15 = vsel %vm137_vm3, %v6908_v8, %v6885_v39  ;;  %v1238_v7 = vmul.f32 %v4944_v57, %v1145_v24  ;;  %v1189_v27 = vsel %vm88_vm1, %v6899_v6, %v6905_v61  ;;  %v6911_v6 = vld [vmem:[#allocation61_spill] sm:$0xff]  ;;  %v6912_v13 = vld [vmem:[#allocation67_spill] sm:$0xff] }
 0x335   :  { %3465 = vmatpush1.bf16.msra.mxu0 %v3464_v1  ;;  %v3614_v34 = vpack.c.bf16 %v1244_v55, %v1240_v63  ;;  %v3468_v5 = vpack.c.bf16 %v1233_v52, %v1229_v31  ;;  %v1239_v54 = vmul.f32 %v4947_v49, %v1146_v58  ;;  %v1241_v12 = vmul.f32 %v5013_v26, %v1190_v42  ;;  %v5464_v1 = vpop.permute.xlu0 %1807  ;;  %v6914_v52 = vld [vmem:[#allocation82_spill] sm:$0xff]  ;;  %v6916_v58 = vld [vmem:[#allocation115_spill] sm:$0xff] }
 0x336   :  { %3467 = vmatprep.subr.bf16.mxu0 %v3466_v50  ;;  %6909 = vst [vmem:[#allocation44_spill] sm:$0xff] %v5464_v1  ;;  %2237 = vrot.lane.b32.xlu1 %v6910_v46, %s3760_s10  ;;  %v5469_v39 = vmul.f32 %v5048_v44, %v1408_v21  ;;  %v1450_v57 = vmul.f32 %v5058_v14, %v5364_v29  ;;  %v6913_v21 = vld [vmem:[#allocation68_spill] sm:$0xff]  ;;  %v6915_v50 = vld [vmem:[#allocation123_spill] sm:$0xff]  ;;  %v6918_v31 = vld [vmem:[#allocation90_spill] sm:$0xff] }
 0x337   :  { %3613 = vmatpush1.bf16.msra.mxu1 %v3612_v20  ;;  %v1358_v61 = vsel %vm137_vm3, %v6894_v37, %v6908_v8  ;;  %v3470_v49 = vpack.c.bf16 %v1242_v18, %v1238_v7  ;;  %v5479_v59 = vsel %vm186_vm2, %v6912_v13, %v6911_v6  ;;  %v1237_v55 = vmul.f32 %v5013_v26, %v1189_v27  ;;  %v6917_v18 = vld [vmem:[#allocation54_spill] sm:$0xff]  ;;  %v6919_v20 = vld [vmem:[#allocation83_spill] sm:$0xff] }
 0x338   :  { %3615 = vmatprep.subr.bf16.mxu1 %v3614_v34  ;;  %v3616_v62 = vpack.c.bf16 %v1243_v43, %v1239_v54  ;;  %2239 = vrot.lane.b32.xlu0 %v6913_v21, %s3760_s10  ;;  %v5484_v32 = vpop.permute.xlu1 %1809  ;;  %v5488_v29 = vmul.f32 %v5048_v44, %v5348_v60  ;;  %v1446_v37 = vmul.f32 %v5058_v14, %v5340_v2  ;;  %v6920_v8 = vld [vmem:[#allocation126_spill] sm:$0xff]  ;;  %v6924_v54 = vld [vmem:[#allocation103_spill] sm:$0xff] }
 0x339   :  { %3469 = vmatpush1.bf16.msra.mxu0 %v3468_v5  ;;  %v5495_v41 = vsel %vm186_vm2, %v6914_v52, %v6912_v13  ;;  %v1449_v26 = vmul.f32 %v4957_v51, %v1359_v15  ;;  %v1448_v24 = vmul.f32 %v4954_v36, %v1358_v61  ;;  %v1366_v63 = vsel %vm137_vm3, %v6916_v58, %v6915_v50  ;;  %v5502_v60 = vpop.permute.xlu0 %1811  ;;  %v6921_v15 = vld [vmem:[#allocation113_spill] sm:$0xff]  ;;  %v6923_v5 = vld [vmem:[#allocation98_spill] sm:$0xff] }
 0x33a   :  { %3471 = vmatprep.subr.bf16.mxu0 %v3470_v49  ;;  %v3472_v42 = vpack.c.bf16 %v1241_v12, %v1237_v55  ;;  %2241 = vrot.lane.b32.xlu1 %v6917_v18, %s3760_s10  ;;  %v3480_v2 = vpack.c.bf16 %v5469_v39, %v5488_v29  ;;  %v5511_v43 = vsel %vm186_vm2, %v6919_v20, %v6918_v31  ;;  %v6925_v61 = vld [vmem:[#allocation105_spill] sm:$0xff]  ;;  %v6926_v49 = vld [vmem:[#allocation116_spill] sm:$0xff]  ;;  %v6927_v55 = vld [vmem:[#allocation66_spill] sm:$0xff] }
 0x33b   :  { %3617 = vmatpush1.bf16.msra.mxu1 %v3616_v62  ;;  %v1364_v7 = vsel %vm137_vm3, %v6921_v15, %v6920_v8  ;;  %v6922_v27 = vpack.c.bf16 %v5153_v11, %v5184_v56  ;;  %v3622_v34 = vpack.c.bf16 %v1450_v57, %v1446_v37  ;;  %v1361_v12 = vsel %vm137_vm3, %v6924_v54, %v6923_v5  ;;  %v6928_v56 = vld [vmem:[#allocation81_spill] sm:$0xff] }
 0x33c   :  { %v1362_v39 = vsel %vm137_vm3, %v6923_v5, %v6925_v61  ;;  %v1363_v13 = vsel %vm137_vm3, %v6925_v61, %v6926_v49  ;;  %2243 = vrot.lane.b32.xlu0 %v6927_v55, %s3760_s10  ;;  %v5530_v62 = vpop.permute.xlu1 %1813  ;;  %v1630_v11 = vsel %vm186_vm2, %v6918_v31, %v6928_v56  ;;  %v3624_v57 = vpack.c.bf16 %v1449_v26, %v5283_v45  ;;  %v6930_v5 = vld [vmem:[#allocation47_spill] sm:$0xff] }
 0x33d   :  { %3619 = vmatprep.subr.bf16.mxu1 %v6922_v27  ;;  %3473 = vmatpush1.bf16.msra.mxu0 %v3472_v42  ;;  %v1458_v29 = vmul.f32 %v5058_v14, %v1366_v63  ;;  %v1365_v37 = vsel %vm137_vm3, %v6920_v8, %v6916_v58  ;;  %v6929_v27 = vpack.c.bf16 %v5209_v30, %v5073_v35  ;;  %v5547_v1 = vpop.permute.xlu0 %1815  ;;  %v6931_v45 = vld [vmem:[#allocation75_spill] sm:$0xff] }
 0x33e   :  { %v1456_v42 = vmul.f32 %v4954_v36, %v1364_v7  ;;  %v1372_v61 = vsel %vm137_vm3, %v6930_v5, %v5357_v53  ;;  %2245 = vrot.lane.b32.xlu1 %v6931_v45, %s3760_s10  ;;  %v6932_v26 = vpack.c.bf16 %v5202_v22, %v5076_v23  ;;  %v3478_v58 = vpack.c.bf16 %v1448_v24, %v5277_v33  ;;  %v6933_v7 = vld [vmem:[#allocation136_spill] sm:$0xff]  ;;  %v6935_v24 = vld [vmem:[#allocation78_spill] sm:$0xff] }
 0x33f   :  { %3475 = vmatprep.subr.bf16.mxu0 %v6929_v27  ;;  %v1452_v35 = vmul.f32 %v4954_v36, %v1361_v12  ;;  %v1453_v30 = vmul.f32 %v4957_v51, %v1362_v39  ;;  %v1454_v63 = vmul.f32 %v5058_v14, %v1363_v13  ;;  %v1410_v31 = vsel %vm137_vm3, %v6915_v50, %v6921_v15  ;;  %v6934_v22 = vld [vmem:[#allocation28_spill] sm:$0xff] }
 0x340   :  { %3621 = vmatpush1.bf16.msra.mxu1 %v6932_v26  ;;  %v1457_v8 = vmul.f32 %v4957_v51, %v1365_v37  ;;  %v1369_v23 = vsel %vm137_vm3, %v6933_v7, %v5219_v17  ;;  %v1370_v33 = vsel %vm137_vm3, %v6934_v22, %v5383_v47  ;;  %2247 = vrot.lane.b32.xlu0 %v6935_v24, %s3760_s10  ;;  %v5573_v39 = vpop.permute.xlu1 %1975  ;;  %v6937_v27 = vld [vmem:[#allocation132_spill] sm:$0xff]  ;;  %v6938_v26 = vld [vmem:[#allocation135_spill] sm:$0xff] }
 0x341   :  { %3623 = vmatprep.subr.bf16.mxu1 %v3622_v34  ;;  %v6936_v12 = vpack.c.bf16 %v5147_v10, %v5181_v9  ;;  %v1409_v50 = vsel %vm137_vm3, %v6926_v49, %v6924_v54  ;;  %v1466_v15 = vmul.f32 %v5058_v14, %v1372_v61  ;;  %v1371_v34 = vsel %vm137_vm3, %v5383_v47, %v6930_v5  ;;  %v5586_v10 = vpop.permute.xlu0 %1977 }
 0x342   :  { %v3626_v13 = vpack.c.bf16 %v1458_v29, %v1454_v63  ;;  %v1455_v37 = vmul.f32 %v5048_v44, %v1410_v31  ;;  %v1367_v9 = vsel %vm137_vm3, %v6938_v26, %v6937_v27  ;;  %v3482_v54 = vpack.c.bf16 %v1456_v42, %v1452_v35 }
 0x343   :  { %3477 = vmatpush1.bf16.msra.mxu0 %v6936_v12  ;;  %v6939_v12 = vld [vmem:[#allocation79_spill] sm:$0xff]  ;;  %v1368_v49 = vsel %vm137_vm3, %v6937_v27, %v6933_v7  ;;  %v1462_v47 = vmul.f32 %v5058_v14, %v1369_v23  ;;  %v1412_v29 = vsel %vm137_vm3, %v5357_v53, %v6934_v22  ;;  %v1464_v5 = vmul.f32 %v4954_v36, %v1370_v33  ;;  %v6942_v14 = vld [vmem:[#allocation93_spill] sm:$0xff] }
 0x344   :  { %3479 = vmatprep.subr.bf16.mxu0 %v3478_v58  ;;  %2249 = vrot.lane.b32.xlu1 %v6939_v12, %s3760_s10  ;;  %v1451_v61 = vmul.f32 %v5048_v44, %v1409_v50  ;;  %v3628_v58 = vpack.c.bf16 %v1457_v8, %v1453_v30  ;;  %v1465_v63 = vmul.f32 %v4957_v51, %v1371_v34  ;;  %v5602_v42 = vpop.permute.xlu1 %1979  ;;  %v6944_v22 = vld [vmem:[#allocation87_spill] sm:$0xff]  ;;  %v6946_v33 = vld [vmem:[#allocation25_spill] sm:$0xff] }
 0x345   :  { %3625 = vmatpush1.bf16.msra.mxu1 %v3624_v57  ;;  %v6940_v57 = vld [vmem:[#allocation95_spill] sm:$0xff]  ;;  %6941 = vst [vmem:[#allocation52_spill] sm:$0xff] %v5602_v42  ;;  %v1581_v35 = vsel %vm186_vm2, %v6942_v14, %v6919_v20  ;;  %v1460_v53 = vmul.f32 %v4954_v36, %v1367_v9  ;;  %v1411_v31 = vsel %vm137_vm3, %v5219_v17, %v6938_v26  ;;  %v6945_v20 = vld [vmem:[#allocation69_spill] sm:$0xff]  ;;  %v6949_v26 = vld [vmem:[#allocation22_spill] sm:$0xff] }
 0x346   :  { %3627 = vmatprep.subr.bf16.mxu1 %v3626_v13  ;;  %2251 = vrot.lane.b32.xlu0 %v6940_v57, %s3760_s10  ;;  %v3630_v30 = vpack.c.bf16 %v1466_v15, %v1462_v47  ;;  %v3484_v8 = vpack.c.bf16 %v1455_v37, %v1451_v61  ;;  %v1461_v7 = vmul.f32 %v4957_v51, %v1368_v49  ;;  %v6947_v37 = vld [vmem:[#allocation102_spill] sm:$0xff]  ;;  %v6951_v49 = vld [vmem:[#allocation125_spill] sm:$0xff]  ;;  %v6952_v47 = vld [vmem:[#allocation119_spill] sm:$0xff] }
 0x347   :  { %3481 = vmatpush1.bf16.msra.mxu0 %v3480_v2  ;;  %v1463_v23 = vmul.f32 %v5048_v44, %v1412_v29  ;;  %v5613_v2 = vpop.permute.xlu0 %1981  ;;  %v1578_v36 = vsel %vm186_vm2, %v6911_v6, %v6945_v20  ;;  %v5621_v50 = vmul.f32 %v6946_v33, %v1630_v11  ;;  %v1580_v17 = vsel %vm186_vm2, %v6928_v56, %v6942_v14  ;;  %v6948_v11 = vld [vmem:[#allocation138_spill] sm:$0xff]  ;;  %v6955_v14 = vld [vmem:[#allocation117_spill] sm:$0xff] }
 0x348   :  { %3483 = vmatprep.subr.bf16.mxu0 %v3482_v54  ;;  %6943 = vst [vmem:[#allocation55_spill] sm:$0xff] %v5613_v2  ;;  %2253 = vrot.lane.b32.xlu1 %v6944_v22, %s3760_s10  ;;  %v3486_v51 = vpack.c.bf16 %v1464_v5, %v1460_v53  ;;  %v1579_v15 = vsel %vm186_vm2, %v6945_v20, %v6914_v52  ;;  %v5632_v6 = vpop.permute.xlu1 %1983  ;;  %v6950_v52 = vld [vmem:[#allocation140_spill] sm:$0xff]  ;;  %v6956_v53 = vld [vmem:[#allocation39_spill] sm:$0xff]  ;;  %v6978_v2 = vld [vmem:[#allocation134_spill] sm:$0xff] }
 0x349   :  { %3629 = vmatpush1.bf16.msra.mxu1 %v3628_v58  ;;  %v1459_v34 = vmul.f32 %v5048_v44, %v1411_v31  ;;  %v3632_v13 = vpack.c.bf16 %v1465_v63, %v1461_v7  ;;  %v1666_v27 = vmul.f32 %v6948_v11, %v5479_v59  ;;  %v5638_v56 = vmul.f32 %v6946_v33, %v5495_v41  ;;  %v6953_v59 = vld [vmem:[#allocation88_spill] sm:$0xff]  ;;  %v6979_v42 = vld [vmem:[#allocation137_spill] sm:$0xff] }
 0x34a   :  { %3631 = vmatprep.subr.bf16.mxu1 %v3630_v30  ;;  %2255 = vrot.lane.b32.xlu0 %v6947_v37, %s3760_s10  ;;  %v1672_v9 = vmul.f32 %v6949_v26, %v5511_v43  ;;  %v1671_v54 = vmul.f32 %v6950_v52, %v1581_v35  ;;  %v1670_v44 = vmul.f32 %v6948_v11, %v1580_v17  ;;  %v6954_v63 = vld [vmem:[#allocation128_spill] sm:$0xff]  ;;  %v6962_v17 = vld [vmem:[#allocation101_spill] sm:$0xff] }
 0x34b   :  { %3485 = vmatpush1.bf16.msra.mxu0 %v3484_v8  ;;  %v1588_v29 = vsel %vm186_vm2, %v6952_v47, %v6951_v49  ;;  %v3488_v5 = vpack.c.bf16 %v1463_v23, %v1459_v34  ;;  %v5647_v61 = vpop.permute.xlu0 %1985  ;;  %v1667_v41 = vmul.f32 %v6950_v52, %v1578_v36  ;;  %v1668_v43 = vmul.f32 %v6949_v26, %v1579_v15  ;;  %v6958_v30 = vld [vmem:[#allocation100_spill] sm:$0xff]  ;;  %v6959_v8 = vld [vmem:[#allocation107_spill] sm:$0xff]  ;;  %v6961_v36 = vld [vmem:[#allocation118_spill] sm:$0xff] }
 0x34c   :  { %3487 = vmatprep.subr.bf16.mxu0 %v3486_v51  ;;  %2257 = vrot.lane.b32.xlu1 %v6953_v59, %s3760_s10  ;;  %v3496_v58 = vpack.c.bf16 %v5621_v50, %v5638_v56  ;;  %v1586_v35 = vsel %vm186_vm2, %v6955_v14, %v6954_v63  ;;  %v6957_v31 = vpack.c.bf16 %v5190_v28, %v6956_v53  ;;  %v6960_v23 = vld [vmem:[#allocation108_spill] sm:$0xff]  ;;  %v5672_v51 = vpop.permute.xlu1 %1987 }
 0x34d   :  { %3633 = vmatpush1.bf16.msra.mxu1 %v3632_v13  ;;  %v1583_v7 = vsel %vm186_vm2, %v6959_v8, %v6958_v30  ;;  %v1584_v20 = vsel %vm186_vm2, %v6958_v30, %v6960_v23  ;;  %v1585_v50 = vsel %vm186_vm2, %v6960_v23, %v6961_v36  ;;  %v3640_v28 = vpack.c.bf16 %v1671_v54, %v1667_v41  ;;  %v6966_v54 = vld [vmem:[#allocation8_spill] sm:$0xff]  ;;  %v6968_v41 = vld [vmem:[#allocation30_spill] sm:$0xff] }
 0x34e   :  { %3635 = vmatprep.subr.bf16.mxu1 %v6957_v31  ;;  %2259 = vrot.lane.b32.xlu0 %v6962_v17, %s3760_s10  ;;  %v1680_v15 = vmul.f32 %v6949_v26, %v1588_v29  ;;  %v1587_v34 = vsel %vm186_vm2, %v6954_v63, %v6952_v47  ;;  %v6963_v13 = vpack.c.bf16 %v5212_v3, %v5083_v38  ;;  %v6964_v31 = vld [vmem:[#allocation43_spill] sm:$0xff]  ;;  %v6967_v29 = vld [vmem:[#allocation49_spill] sm:$0xff] }
 0x34f   :  { %3489 = vmatpush1.bf16.msra.mxu0 %v3488_v5  ;;  %v3638_v56 = vpack.c.bf16 %v1672_v9, %v1668_v43  ;;  %v1678_v53 = vmul.f32 %v6948_v11, %v1586_v35  ;;  %v1594_v5 = vsel %vm186_vm2, %v6964_v31, %v5400_v25  ;;  %v5685_v30 = vpop.permute.xlu0 %1989  ;;  %v6969_v23 = vpack.c.bf16 %v6967_v29, %v6968_v41  ;;  %v6970_v35 = vld [vmem:[#allocation50_spill] sm:$0xff]  ;;  %v6972_v29 = vld [vmem:[#allocation41_spill] sm:$0xff] }
 0x350   :  { %3491 = vmatprep.subr.bf16.mxu0 %v6963_v13  ;;  %6965 = vst [vmem:[#allocation57_spill] sm:$0xff] %v5685_v30  ;;  %2419 = vrot.lane.b32.xlu1 %v6966_v54, %s3762_s11  ;;  %v3494_v47 = vpack.c.bf16 %v1670_v44, %v1666_v27  ;;  %v1674_v38 = vmul.f32 %v6948_v11, %v1583_v7  ;;  %v6971_v13 = vld [vmem:[#allocation143_spill] sm:$0xff]  ;;  %v6973_v44 = vld [vmem:[#allocation9_spill] sm:$0xff]  ;;  %v6974_v7 = vld [vmem:[#allocation32_spill] sm:$0xff]  ;;  %v5710_v41 = vpop.permute.xlu1 %1991 }
 0x351   :  { %3637 = vmatpush1.bf16.msra.mxu1 %v6969_v23  ;;  %v1675_v3 = vmul.f32 %v6950_v52, %v1584_v20  ;;  %v1676_v9 = vmul.f32 %v6949_v26, %v1585_v50  ;;  %v1632_v43 = vsel %vm186_vm2, %v6951_v49, %v6955_v14  ;;  %v1679_v63 = vmul.f32 %v6950_v52, %v1587_v34  ;;  %v6975_v20 = vld [vmem:[#allocation35_spill] sm:$0xff] }
 0x352   :  { %3639 = vmatprep.subr.bf16.mxu1 %v3638_v56  ;;  %v1591_v30 = vsel %vm186_vm2, %v6971_v13, %v6970_v35  ;;  %v1592_v27 = vsel %vm186_vm2, %v6972_v29, %v5425_v16  ;;  %2421 = vrot.lane.b32.xlu0 %v6973_v44, %s3762_s11  ;;  %v6976_v50 = vpack.c.bf16 %v6974_v7, %v6975_v20 }
 0x353   :  { %6977 = vst [vmem:[#allocation58_spill] sm:$0xff] %v5710_v41  ;;  %v1631_v49 = vsel %vm186_vm2, %v6961_v36, %v6959_v8  ;;  %v1688_v14 = vmul.f32 %v6949_v26, %v1594_v5  ;;  %v1593_v34 = vsel %vm186_vm2, %v5425_v16, %v6964_v31  ;;  %v3642_v56 = vpack.c.bf16 %v1680_v15, %v1676_v9  ;;  %v5723_v20 = vpop.permute.xlu0 %1993 }
 0x354   :  { %3493 = vmatpush1.bf16.msra.mxu0 %v6976_v50  ;;  %v1677_v23 = vmul.f32 %v6946_v33, %v1632_v43  ;;  %v1589_v7 = vsel %vm186_vm2, %v6979_v42, %v6978_v2  ;;  %6980 = vst [vmem:[#allocation60_spill] sm:$0xff] %v5723_v20  ;;  %v6981_v50 = vld [vmem:[#allocation10_spill] sm:$0xff]  ;;  %v3498_v8 = vpack.c.bf16 %v1678_v53, %v1674_v38  ;;  %v5739_v53 = vpop.permute.xlu1 %1995 }
 0x355   :  { %3495 = vmatprep.subr.bf16.mxu0 %v3494_v47  ;;  %2423 = vrot.lane.b32.xlu1 %v6981_v50, %s3762_s11  ;;  %v1590_v36 = vsel %vm186_vm2, %v6978_v2, %v6971_v13  ;;  %v1684_v16 = vmul.f32 %v6949_v26, %v1591_v30  ;;  %v1634_v15 = vsel %vm186_vm2, %v5400_v25, %v6972_v29  ;;  %v6984_v2 = vld [vmem:[#allocation46_spill] sm:$0xff]  ;;  %v6985_v26 = vld [vmem:[#allocation53_spill] sm:$0xff]  ;;  %v6987_v29 = vld [vmem:[#allocation12_spill] sm:$0xff] }
 0x356   :  { %3641 = vmatpush1.bf16.msra.mxu1 %v3640_v28  ;;  %v1686_v31 = vmul.f32 %v6948_v11, %v1592_v27  ;;  %v1673_v5 = vmul.f32 %v6946_v33, %v1631_v49  ;;  %v3644_v47 = vpack.c.bf16 %v1679_v63, %v1675_v3  ;;  %v1687_v9 = vmul.f32 %v6950_v52, %v1593_v34  ;;  %v6982_v28 = vld [vmem:[#allocation11_spill] sm:$0xff]  ;;  %v6990_v34 = vld [vmem:[#allocation33_spill] sm:$0xff] }
 0x357   :  { %3643 = vmatprep.subr.bf16.mxu1 %v3642_v56  ;;  %2425 = vrot.lane.b32.xlu0 %v6982_v28, %s3762_s11  ;;  %6983 = vst [vmem:[#allocation59_spill] sm:$0xff] %v5739_v53  ;;  %v1821_v30 = vsel %vm238_vm4, %v6985_v26, %v6984_v2  ;;  %v1682_v25 = vmul.f32 %v6948_v11, %v1589_v7  ;;  %v6988_v27 = vld [vmem:[#allocation31_spill] sm:$0xff]  ;;  %v6991_v56 = vld [vmem:[#allocation24_spill] sm:$0xff] }
 0x358   :  { %3497 = vmatpush1.bf16.msra.mxu0 %v3496_v58  ;;  %v1633_v38 = vsel %vm186_vm2, %v6970_v35, %v6979_v42  ;;  %v3646_v3 = vpack.c.bf16 %v1688_v14, %v1684_v16  ;;  %v3500_v43 = vpack.c.bf16 %v1677_v23, %v1673_v5  ;;  %v1683_v63 = vmul.f32 %v6950_v52, %v1590_v36  ;;  %v5750_v58 = vpop.permute.xlu0 %1997  ;;  %v6989_v49 = vld [vmem:[#allocation27_spill] sm:$0xff]  ;;  %v6992_v35 = vld [vmem:[#allocation42_spill] sm:$0xff]  ;;  %v6993_v14 = vld [vmem:[#allocation141_spill] sm:$0xff] }
 0x359   :  { %3499 = vmatprep.subr.bf16.mxu0 %v3498_v8  ;;  %v1685_v13 = vmul.f32 %v6946_v33, %v1634_v15  ;;  %6986 = vst [vmem:[#allocation62_spill] sm:$0xff] %v5750_v58  ;;  %2427 = vrot.lane.b32.xlu1 %v6987_v29, %s3762_s11  ;;  %v1881_v11 = vsel %vm238_vm4, %v6989_v49, %v6988_v27  ;;  %v6994_v16 = vld [vmem:[#allocation15_spill] sm:$0xff]  ;;  %v5770_v15 = vpop.permute.xlu1 %1999  ;;  %v6996_v5 = vld [vmem:[#allocation37_spill] sm:$0xff]  ;;  %v6997_v26 = vld [vmem:[#allocation144_spill] sm:$0xff] }
 0x35a   :  { %3645 = vmatpush1.bf16.msra.mxu1 %v3644_v47  ;;  %v1818_v42 = vsel %vm238_vm4, %v6991_v56, %v6990_v34  ;;  %v5762_v23 = vmul.f32 %v6993_v14, %v6992_v35  ;;  %v3502_v52 = vpack.c.bf16 %v1686_v31, %v1682_v25  ;;  %v1819_v7 = vsel %vm238_vm4, %v6990_v34, %v6989_v49  ;;  %v6998_v31 = vld [vmem:[#allocation56_spill] sm:$0xff]  ;;  %v7000_v27 = vld [vmem:[#allocation13_spill] sm:$0xff]  ;;  %v7001_v49 = vld [vmem:[#allocation142_spill] sm:$0xff] }
 0x35b   :  { %3647 = vmatprep.subr.bf16.mxu1 %v3646_v3  ;;  %v1681_v8 = vmul.f32 %v6946_v33, %v1633_v38  ;;  %v3648_v36 = vpack.c.bf16 %v1687_v9, %v1683_v63  ;;  %2429 = vrot.lane.b32.xlu0 %v6994_v16, %s3762_s11  ;;  %6995 = vst [vmem:[#allocation64_spill] sm:$0xff] %v5770_v15  ;;  %v6999_v9 = vld [vmem:[#allocation45_spill] sm:$0xff]  ;;  %v7011_v33 = vld [vmem:[#allocation63_spill] sm:$0xff]  ;;  %v7013_v58 = vld [vmem:[#allocation72_spill] sm:$0xff] }
 0x35c   :  { %3501 = vmatpush1.bf16.msra.mxu0 %v3500_v43  ;;  %v5774_v47 = vmul.f32 %v6993_v14, %v6996_v5  ;;  %v5777_v3 = vmul.f32 %v6997_v26, %v1821_v30  ;;  %v1822_v25 = vsel %vm238_vm4, %v6984_v2, %v6998_v31  ;;  %v1882_v38 = vsel %vm238_vm4, %v6998_v31, %v6999_v9  ;;  %v5787_v63 = vpop.permute.xlu0 %2001  ;;  %v2641_v30 = vld [vmem:[%s6463_s4] sm:$0xff]  ;;  %v7007_v2 = vld [vmem:[#allocation85_spill] sm:$0xff] }
 0x35d   :  { %3503 = vmatprep.subr.bf16.mxu0 %v3502_v52  ;;  %v3504_v43 = vpack.c.bf16 %v1685_v13, %v1681_v8  ;;  %2431 = vrot.lane.b32.xlu1 %v7000_v27, %s3762_s11  ;;  %v5797_v34 = vmul.f32 %v7001_v49, %v1881_v11  ;;  %v5800_v56 = vmul.f32 %v6997_v26, %v1818_v42  ;;  %v7002_v13 = vld [vmem:[#allocation145_spill] sm:$0xff]  ;;  %v7003_v8 = vld [vmem:[#allocation14_spill] sm:$0xff]  ;;  %v7005_v31 = vld [vmem:[#allocation92_spill] sm:$0xff] }
 0x35e   :  { %3649 = vmatpush1.bf16.msra.mxu1 %v3648_v36  ;;  %v5803_v35 = vmul.f32 %v7002_v13, %v1819_v7  ;;  %v7004_v36 = vpack.c.bf16 %v7003_v8, %v6982_v28  ;;  %v5811_v5 = vmul.f32 %v7002_v13, %v1822_v25  ;;  %v7006_v9 = vld [vmem:[#allocation84_spill] sm:$0xff]  ;;  %v1827_v42 = vsel %vm238_vm4, %v7005_v31, %v7007_v2  ;;  %v5821_v7 = vpop.permute.xlu1 %2003 }
 0x35f   :  { %v1826_v11 = vsel %vm238_vm4, %v7006_v9, %v7005_v31  ;;  %2433 = vrot.lane.b32.xlu0 %v7003_v8, %s3762_s11  ;;  %7008 = vst [vmem:[#allocation76_spill] sm:$0xff] %v5821_v7  ;;  %v5824_v28 = vmul.f32 %v7001_v49, %v1882_v38  ;;  %v7010_v52 = vpack.c.bf16 %v6994_v16, %v6973_v44  ;;  %v7012_v8 = vld [vmem:[#allocation70_spill] sm:$0xff]  ;;  %v7015_v44 = vld [vmem:[#allocation16_spill] sm:$0xff]  ;;  %v7017_v31 = vld [vmem:[#allocation65_spill] sm:$0xff] }
 0x360   :  { %3651 = vmatprep.subr.bf16.mxu1 %v7004_v36  ;;  %3505 = vmatpush1.bf16.msra.mxu0 %v3504_v43  ;;  %v7009_v36 = vld [vmem:[#allocation94_spill] sm:$0xff]  ;;  %v1823_v43 = vsel %vm238_vm4, %v7012_v8, %v7011_v33  ;;  %v1824_v38 = vsel %vm238_vm4, %v7011_v33, %v7013_v58  ;;  %v5843_v53 = vpop.permute.xlu0 %2005  ;;  %v7016_v16 = vpack.c.bf16 %v7000_v27, %v6981_v50 }
 0x361   :  { %v1828_v25 = vsel %vm238_vm4, %v7007_v2, %v7009_v36  ;;  %3507 = vmatprep.subr.bf16.mxu0 %v7010_v52  ;;  %3222 = vmatmul.mubr.f32.vlgmr.msra.gmra.mrb[16].mxu1 %v2641_v30  ;;  %v1884_v2 = vsel %vm238_vm4, %v7009_v36, %v7006_v9  ;;  %7014 = vst [vmem:[#allocation71_spill] sm:$0xff] %v5843_v53  ;;  %v2644_v52 = vld [vmem:[%s6463_s4 + $0x18] sm:$0xff]  ;;  %v7019_v36 = vld [vmem:[#allocation26_spill] sm:$0xff] }
 0x362   :  { %2435 = vrot.lane.b32.xlu1 %v7015_v44, %s3762_s11  ;;  %3653 = vmatpush1.bf16.msra.mxu1 %v7016_v16  ;;  %v1825_v33 = vsel %vm238_vm4, %v7013_v58, %v7017_v31  ;;  %v5857_v41 = vmul.f32 %v6993_v14, %v1826_v11  ;;  %v5860_v9 = vmul.f32 %v6997_v26, %v1827_v42  ;;  %v7020_v53 = vld [vmem:[#allocation19_spill] sm:$0xff]  ;;  %v7022_v11 = vld [vmem:[#allocation17_spill] sm:$0xff]  ;;  %v5878_v42 = vpop.permute.xlu1 %2007 }
 0x363   :  { %3009 = vmatmul.mubr.f32.vlgmr.msra.gmra.mrb[16].mxu0 %v2641_v30  ;;  %v7021_v20 = vpack.c.bf16 %v7019_v36, %v7020_v53  ;;  %v1883_v27 = vsel %vm238_vm4, %v7017_v31, %v7012_v8  ;;  %v5871_v58 = vmul.f32 %v7002_v13, %v1828_v25  ;;  %2437 = vrot.lane.b32.xlu0 %v7022_v11, %s3762_s11  ;;  %v7026_v25 = vld [vmem:[#allocation29_spill] sm:$0xff] }
 0x364   :  { %7018 = vst [vmem:[#allocation86_spill] sm:$0xff] %v5857_v41  ;;  %v7023_v30 = vpack.c.bf16 %v6987_v29, %v6966_v54  ;;  %7024 = vst [vmem:[#allocation73_spill] sm:$0xff] %v5878_v42  ;;  %v5884_v16 = vmul.f32 %v6997_v26, %v1824_v38  ;;  %v5887_v31 = vmul.f32 %v7001_v49, %v1884_v2  ;;  %3079 = vmatprep.mubr.f32.mxu0 %v2644_v52  ;;  %v7028_v54 = vld [vmem:[#allocation104_spill] sm:$0xff]  ;;  %v7029_v29 = vld [vmem:[#allocation109_spill] sm:$0xff] }
 0x365   :  { %3655 = vmatprep.subr.bf16.mxu1 %v7021_v20  ;;  %v5881_v20 = vmul.f32 %v6993_v14, %v1823_v43  ;;  %v7027_v8 = vpack.c.bf16 %v7026_v25, %v7022_v11  ;;  %v5893_v50 = vmul.f32 %v7002_v13, %v1825_v33  ;;  %v5898_v43 = vpop.permute.xlu0 %2009  ;;  %v7031_v38 = vld [vmem:[#allocation18_spill] sm:$0xff]  ;;  %v7032_v42 = vld [vmem:[#allocation21_spill] sm:$0xff]  ;;  %v3666_v11 = vpack.c.bf16 %v5824_v28, %v5797_v34  ;;  %v7036_v28 = vld [vmem:[#allocation127_spill] sm:$0xff] }
 0x366   :  { %3509 = vmatpush1.bf16.msra.mxu0 %v7023_v30  ;;  %v1829_v30 = vsel %vm238_vm4, %v7029_v29, %v7028_v54  ;;  %7030 = vst [vmem:[#allocation122_spill] sm:$0xff] %v5898_v43  ;;  %2439 = vrot.lane.b32.xlu1 %v7031_v38, %s3762_s11  ;;  %v7033_v2 = vpack.c.bf16 %v7032_v42, %v7031_v38  ;;  %v3405_v33 = vld [vmem:[%s6461_s1 + $0x6] ss:$8 sm:$0xf]  ;;  %v5933_v38 = vpop.permute.xlu1 %2011 }
 0x367   :  { %7025 = vst [vmem:[#allocation80_spill] sm:$0xff] %v5881_v20  ;;  %3511 = vmatprep.subr.bf16.mxu0 %v7027_v8  ;;  %v5908_v8 = vmul.f32 %v7001_v49, %v1883_v27  ;;  %v7034_v7 = vpack.c.bf16 %v6927_v55, %v6907_v48  ;;  %3292 = vmatprep.mubr.f32.mxu1 %v2644_v52  ;;  %v7037_v27 = vld [vmem:[#allocation120_spill] sm:$0xff]  ;;  %7040 = vst [vmem:[#allocation112_spill] sm:$0xff] %v5933_v38  ;;  %v7044_v38 = vld [vmem:[#allocation129_spill] sm:$0xff] }
 0x368   :  { %3657 = vmatpush1.bf16.msra.mxu1 %v7033_v2  ;;  %v7035_v2 = vld [vmem:[#allocation106_spill] sm:$0xff]  ;;  %v1832_v15 = vsel %vm238_vm4, %v7037_v27, %v7036_v28  ;;  %2441 = vrot.lane.b32.xlu0 %v7020_v53, %s3762_s11  ;;  %v5936_v43 = vmul.f32 %v6993_v14, %v1829_v30  ;;  %v7042_v53 = vpack.c.bf16 %v6913_v21, %v6902_v40 }
 0x369   :  { %3659 = vmatprep.subr.bf16.mxu1 %v7034_v7  ;;  %v1885_v34 = vsel %vm238_vm4, %v7035_v2, %v7029_v29  ;;  %v7038_v7 = vld [vmem:[#allocation20_spill] sm:$0xff]  ;;  %v7041_v29 = vld [vmem:[#allocation111_spill] sm:$0xff] }
 0x36a   :  { %v7039_v52 = vpack.c.bf16 %v7038_v7, %v7015_v44  ;;  %v1830_v55 = vsel %vm238_vm4, %v7028_v54, %v7041_v29  ;;  %v1831_v20 = vsel %vm238_vm4, %v7041_v29, %v7035_v2  ;;  %v3670_v44 = vpack.c.bf16 %v5887_v31, %v5908_v8  ;;  %v5958_v2 = vpop.permute.xlu0 %2013  ;;  %2443 = vrot.lane.b32.xlu1 %v7038_v7, %s3762_s11  ;;  %v7047_v29 = vld [vmem:[#allocation7_spill] sm:$0xff] }
 0x36b   :  { %v1886_v54 = vsel %vm238_vm4, %v7044_v38, %v7037_v27  ;;  %7045 = vst [vmem:[#allocation89_spill] sm:$0xff] %v5958_v2  ;;  %v7046_v31 = vpack.c.bf16 %v6917_v18, %v6906_v0  ;;  %v5966_v8 = vmul.f32 %v7001_v49, %v1885_v34  ;;  %v7049_v27 = vpack.c.bf16 %v6962_v17, %v6940_v57  ;;  %v7050_v34 = vld [vmem:[#allocation36_spill] sm:$0xff]  ;;  %v7052_v17 = vld [vmem:[#allocation6_spill] sm:$0xff]  ;;  %v7054_v2 = vld [vmem:[#allocation23_spill] sm:$0xff] }
 0x36c   :  { %3513 = vmatpush1.bf16.msra.mxu0 %v7039_v52  ;;  %v7043_v52 = vld [vmem:[#allocation121_spill] sm:$0xff]  ;;  %v5981_v7 = vmul.f32 %v6997_v26, %v1830_v55  ;;  %2445 = vrot.lane.b32.xlu0 %v7026_v25, %s3762_s11  ;;  %v6004_v57 = vrot.slane %v3405_v33, %v7052_v17  ;;  %v7053_v25 = vpack.c.bf16 %v6947_v37, %v6935_v24 }
 0x36d   :  { %3515 = vmatprep.subr.bf16.mxu0 %v7042_v53  ;;  %v1833_v30 = vsel %vm238_vm4, %v7036_v28, %v7043_v52  ;;  %v1834_v41 = vsel %vm238_vm4, %v7043_v52, %v7044_v38  ;;  %3661 = vmatpush1.bf16.msra.mxu1 %v7046_v31  ;;  %v5969_v28 = vmul.f32 %v6993_v14, %v1832_v15  ;;  %v7048_v52 = vld [vmem:[#allocation4_spill] sm:$0xff] }
 0x36e   :  { %v5972_v53 = vrot.slane %v3405_v33, %v7047_v29  ;;  %v5975_v38 = vrot.slane %v3405_v33, %v7048_v52  ;;  %3663 = vmatprep.subr.bf16.mxu1 %v7049_v27  ;;  %v5984_v31 = vmul.f32 %v7002_v13, %v1831_v20  ;;  %v1838_v15 = vsel %vm238_vm4, %v5484_v32, %v5502_v60  ;;  %v5994_v52 = vpop.permute.xlu1 %2015 }
 0x36f   :  { %v7051_v29 = vpack.c.bf16 %v6910_v46, %v7050_v34  ;;  %v5997_v27 = vmul.f32 %v6997_v26, %v1833_v30  ;;  %v6000_v55 = vmul.f32 %v7002_v13, %v1834_v41  ;;  %v1934_v20 = vmul.f32 %v7001_v49, %v1886_v54  ;;  %v6018_v54 = vpop.permute.xlu0 %2017  ;;  %2447 = vrot.lane.b32.xlu1 %v7032_v42, %s3762_s11 }
 0x370   :  { %v1839_v30 = vsel %vm238_vm4, %v5502_v60, %v5530_v62  ;;  %v1840_v41 = vsel %vm238_vm4, %v5530_v62, %v5547_v1  ;;  %7055 = vst [vmem:[#allocation77_spill] sm:$0xff] %v6018_v54  ;;  %v1836_v60 = vsel %vm238_vm4, %v5437_v4, %v5453_v19  ;;  %v6031_v37 = vmul.f32 %v6993_v14, %v1838_v15  ;;  %v7057_v62 = vld [vmem:[#allocation5_spill] sm:$0xff]  ;;  %v7058_v54 = vld [vmem:[#allocation44_spill] sm:$0xff] }
 0x371   :  { %3517 = vmatpush1.bf16.msra.mxu0 %v7051_v29  ;;  %v1835_v29 = vsel %vm238_vm4, %v7054_v2, %v5437_v4  ;;  %v6034_v24 = vrot.slane %v3405_v33, %v7057_v62  ;;  %v1837_v42 = vsel %vm238_vm4, %v5453_v19, %v7058_v54  ;;  %v1888_v17 = vsel %vm238_vm4, %v5547_v1, %v5484_v32 }
 0x372   :  { %3519 = vmatprep.subr.bf16.mxu0 %v7053_v25  ;;  %v7056_v25 = vpack.c.bf16 %v6953_v59, %v6939_v12  ;;  %2449 = vrot.lane.b32.xlu0 %v7019_v36, %s3762_s11  ;;  %v7059_v4 = vpack.c.bf16 %v6944_v22, %v6931_v45  ;;  %v6053_v33 = vmul.f32 %v6993_v14, %v1835_v29 }
 0x373   :  { %v6056_v19 = vmul.f32 %v6997_v26, %v1839_v30  ;;  %v7060_v1 = vpack.c.bf16 %v5777_v3, %v5800_v56  ;;  %v3530_v32 = vpack.c.bf16 %v5997_v27, %v5981_v7  ;;  %v3676_v36 = vpack.c.bf16 %v6000_v55, %v5984_v31  ;;  %v6071_v14 = vpop.permute.xlu0 %2021  ;;  %2451 = vrot.lane.b32.xlu1 %v7050_v34, %s3762_s11  ;;  %v7064_v27 = vld [vmem:[#allocation55_spill] sm:$0xff]  ;;  %v7066_v55 = vld [vmem:[#allocation57_spill] sm:$0xff] }
 0x374   :  { %3665 = vmatpush1.bf16.msra.mxu1 %v7056_v25  ;;  %v1887_v25 = vsel %vm238_vm4, %v7058_v54, %v7054_v2  ;;  %v6059_v2 = vmul.f32 %v7002_v13, %v1840_v41  ;;  %v6069_v15 = vmul.f32 %v6997_v26, %v1836_v60  ;;  %v7061_v29 = vpack.c.bf16 %v5811_v5, %v5803_v35 }
 0x375   :  { %3667 = vmatprep.subr.bf16.mxu1 %v3666_v11  ;;  %3521 = vmatpush1.bf16.msra.mxu0 %v7059_v4  ;;  %v6050_v11 = vpop.permute.xlu1 %2019  ;;  %v3674_v3 = vpack.c.bf16 %v1934_v20, %v5966_v8  ;;  %v6080_v56 = vmul.f32 %v7002_v13, %v1837_v42  ;;  %v1938_v7 = vmul.f32 %v7001_v49, %v1887_v25 }
 0x376   :  { %3523 = vmatprep.subr.bf16.mxu0 %v7060_v1  ;;  %v3536_v26 = vpack.c.bf16 %v6031_v37, %v6053_v33  ;;  %v1942_v31 = vmul.f32 %v7001_v49, %v1888_v17  ;;  %v2039_v34 = vsel %vm287_vm6, %v5573_v39, %v5586_v10  ;;  %v2042_v35 = vsel %vm287_vm6, %v5632_v6, %v5647_v61  ;;  %v7072_v1 = vld [vmem:[#allocation76_spill] sm:$0xff] }
 0x377   :  { %v2043_v13 = vsel %vm287_vm6, %v5647_v61, %v5672_v51  ;;  %2453 = vrot.lane.b32.xlu0 %v6902_v40, %s3762_s11  ;;  %v7062_v5 = vpack.c.bf16 %v5762_v23, %v5774_v47  ;;  %v3680_v49 = vpack.c.bf16 %v6059_v2, %v6080_v56  ;;  %v7065_v40 = vpack.c.bf16 %v5860_v9, %v5884_v16  ;;  %v6124_v30 = vpop.permute.xlu0 %2025  ;;  %v7075_v56 = vld [vmem:[#allocation71_spill] sm:$0xff] }
 0x378   :  { %3669 = vmatpush1.bf16.msra.mxu1 %v7061_v29  ;;  %v3534_v23 = vpack.c.bf16 %v6056_v19, %v6069_v15  ;;  %v2103_v47 = vsel %vm287_vm6, %v7064_v27, %v5573_v39  ;;  %v2044_v20 = vsel %vm287_vm6, %v5672_v51, %v7066_v55  ;;  %2455 = vrot.lane.b32.xlu1 %v6906_v0, %s3762_s11  ;;  %v7068_v0 = vld [vmem:[#allocation64_spill] sm:$0xff] }
 0x379   :  { %3671 = vmatprep.subr.bf16.mxu1 %v3670_v44  ;;  %3525 = vmatpush1.bf16.msra.mxu0 %v7062_v5  ;;  %v6100_v17 = vpop.permute.xlu1 %2023  ;;  %v7063_v44 = vld [vmem:[#allocation52_spill] sm:$0xff]  ;;  %v7067_v9 = vpack.c.bf16 %v5871_v58, %v5893_v50  ;;  %v6132_v16 = vmul.f32 %v5972_v53, %v2039_v34  ;;  %v6135_v39 = vmul.f32 %v5972_v53, %v2042_v35  ;;  %v7069_v50 = vld [vmem:[#allocation86_spill] sm:$0xff] }
 0x37a   :  { %v2040_v8 = vsel %vm287_vm6, %v5586_v10, %v7063_v44  ;;  %v2041_v61 = vsel %vm287_vm6, %v7063_v44, %v7064_v27  ;;  %3527 = vmatprep.subr.bf16.mxu0 %v7065_v40  ;;  %v2104_v10 = vsel %vm287_vm6, %v7066_v55, %v5632_v6  ;;  %v2138_v51 = vmul.f32 %v5975_v38, %v2043_v13  ;;  %v7070_v58 = vld [vmem:[#allocation80_spill] sm:$0xff]  ;;  %v7077_v44 = vld [vmem:[#allocation62_spill] sm:$0xff] }
 0x37b   :  { %v3678_v41 = vpack.c.bf16 %v1942_v31, %v1938_v7  ;;  %v2134_v6 = vmul.f32 %v5975_v38, %v2040_v8  ;;  %v2135_v54 = vmul.f32 %v6004_v57, %v2041_v61  ;;  %v2048_v60 = vsel %vm287_vm6, %v7068_v0, %v5787_v63  ;;  %2457 = vrot.lane.b32.xlu0 %v6907_v48, %s3762_s11  ;;  %v7073_v29 = vld [vmem:[#allocation60_spill] sm:$0xff]  ;;  %v6165_v34 = vpop.permute.xlu0 %2029 }
 0x37c   :  { %3673 = vmatpush1.bf16.msra.mxu1 %v7067_v9  ;;  %v7071_v42 = vpack.c.bf16 %v7069_v50, %v7070_v58  ;;  %v2136_v4 = vmul.f32 %v6034_v24, %v2103_v47  ;;  %v2139_v19 = vmul.f32 %v6004_v57, %v2044_v20  ;;  %v2140_v2 = vmul.f32 %v6034_v24, %v2104_v10 }
 0x37d   :  { %3675 = vmatprep.subr.bf16.mxu1 %v3674_v3  ;;  %v6148_v25 = vpop.permute.xlu1 %2027  ;;  %v2049_v15 = vsel %vm287_vm6, %v5787_v63, %v7072_v1  ;;  %v7074_v3 = vld [vmem:[#allocation58_spill] sm:$0xff]  ;;  %v2050_v7 = vsel %vm287_vm6, %v7072_v1, %v7075_v56  ;;  %v2106_v31 = vsel %vm287_vm6, %v7075_v56, %v7068_v0  ;;  %2459 = vrot.lane.b32.xlu1 %v6910_v46, %s3762_s11  ;;  %v7082_v0 = vld [vmem:[#allocation73_spill] sm:$0xff] }
 0x37e   :  { %3529 = vmatpush1.bf16.msra.mxu0 %v7071_v42  ;;  %v2045_v48 = vsel %vm287_vm6, %v7074_v3, %v7073_v29  ;;  %v3540_v63 = vpack.c.bf16 %v6135_v39, %v6132_v16  ;;  %v6175_v13 = vmul.f32 %v5972_v53, %v2048_v60  ;;  %v3538_v5 = vpack.c.bf16 %v2138_v51, %v2134_v6  ;;  %v7079_v39 = vld [vmem:[#allocation77_spill] sm:$0xff]  ;;  %v7081_v6 = vld [vmem:[#allocation122_spill] sm:$0xff] }
 0x37f   :  { %3531 = vmatprep.subr.bf16.mxu0 %v3530_v32  ;;  %v7076_v32 = vld [vmem:[#allocation59_spill] sm:$0xff]  ;;  %v2105_v46 = vsel %vm287_vm6, %v7077_v44, %v7074_v3  ;;  %2461 = vrot.lane.b32.xlu0 %v6913_v21, %s3762_s11  ;;  %v7078_v27 = vpack.c.bf16 %v5969_v28, %v5936_v43  ;;  %v6190_v40 = vmul.f32 %v5972_v53, %v2045_v48  ;;  %v2034_v16 = vpop.permute.xlu0 %2033  ;;  %v7083_v60 = vld [vmem:[#allocation89_spill] sm:$0xff]  ;;  %v7085_v56 = vld [vmem:[#allocation78_spill] sm:$0xff] }
 0x380   :  { %3677 = vmatpush1.bf16.msra.mxu1 %v3676_v36  ;;  %v2046_v35 = vsel %vm287_vm6, %v7073_v29, %v7076_v32  ;;  %v2047_v8 = vsel %vm287_vm6, %v7076_v32, %v7077_v44  ;;  %v2146_v36 = vmul.f32 %v5975_v38, %v2049_v15  ;;  %v2147_v47 = vmul.f32 %v6004_v57, %v2050_v7 }
 0x381   :  { %3679 = vmatprep.subr.bf16.mxu1 %v3678_v41  ;;  %v2032_v61 = vpop.permute.xlu1 %2031  ;;  %v2148_v55 = vmul.f32 %v6034_v24, %v2106_v31  ;;  %v3682_v20 = vpack.c.bf16 %v2140_v2, %v2136_v4  ;;  %v3684_v10 = vpack.c.bf16 %v2139_v19, %v2135_v54  ;;  %v2142_v9 = vmul.f32 %v5975_v38, %v2046_v35  ;;  %v7080_v41 = vld [vmem:[#allocation112_spill] sm:$0xff] }
 0x382   :  { %3533 = vmatpush1.bf16.msra.mxu0 %v7078_v27  ;;  %v2108_v21 = vsel %vm287_vm6, %v6071_v14, %v5994_v52  ;;  %2463 = vrot.lane.b32.xlu1 %v6917_v18, %s3762_s11  ;;  %v2143_v43 = vmul.f32 %v6004_v57, %v2047_v8  ;;  %v2144_v28 = vmul.f32 %v6034_v24, %v2105_v46 }
 0x383   :  { %3535 = vmatprep.subr.bf16.mxu0 %v3534_v23  ;;  %v3544_v23 = vpack.c.bf16 %v6175_v13, %v6190_v40  ;;  %v2055_v51 = vsel %vm287_vm6, %v7079_v39, %v6050_v11  ;;  %v2052_v54 = vsel %vm287_vm6, %v7081_v6, %v7080_v41  ;;  %v2107_v18 = vsel %vm287_vm6, %v7083_v60, %v7082_v0 }
 0x384   :  { %3681 = vmatpush1.bf16.msra.mxu1 %v3680_v49  ;;  %v7084_v49 = vld [vmem:[#allocation66_spill] sm:$0xff]  ;;  %v3542_v58 = vpack.c.bf16 %v2146_v36, %v2142_v9  ;;  %v3688_v42 = vpack.c.bf16 %v2147_v47, %v2143_v43  ;;  %v2056_v4 = vsel %vm287_vm6, %v6050_v11, %v6071_v14  ;;  %v2156_v19 = vmul.f32 %v6034_v24, %v2108_v21 }
 0x385   :  { %3683 = vmatprep.subr.bf16.mxu1 %v3682_v20  ;;  %2465 = vrot.lane.b32.xlu0 %v7084_v49, %s3762_s11  ;;  %v2036_v50 = vpop.permute.xlu1 %2035  ;;  %v3686_v2 = vpack.c.bf16 %v2148_v55, %v2144_v28  ;;  %v2051_v1 = vsel %vm287_vm6, %v7082_v0, %v7081_v6  ;;  %v2053_v37 = vsel %vm287_vm6, %v7080_v41, %v7083_v60  ;;  %v7090_v6 = vld [vmem:[#allocation6_spill] sm:$0xff]  ;;  %v2934_v60 = vld [vmem:[%s6464_s5] sm:$0xff] }
 0x386   :  { %3537 = vmatpush1.bf16.msra.mxu0 %v3536_v26  ;;  %v2154_v33 = vmul.f32 %v5975_v38, %v2055_v51  ;;  %v2038_v26 = vpop.permute.xlu0 %2037  ;;  %2467 = vrot.lane.b32.xlu1 %v6931_v45, %s3762_s11  ;;  %v2150_v11 = vmul.f32 %v5975_v38, %v2052_v54  ;;  %v2152_v14 = vmul.f32 %v6034_v24, %v2107_v18 }
 0x387   :  { %3539 = vmatprep.subr.bf16.mxu0 %v3538_v5  ;;  %v2054_v15 = vsel %vm287_vm6, %v5994_v52, %v7079_v39  ;;  %v2110_v29 = vsel %vm287_vm6, %v2038_v26, %v2032_v61  ;;  %v2155_v3 = vmul.f32 %v6004_v57, %v2056_v4  ;;  %v2109_v48 = vsel %vm287_vm6, %v6165_v34, %v6100_v17 }
 0x388   :  { %3685 = vmatpush1.bf16.msra.mxu1 %v3684_v10  ;;  %v2061_v45 = vsel %vm287_vm6, %v2034_v16, %v2036_v50  ;;  %v2151_v31 = vmul.f32 %v6004_v57, %v2053_v37  ;;  %v2062_v52 = vsel %vm287_vm6, %v2036_v50, %v2038_v26  ;;  %v2164_v32 = vmul.f32 %v6034_v24, %v2110_v29  ;;  %v7091_v50 = vld [vmem:[#allocation101_spill] sm:$0xff] }
 0x389   :  { %3687 = vmatprep.subr.bf16.mxu1 %v3686_v2  ;;  %2469 = vrot.lane.b32.xlu0 %v7085_v56, %s3762_s11  ;;  %v2198_v7 = vpop.permute.xlu1 %2197  ;;  %v3690_v35 = vpack.c.bf16 %v2156_v19, %v2152_v14  ;;  %v2153_v13 = vmul.f32 %v5972_v53, %v2054_v15  ;;  %v2058_v5 = vsel %vm287_vm6, %v6124_v30, %v6148_v25 }
 0x38a   :  { %3541 = vmatpush1.bf16.msra.mxu0 %v3540_v63  ;;  %v2200_v44 = vpop.permute.xlu0 %2199  ;;  %2471 = vrot.lane.b32.xlu1 %v6939_v12, %s3762_s11  ;;  %v3546_v63 = vpack.c.bf16 %v2154_v33, %v2150_v11  ;;  %v2059_v8 = vsel %vm287_vm6, %v6148_v25, %v6165_v34  ;;  %v2160_v46 = vmul.f32 %v6034_v24, %v2109_v48  ;;  %v7086_v12 = vld [vmem:[#allocation95_spill] sm:$0xff] }
 0x38b   :  { %3543 = vmatprep.subr.bf16.mxu0 %v3542_v58  ;;  %v2060_v36 = vsel %vm287_vm6, %v2032_v61, %v2034_v16  ;;  %v2162_v27 = vmul.f32 %v5975_v38, %v2061_v45  ;;  %v2149_v40 = vmul.f32 %v5972_v53, %v2051_v1  ;;  %v3692_v47 = vpack.c.bf16 %v2155_v3, %v2151_v31 }
 0x38c   :  { %3689 = vmatpush1.bf16.msra.mxu1 %v3688_v42  ;;  %v2163_v55 = vmul.f32 %v6004_v57, %v2062_v52  ;;  %v2057_v25 = vsel %vm287_vm6, %v6100_v17, %v6124_v30  ;;  %v2158_v24 = vmul.f32 %v5975_v38, %v2058_v5  ;;  %v3694_v34 = vpack.c.bf16 %v2164_v32, %v2160_v46  ;;  %v3406_v38 = vld [vmem:[%s6461_s1 + $0x7] ss:$8 sm:$0xf] }
 0x38d   :  { %3691 = vmatprep.subr.bf16.mxu1 %v3690_v35  ;;  %2473 = vrot.lane.b32.xlu0 %v7086_v12, %s3762_s11  ;;  %v2202_v20 = vpop.permute.xlu1 %2201  ;;  %v3548_v61 = vpack.c.bf16 %v2153_v13, %v2149_v40  ;;  %v2159_v10 = vmul.f32 %v6004_v57, %v2059_v8  ;;  %v2161_v9 = vmul.f32 %v5972_v53, %v2060_v36  ;;  %v7087_v17 = vld [vmem:[#allocation102_spill] sm:$0xff] }
 0x38e   :  { %3545 = vmatpush1.bf16.msra.mxu0 %v3544_v23  ;;  %v2204_v21 = vpop.permute.xlu0 %2203  ;;  %2475 = vrot.lane.b32.xlu1 %v6944_v22, %s3762_s11  ;;  %v3550_v16 = vpack.c.bf16 %v2162_v27, %v2158_v24  ;;  %v2157_v43 = vmul.f32 %v5972_v53, %v2057_v25  ;;  %v7088_v23 = vld [vmem:[#allocation4_spill] sm:$0xff]  ;;  %v7089_v53 = vld [vmem:[#allocation7_spill] sm:$0xff]  ;;  %v2262_v41 = vsel %vm336_vm5, %v2200_v44, %v2202_v20 }
 0x38f   :  { %3547 = vmatprep.subr.bf16.mxu0 %v3546_v63  ;;  %v3696_v28 = vpack.c.bf16 %v2163_v55, %v2159_v10  ;;  %v6278_v39 = vrot.slane %v3406_v38, %v7088_v23  ;;  %v6283_v51 = vrot.slane %v3406_v38, %v7089_v53  ;;  %v6287_v54 = vrot.slane %v3406_v38, %v7090_v6 }
 0x390   :  { %3693 = vmatpush1.bf16.msra.mxu1 %v3692_v47  ;;  %v3552_v30 = vpack.c.bf16 %v2161_v9, %v2157_v43  ;;  %v2261_v18 = vsel %vm336_vm5, %v2198_v7, %v2200_v44  ;;  %v6295_v49 = vrot.slane %v3406_v38, %v7057_v62  ;;  %v2325_v42 = vsel %vm336_vm5, %v2204_v21, %v2198_v7 }
 0x391   :  { %3695 = vmatprep.subr.bf16.mxu1 %v3694_v34  ;;  %2477 = vrot.lane.b32.xlu0 %v7087_v17, %s3762_s11  ;;  %v2206_v57 = vpop.permute.xlu1 %2205  ;;  %v2356_v2 = vmul.f32 %v6278_v39, %v2262_v41  ;;  %v2355_v33 = vmul.f32 %v6283_v51, %v2261_v18 }
 0x392   :  { %3549 = vmatpush1.bf16.msra.mxu0 %v3548_v61  ;;  %v2208_v22 = vpop.permute.xlu0 %2207  ;;  %2479 = vrot.lane.b32.xlu1 %v6953_v59, %s3762_s11  ;;  %v2263_v59 = vsel %vm336_vm5, %v2202_v20, %v2204_v21  ;;  %v2358_v15 = vmul.f32 %v6295_v49, %v2325_v42 }
 0x393   :  { %3551 = vmatprep.subr.bf16.mxu0 %v3550_v16  ;;  %v2264_v0 = vsel %vm336_vm5, %v2206_v57, %v2208_v22  ;;  %v2357_v26 = vmul.f32 %v6287_v54, %v2263_v59 }
 0x394   :  { %3697 = vmatpush1.bf16.msra.mxu1 %v3696_v28  ;;  %v2359_v4 = vmul.f32 %v6283_v51, %v2264_v0 }
 0x395   :  { %2481 = vrot.lane.b32.xlu0 %v7091_v50, %s3762_s11  ;;  %v2210_v58 = vpop.permute.xlu1 %2209 }
 0x396   :  { %3553 = vmatpush1.bf16.msra.mxu0 %v3552_v30  ;;  %v2265_v19 = vsel %vm336_vm5, %v2208_v22, %v2210_v58  ;;  %v2212_v37 = vpop.permute.xlu0 %2211  ;;  %2937 = vperm.xlu1 %3753, %v2934_v60   ;;  %v3556_v56 = vpack.c.bf16 %v2359_v4, %v2355_v33 }
 0x397   :  { %v2360_v1 = vmul.f32 %v6278_v39, %v2265_v19  ;;  %v2266_v11 = vsel %vm336_vm5, %v2210_v58, %v2212_v37  ;;  %v2326_v14 = vsel %vm336_vm5, %v2212_v37, %v2206_v57 }
 0x398   :  { %v2361_v29 = vmul.f32 %v6287_v54, %v2266_v11  ;;  %v2362_v3 = vmul.f32 %v6295_v49, %v2326_v14 }
 0x399   :  { %v2214_v48 = vpop.permute.xlu1 %2213  ;;  %v3554_v45 = vpack.c.bf16 %v2360_v1, %v2356_v2 }
 0x39a   :  { %v3700_v7 = vpack.c.bf16 %v2361_v29, %v2357_v26  ;;  %v2216_v31 = vpop.permute.xlu0 %2215  ;;  %v3698_v52 = vpack.c.bf16 %v2362_v3, %v2358_v15 }
 0x39b   :  { %3555 = vmatprep.subr.bf16.mxu0 %v3554_v45  ;;  %v2267_v8 = vsel %vm336_vm5, %v2214_v48, %v2216_v31 }
 0x39c   :  { %3557 = vmatpush1.bf16.msra.mxu0 %v3556_v56  ;;  %3699 = vmatprep.subr.bf16.mxu1 %v3698_v52  ;;  %v2363_v25 = vmul.f32 %v6283_v51, %v2267_v8 }
 0x39d   :  { %v2218_v32 = vpop.permute.xlu1 %2217  ;;  %3701 = vmatpush1.bf16.msra.mxu1 %v3700_v7 }
 0x39e   :  { %v2220_v35 = vpop.permute.xlu0 %2219  ;;  %v2268_v44 = vsel %vm336_vm5, %v2216_v31, %v2218_v32 }
 0x39f   :  { %v2269_v46 = vsel %vm336_vm5, %v2218_v32, %v2220_v35  ;;  %v2327_v27 = vsel %vm336_vm5, %v2220_v35, %v2214_v48  ;;  %v2364_v55 = vmul.f32 %v6278_v39, %v2268_v44 }
 0x3a0   :  { %v2365_v24 = vmul.f32 %v6287_v54, %v2269_v46  ;;  %v2366_v10 = vmul.f32 %v6295_v49, %v2327_v27 }
 0x3a1   :  { %v2222_v13 = vpop.permute.xlu1 %2221 }
 0x3a2   :  { %v2224_v5 = vpop.permute.xlu0 %2223 }
 0x3a3   :  { %v2270_v63 = vsel %vm336_vm5, %v2222_v13, %v2224_v5 }
 0x3a4   :  { %v2367_v40 = vmul.f32 %v6283_v51, %v2270_v63 }
 0x3a5   :  { %v2226_v36 = vpop.permute.xlu1 %2225 }
 0x3a6   :  { %v2271_v47 = vsel %vm336_vm5, %v2224_v5, %v2226_v36  ;;  %v2228_v20 = vpop.permute.xlu0 %2227  ;;  %v3560_v28 = vpack.c.bf16 %v2367_v40, %v2363_v25 }
 0x3a7   :  { %v2368_v12 = vmul.f32 %v6278_v39, %v2271_v47  ;;  %v2272_v34 = vsel %vm336_vm5, %v2226_v36, %v2228_v20  ;;  %v2328_v61 = vsel %vm336_vm5, %v2228_v20, %v2222_v13 }
 0x3a8   :  { %v2369_v9 = vmul.f32 %v6287_v54, %v2272_v34  ;;  %v2370_v21 = vmul.f32 %v6295_v49, %v2328_v61 }
 0x3a9   :  { %v2230_v16 = vpop.permute.xlu1 %2229  ;;  %v3558_v43 = vpack.c.bf16 %v2368_v12, %v2364_v55 }
 0x3aa   :  { %v3704_v38 = vpack.c.bf16 %v2369_v9, %v2365_v24  ;;  %v2232_v17 = vpop.permute.xlu0 %2231  ;;  %v3702_v57 = vpack.c.bf16 %v2370_v21, %v2366_v10 }
 0x3ab   :  { %3559 = vmatprep.subr.bf16.mxu0 %v3558_v43  ;;  %v2273_v59 = vsel %vm336_vm5, %v2230_v16, %v2232_v17 }
 0x3ac   :  { %3561 = vmatpush1.bf16.msra.mxu0 %v3560_v28  ;;  %3703 = vmatprep.subr.bf16.mxu1 %v3702_v57  ;;  %v2371_v33 = vmul.f32 %v6283_v51, %v2273_v59 }
 0x3ad   :  { %v2234_v30 = vpop.permute.xlu1 %2233  ;;  %3705 = vmatpush1.bf16.msra.mxu1 %v3704_v38 }
 0x3ae   :  { %v2236_v22 = vpop.permute.xlu0 %2235  ;;  %v2274_v60 = vsel %vm336_vm5, %v2232_v17, %v2234_v30 }
 0x3af   :  { %v2275_v50 = vsel %vm336_vm5, %v2234_v30, %v2236_v22  ;;  %v2329_v42 = vsel %vm336_vm5, %v2236_v22, %v2230_v16  ;;  %v2372_v2 = vmul.f32 %v6278_v39, %v2274_v60 }
 0x3b0   :  { %v2373_v26 = vmul.f32 %v6287_v54, %v2275_v50  ;;  %v2374_v15 = vmul.f32 %v6295_v49, %v2329_v42 }
 0x3b1   :  { %v2238_v41 = vpop.permute.xlu1 %2237 }
 0x3b2   :  { %v2240_v0 = vpop.permute.xlu0 %2239 }
 0x3b3   :  { %v2276_v18 = vsel %vm336_vm5, %v2238_v41, %v2240_v0 }
 0x3b4   :  { %v2375_v4 = vmul.f32 %v6283_v51, %v2276_v18 }
 0x3b5   :  { %v2242_v58 = vpop.permute.xlu1 %2241 }
 0x3b6   :  { %v2277_v19 = vsel %vm336_vm5, %v2240_v0, %v2242_v58  ;;  %v2244_v37 = vpop.permute.xlu0 %2243  ;;  %v3564_v56 = vpack.c.bf16 %v2375_v4, %v2371_v33 }
 0x3b7   :  { %v2376_v1 = vmul.f32 %v6278_v39, %v2277_v19  ;;  %v2278_v11 = vsel %vm336_vm5, %v2242_v58, %v2244_v37  ;;  %v2330_v14 = vsel %vm336_vm5, %v2244_v37, %v2238_v41 }
 0x3b8   :  { %v2377_v29 = vmul.f32 %v6287_v54, %v2278_v11  ;;  %v2378_v3 = vmul.f32 %v6295_v49, %v2330_v14 }
 0x3b9   :  { %v2246_v48 = vpop.permute.xlu1 %2245  ;;  %v3562_v45 = vpack.c.bf16 %v2376_v1, %v2372_v2 }
 0x3ba   :  { %v3708_v7 = vpack.c.bf16 %v2377_v29, %v2373_v26  ;;  %v2248_v31 = vpop.permute.xlu0 %2247  ;;  %v3706_v52 = vpack.c.bf16 %v2378_v3, %v2374_v15 }
 0x3bb   :  { %3563 = vmatprep.subr.bf16.mxu0 %v3562_v45  ;;  %v2279_v8 = vsel %vm336_vm5, %v2246_v48, %v2248_v31 }
 0x3bc   :  { %3565 = vmatpush1.bf16.msra.mxu0 %v3564_v56  ;;  %3707 = vmatprep.subr.bf16.mxu1 %v3706_v52  ;;  %v2379_v25 = vmul.f32 %v6283_v51, %v2279_v8 }
 0x3bd   :  { %v2250_v32 = vpop.permute.xlu1 %2249  ;;  %3709 = vmatpush1.bf16.msra.mxu1 %v3708_v7 }
 0x3be   :  { %v2252_v35 = vpop.permute.xlu0 %2251  ;;  %v2280_v44 = vsel %vm336_vm5, %v2248_v31, %v2250_v32 }
 0x3bf   :  { %v2281_v46 = vsel %vm336_vm5, %v2250_v32, %v2252_v35  ;;  %v2331_v27 = vsel %vm336_vm5, %v2252_v35, %v2246_v48  ;;  %v2380_v55 = vmul.f32 %v6278_v39, %v2280_v44 }
 0x3c0   :  { %v2381_v24 = vmul.f32 %v6287_v54, %v2281_v46  ;;  %v2382_v10 = vmul.f32 %v6295_v49, %v2331_v27 }
 0x3c1   :  { %v2254_v13 = vpop.permute.xlu1 %2253 }
 0x3c2   :  { %v2256_v5 = vpop.permute.xlu0 %2255 }
 0x3c3   :  { %v2282_v63 = vsel %vm336_vm5, %v2254_v13, %v2256_v5 }
 0x3c4   :  { %v2383_v40 = vmul.f32 %v6283_v51, %v2282_v63  ;;  %v2643_v51 = vld [vmem:[%s6463_s4 + $0x10] sm:$0xff] }
 0x3c5   :  { %v2258_v36 = vpop.permute.xlu1 %2257 }
 0x3c6   :  { %v2283_v47 = vsel %vm336_vm5, %v2256_v5, %v2258_v36  ;;  %v2260_v20 = vpop.permute.xlu0 %2259  ;;  %v3568_v28 = vpack.c.bf16 %v2383_v40, %v2379_v25 }
 0x3c7   :  { %v2384_v12 = vmul.f32 %v6278_v39, %v2283_v47  ;;  %v2284_v34 = vsel %vm336_vm5, %v2258_v36, %v2260_v20  ;;  %v2332_v61 = vsel %vm336_vm5, %v2260_v20, %v2254_v13 }
 0x3c8   :  { %v2385_v9 = vmul.f32 %v6287_v54, %v2284_v34  ;;  %v2386_v21 = vmul.f32 %v6295_v49, %v2332_v61  ;;  %v7092_v54 = vmov 0.0   ;;  %v3407_v49 = vld [vmem:[%s6461_s1 + $0x20] ss:$8 sm:$0xf] }
 0x3c9   :  { %v2420_v16 = vpop.permute.xlu1 %2419  ;;  %v3566_v43 = vpack.c.bf16 %v2384_v12, %v2380_v55  ;;  %v6369_v41 = vrot.slane %v3407_v49, %v7088_v23  ;;  %v6372_v60 = vrot.slane %v3407_v49, %v7089_v53  ;;  %v6376_v59 = vrot.slane %v3407_v49, %v7090_v6 }
 0x3ca   :  { %v3712_v38 = vpack.c.bf16 %v2385_v9, %v2381_v24  ;;  %v2422_v39 = vpop.permute.xlu0 %2421  ;;  %v3710_v17 = vpack.c.bf16 %v2386_v21, %v2382_v10  ;;  %v6381_v42 = vrot.slane %v3407_v49, %v7057_v62 }
 0x3cb   :  { %3567 = vmatprep.subr.bf16.mxu0 %v3566_v43  ;;  %v2483_v58 = vsel %vm385_vm7, %v2420_v16, %v2422_v39 }
 0x3cc   :  { %3569 = vmatpush1.bf16.msra.mxu0 %v3568_v28  ;;  %3711 = vmatprep.subr.bf16.mxu1 %v3710_v17  ;;  %v2577_v33 = vmul.f32 %v6372_v60, %v2483_v58 }
 0x3cd   :  { %v2424_v57 = vpop.permute.xlu1 %2423  ;;  %3713 = vmatpush1.bf16.msra.mxu1 %v3712_v38 }
 0x3ce   :  { %v2426_v30 = vpop.permute.xlu0 %2425  ;;  %v2484_v18 = vsel %vm385_vm7, %v2422_v39, %v2424_v57 }
 0x3cf   :  { %3080 = vmatmul.mubr.f32.vlgmr.msra.gmra.mrb[16].mxu0 %v2643_v51  ;;  %v2485_v4 = vsel %vm385_vm7, %v2424_v57, %v2426_v30  ;;  %v2547_v19 = vsel %vm385_vm7, %v2426_v30, %v2420_v16  ;;  %v2578_v1 = vmul.f32 %v6369_v41, %v2484_v18 }
 0x3d0   :  { %3150 = vmatprep.mubr.f32.mxu0 %v7092_v54  ;;  %3293 = vmatmul.mubr.f32.vlgmr.msra.gmra.mrb[16].mxu1 %v2643_v51  ;;  %v2579_v26 = vmul.f32 %v6376_v59, %v2485_v4  ;;  %v2580_v14 = vmul.f32 %v6381_v42, %v2547_v19 }
 0x3d1   :  { %v2428_v22 = vpop.permute.xlu1 %2427  ;;  %3363 = vmatprep.mubr.f32.mxu1 %v7092_v54 }
 0x3d2   :  { %v2430_v0 = vpop.permute.xlu0 %2429 }
 0x3d3   :  { %v2486_v50 = vsel %vm385_vm7, %v2428_v22, %v2430_v0 }
 0x3d4   :  { %v2581_v53 = vmul.f32 %v6372_v60, %v2486_v50 }
 0x3d5   :  { %v2432_v23 = vpop.permute.xlu1 %2431 }
 0x3d6   :  { %v2487_v2 = vsel %vm385_vm7, %v2430_v0, %v2432_v23  ;;  %v2434_v37 = vpop.permute.xlu0 %2433  ;;  %v3572_v45 = vpack.c.bf16 %v2581_v53, %v2577_v33 }
 0x3d7   :  { %v2582_v6 = vmul.f32 %v6369_v41, %v2487_v2  ;;  %v2488_v62 = vsel %vm385_vm7, %v2432_v23, %v2434_v37  ;;  %v2548_v11 = vsel %vm385_vm7, %v2434_v37, %v2428_v22 }
 0x3d8   :  { %v2583_v15 = vmul.f32 %v6376_v59, %v2488_v62  ;;  %v2584_v29 = vmul.f32 %v6381_v42, %v2548_v11 }
 0x3d9   :  { %v2436_v3 = vpop.permute.xlu1 %2435  ;;  %v3570_v48 = vpack.c.bf16 %v2582_v6, %v2578_v1 }
 0x3da   :  { %v3716_v56 = vpack.c.bf16 %v2583_v15, %v2579_v26  ;;  %v2438_v7 = vpop.permute.xlu0 %2437  ;;  %v3714_v31 = vpack.c.bf16 %v2584_v29, %v2580_v14 }
 0x3db   :  { %3571 = vmatprep.subr.bf16.mxu0 %v3570_v48  ;;  %v2489_v63 = vsel %vm385_vm7, %v2436_v3, %v2438_v7 }
 0x3dc   :  { %3573 = vmatpush1.bf16.msra.mxu0 %v3572_v45  ;;  %3715 = vmatprep.subr.bf16.mxu1 %v3714_v31  ;;  %v2585_v20 = vmul.f32 %v6372_v60, %v2489_v63 }
 0x3dd   :  { %v2440_v52 = vpop.permute.xlu1 %2439  ;;  %3717 = vmatpush1.bf16.msra.mxu1 %v3716_v56 }
 0x3de   :  { %v2442_v32 = vpop.permute.xlu0 %2441  ;;  %v2490_v5 = vsel %vm385_vm7, %v2438_v7, %v2440_v52 }
 0x3df   :  { %v2491_v8 = vsel %vm385_vm7, %v2440_v52, %v2442_v32  ;;  %v2549_v36 = vsel %vm385_vm7, %v2442_v32, %v2436_v3  ;;  %v2586_v47 = vmul.f32 %v6369_v41, %v2490_v5 }
 0x3e0   :  { %v2587_v25 = vmul.f32 %v6376_v59, %v2491_v8  ;;  %v2588_v61 = vmul.f32 %v6381_v42, %v2549_v36 }
 0x3e1   :  { %v2444_v35 = vpop.permute.xlu1 %2443 }
 0x3e2   :  { %v2446_v13 = vpop.permute.xlu0 %2445 }
 0x3e3   :  { %v2492_v44 = vsel %vm385_vm7, %v2444_v35, %v2446_v13 }
 0x3e4   :  { %v2589_v27 = vmul.f32 %v6372_v60, %v2492_v44 }
 0x3e5   :  { %v2448_v46 = vpop.permute.xlu1 %2447 }
 0x3e6   :  { %v2493_v40 = vsel %vm385_vm7, %v2446_v13, %v2448_v46  ;;  %v2450_v12 = vpop.permute.xlu0 %2449  ;;  %v3576_v43 = vpack.c.bf16 %v2589_v27, %v2585_v20 }
 0x3e7   :  { %v2590_v55 = vmul.f32 %v6369_v41, %v2493_v40  ;;  %v2494_v24 = vsel %vm385_vm7, %v2448_v46, %v2450_v12  ;;  %v2550_v34 = vsel %vm385_vm7, %v2450_v12, %v2444_v35 }
 0x3e8   :  { %v2591_v10 = vmul.f32 %v6376_v59, %v2494_v24  ;;  %v2592_v9 = vmul.f32 %v6381_v42, %v2550_v34 }
 0x3e9   :  { %v2452_v21 = vpop.permute.xlu1 %2451  ;;  %v3574_v16 = vpack.c.bf16 %v2590_v55, %v2586_v47 }
 0x3ea   :  { %v3720_v28 = vpack.c.bf16 %v2591_v10, %v2587_v25  ;;  %v2454_v38 = vpop.permute.xlu0 %2453  ;;  %v3718_v39 = vpack.c.bf16 %v2592_v9, %v2588_v61 }
 0x3eb   :  { %3575 = vmatprep.subr.bf16.mxu0 %v3574_v16  ;;  %v2495_v22 = vsel %vm385_vm7, %v2452_v21, %v2454_v38 }
 0x3ec   :  { %3577 = vmatpush1.bf16.msra.mxu0 %v3576_v43  ;;  %3719 = vmatprep.subr.bf16.mxu1 %v3718_v39  ;;  %v2593_v2 = vmul.f32 %v6372_v60, %v2495_v22 }
 0x3ed   :  { %v2456_v17 = vpop.permute.xlu1 %2455  ;;  %3721 = vmatpush1.bf16.msra.mxu1 %v3720_v28 }
 0x3ee   :  { %v2458_v51 = vpop.permute.xlu0 %2457  ;;  %v2496_v54 = vsel %vm385_vm7, %v2454_v38, %v2456_v17 }
 0x3ef   :  { %v2497_v0 = vsel %vm385_vm7, %v2456_v17, %v2458_v51  ;;  %v2551_v50 = vsel %vm385_vm7, %v2458_v51, %v2452_v21  ;;  %v2594_v23 = vmul.f32 %v6369_v41, %v2496_v54 }
 0x3f0   :  { %v2595_v1 = vmul.f32 %v6376_v59, %v2497_v0  ;;  %v2596_v33 = vmul.f32 %v6381_v42, %v2551_v50 }
 0x3f1   :  { %v2460_v57 = vpop.permute.xlu1 %2459 }
 0x3f2   :  { %v2462_v30 = vpop.permute.xlu0 %2461 }
 0x3f3   :  { %v2498_v49 = vsel %vm385_vm7, %v2460_v57, %v2462_v30 }
 0x3f4   :  { %v2597_v58 = vmul.f32 %v6372_v60, %v2498_v49 }
 0x3f5   :  { %v2464_v18 = vpop.permute.xlu1 %2463 }
 0x3f6   :  { %v2499_v4 = vsel %vm385_vm7, %v2462_v30, %v2464_v18  ;;  %v3580_v15 = vpack.c.bf16 %v2597_v58, %v2593_v2 }
 0x3f7   :  { %v2598_v19 = vmul.f32 %v6369_v41, %v2499_v4  ;;  %v2466_v53 = vpop.permute.xlu0 %2465 }
 0x3f8   :  { %v2500_v6 = vsel %vm385_vm7, %v2464_v18, %v2466_v53  ;;  %v2552_v37 = vsel %vm385_vm7, %v2466_v53, %v2460_v57 }
 0x3f9   :  { %v2599_v26 = vmul.f32 %v6376_v59, %v2500_v6  ;;  %v2600_v62 = vmul.f32 %v6381_v42, %v2552_v37  ;;  %v2468_v11 = vpop.permute.xlu1 %2467  ;;  %v3578_v14 = vpack.c.bf16 %v2598_v19, %v2594_v23 }
 0x3fb   :  { %v3724_v29 = vpack.c.bf16 %v2599_v26, %v2595_v1  ;;  %v2470_v3 = vpop.permute.xlu0 %2469  ;;  %3579 = vmatprep.subr.bf16.mxu0 %v3578_v14  ;;  %v3722_v48 = vpack.c.bf16 %v2600_v62, %v2596_v33 }
 0x3fc   :  { %3581 = vmatpush1.bf16.msra.mxu0 %v3580_v15  ;;  %v2501_v35 = vsel %vm385_vm7, %v2468_v11, %v2470_v3 }
 0x3fd   :  { %3723 = vmatprep.subr.bf16.mxu1 %v3722_v48  ;;  %v2472_v45 = vpop.permute.xlu1 %2471  ;;  %v2601_v40 = vmul.f32 %v6372_v60, %v2501_v35 }
 0x3fe   :  { %3725 = vmatpush1.bf16.msra.mxu1 %v3724_v29  ;;  %v2502_v52 = vsel %vm385_vm7, %v2470_v3, %v2472_v45 }
 0x3ff   :  { %v2474_v56 = vpop.permute.xlu0 %2473  ;;  %v2602_v46 = vmul.f32 %v6369_v41, %v2502_v52 }
 0x400   :  { %v2503_v13 = vsel %vm385_vm7, %v2472_v45, %v2474_v56  ;;  %v2553_v44 = vsel %vm385_vm7, %v2474_v56, %v2468_v11 }
 0x401   :  { %v2476_v7 = vpop.permute.xlu1 %2475  ;;  %v2603_v47 = vmul.f32 %v6376_v59, %v2503_v13  ;;  %v2604_v20 = vmul.f32 %v6381_v42, %v2553_v44 }
 0x403   :  { %v2478_v31 = vpop.permute.xlu0 %2477 }
 0x404   :  { %v2504_v32 = vsel %vm385_vm7, %v2476_v7, %v2478_v31 }
 0x405   :  { %v2480_v5 = vpop.permute.xlu1 %2479  ;;  %v2605_v63 = vmul.f32 %v6372_v60, %v2504_v32  ;;  %v2645_v60 = vld [vmem:[%s6463_s4 + $0x20] sm:$0xff] }
 0x406   :  { %v2505_v8 = vsel %vm385_vm7, %v2478_v31, %v2480_v5 }
 0x407   :  { %v2606_v36 = vmul.f32 %v6369_v41, %v2505_v8  ;;  %v2482_v27 = vpop.permute.xlu0 %2481  ;;  %v3584_v61 = vpack.c.bf16 %v2605_v63, %v2601_v40 }
 0x408   :  { %v2506_v55 = vsel %vm385_vm7, %v2480_v5, %v2482_v27  ;;  %v2554_v12 = vsel %vm385_vm7, %v2482_v27, %v2476_v7 }
 0x409   :  { %v2607_v25 = vmul.f32 %v6376_v59, %v2506_v55  ;;  %v2608_v24 = vmul.f32 %v6381_v42, %v2554_v12  ;;  %v3582_v34 = vpack.c.bf16 %v2606_v36, %v2602_v46 }
 0x40b   :  { %v3728_v10 = vpack.c.bf16 %v2607_v25, %v2603_v47  ;;  %3583 = vmatprep.subr.bf16.mxu0 %v3582_v34  ;;  %v3726_v41 = vpack.c.bf16 %v2608_v24, %v2604_v20 }
 0x40c   :  { %3585 = vmatpush1.bf16.msra.mxu0 %v3584_v61 }
 0x40d   :  { %3727 = vmatprep.subr.bf16.mxu1 %v3726_v41 }
 0x40e   :  { %3729 = vmatpush1.bf16.msra.mxu1 %v3728_v10 }
 0x40f   :  { %3408 = vmatmul.mubr.msk.f32.vlgmr.msra.gmra.mrb[16].mxu0 %vm2940_vm9, %v2645_v60 }
 0x411   :  { %3409 = vmatmul.mubr.msk.f32.vlgmr.msra.gmra.mrb[16].mxu1 %vm2940_vm9, %v2645_v60 }
 0x415   :  { %v2938_v9 = vpop.permute.xlu1 %2937 }
 0x4e2   :  { %v3152_v21 = vpop.f32.mrb[16].mxu0 }
 0x4e3   :  { %v3730_v59 = vadd.f32 %v3152_v21, %v2938_v9  ;;  %v3154_v16 = vpop.f32.mrb[17].mxu0 }
 0x4e4   :  { %v3731_v42 = vadd.f32 %v3154_v16, %v2938_v9  ;;  %v3365_v43 = vpop.f32.mrb[16].mxu1 }
 0x4e5   :  { %3370 = vst [vmem:[%s6465_s6] sm:$0xff] %v3730_v59  ;;  %v3732_v28 = vadd.f32 %v3365_v43, %v2938_v9  ;;  %v3367_v38 = vpop.f32.mrb[17].mxu1 }
 0x4e6   :  { %3371 = vst [vmem:[%s6465_s6 + $0x8] sm:$0xff] %v3731_v42  ;;  %v3733_v39 = vadd.f32 %v3367_v38, %v2938_v9 }
 0x4e7   :  { %3372 = vst [vmem:[%s6465_s6 + $0x10] sm:$0xff] %v3732_v28 }
 0x4e8   :  { %3373 = vst [vmem:[%s6465_s6 + $0x18] sm:$0xff] %v3733_v39 }

</bundles_post_ra>
